<compile_context>
chip_gen: v6e
topology: v6e:2x2x1
jax: 0.10.0
libtpu: 0.0.40
codegen_flags: <defaults>
</compile_context>

<pallas_src>
import jax
import jax.numpy as jnp
from jax import lax
from jax.experimental import pallas as pl
from jax.experimental.pallas import tpu as pltpu


def _make_layer_kernel(B, P, K, C, Ho, Wo, Hq, Wq):
    """Fused conv-GEMM + BN + ReLU + 2x2 maxpool kernel for one encoder layer.

    The kernel processes B images stacked along the GEMM row dimension.
    All of B, P, K, C, Ho, Wo, Hq, Wq are Python statics (baked into the trace).
    """
    Q = Hq * Wq

    def kernel(p_ref, w_ref, scale_ref, shift_ref, o_ref, z_ref):
        # p_ref:     (1, B*P, K)  bf16 im2col patches, P = Ho*Wo, K = 9*Cin
        # w_ref:     (K, C)       bf16 conv weight as GEMM matrix ((dy, dx, cin) -> cout)
        # scale_ref: (1, C)       f32 folded BN scale  = gamma / sqrt(var + eps)
        # shift_ref: (1, C)       f32 folded BN shift  = beta + (bias - mean) * scale
        # o_ref:     (1, B*Q, C)  f32 pooled output, Q = (Ho//2)*(Wo//2)
        # z_ref:     (B*P, C)     f32 VMEM scratch holding the pre-pool activations

        # Conv as a single GEMM on the MXU (bf16 operands, f32 accumulation),
        # then BN (folded affine) + ReLU on the VPU; stash result in VMEM scratch.
        z = jnp.dot(p_ref[0], w_ref[...], preferred_element_type=jnp.float32)
        z_ref[...] = jnp.maximum(z * scale_ref[...] + shift_ref[...], 0.0)

        def row(start):
            # One pooled output row's worth of candidates: every other activation
            # row starting at `start` (sublane-strided load from VMEM scratch).
            if Wq == 1:
                return z_ref[pl.ds(start, 1), :]
            return z_ref[pl.ds(start, Wq, stride=2), :]

        # 2x2 / stride-2 max pool (floor): for each pooled row take the elementwise
        # max over the 4 window positions.  Static starts/sizes/strides; odd Ho/Wo
        # is handled naturally because only the needed indices are ever read.
        for b in range(B):
            for hq in range(Hq):
                r0 = b * P + (2 * hq) * Wo        # activation row (h = 2*hq,   w = 0)
                r1 = r0 + Wo                      # activation row (h = 2*hq+1, w = 0)
                m = jnp.maximum(jnp.maximum(row(r0), row(r0 + 1)),
                                jnp.maximum(row(r1), row(r1 + 1)))
                o_ref[0, pl.ds(b * Q + hq * Wq, Wq), :] = m

    return kernel


def conv_bn_relu_pool(x_nhwc, layer_params, pad):
    """One encoder layer: Conv3x3(pad) -> BN(eval) -> ReLU -> MaxPool2d(2)."""
    w, b, gamma, beta, rmean, rvar = layer_params  # w: (Cout, Cin, 3, 3) (PyTorch layout)
    eps = 1e-5
    N, H, W, Cin = x_nhwc.shape
    Cout = w.shape[0]

    xp = jnp.pad(x_nhwc, ((0, 0), (pad, pad), (pad, pad), (0, 0)))
    Hp, Wp = H + 2 * pad, W + 2 * pad
    Ho, Wo = Hp - 2, Wp - 2
    Hq, Wq = Ho // 2, Wo // 2
    assert Hq >= 1 and Wq >= 1, "spatial size too small for MaxPool2d(2)"
    P, K, Q = Ho * Wo, 9 * Cin, Hq * Wq

    # --- glue (plain JAX): im2col in bf16, weight reshape, BN folding ---
    xb = xp.astype(jnp.bfloat16)
    patches = jnp.concatenate(
        [xb[:, dy:dy + Ho, dx:dx + Wo, :] for dy in range(3) for dx in range(3)],
        axis=-1).reshape(N, P, K)                                      # (N, Ho*Wo, 9*Cin)
    wmat = jnp.transpose(w, (2, 3, 1, 0)).reshape(K, Cout).astype(jnp.bfloat16)
    inv = gamma / jnp.sqrt(rvar + eps)
    scale = inv.reshape(1, Cout).astype(jnp.float32)
    shift = (beta + (b - rmean) * inv).reshape(1, Cout).astype(jnp.float32)

    # Big layers: one image per grid step so the batch axis can shard across
    # TensorCores (megacore on v7x).  Small later layers: whole batch in a single
    # grid step (amortize per-step overhead, feed the MXU more rows).
    if P >= 512:
        G, B = N, 1
    else:
        G, B = 1, N
    patches = patches.reshape(G, B * P, K)

    kernel = _make_layer_kernel(B, P, K, Cout, Ho, Wo, Hq, Wq)
    out = pl.pallas_call(
        kernel,
        out_shape=jax.ShapeDtypeStruct((G, B * Q, Cout), jnp.float32),
        grid=(G,),
        in_specs=[
            pl.BlockSpec((1, B * P, K), lambda g: (g, 0, 0)),
            pl.BlockSpec((K, Cout), lambda g: (0, 0)),
            pl.BlockSpec((1, Cout), lambda g: (0, 0)),
            pl.BlockSpec((1, Cout), lambda g: (0, 0)),
        ],
        out_specs=pl.BlockSpec((1, B * Q, Cout), lambda g: (g, 0, 0)),
        scratch_shapes=[pltpu.VMEM((B * P, Cout), jnp.float32)],
        compiler_params=pltpu.CompilerParams(dimension_semantics=("parallel",)),
    )(patches, wmat, scale, shift)
    return out.reshape(N, Hq, Wq, Cout)


def init_params(key):
    """Deterministic synthetic parameters matching CNNEncoder.__init__ shapes."""
    def conv_bn(k, cin, cout):
        k1, k2, k3, k4 = jax.random.split(k, 4)
        w = jax.random.normal(k1, (cout, cin, 3, 3), jnp.float32) / jnp.sqrt(9.0 * cin)
        b = 0.01 * jax.random.normal(k2, (cout,), jnp.float32)
        gamma = 1.0 + 0.1 * jax.random.normal(k3, (cout,), jnp.float32)
        beta = 0.1 * jax.random.normal(k4, (cout,), jnp.float32)
        rmean = jnp.zeros((cout,), jnp.float32)
        rvar = jnp.ones((cout,), jnp.float32)
        return (w, b, gamma, beta, rmean, rvar)

    ks = jax.random.split(key, 4)
    return [conv_bn(ks[0], 3, 64), conv_bn(ks[1], 64, 64),
            conv_bn(ks[2], 64, 64), conv_bn(ks[3], 64, 64)]


def cnn_encoder_forward(x_nchw, params):
    """CNNEncoder.forward: 4 x (conv -> BN -> ReLU -> maxpool) then flatten."""
    x = jnp.transpose(x_nchw, (0, 2, 3, 1))          # NCHW -> NHWC
    pads = (0, 0, 1, 1)                              # layer1/2: padding=0, layer3/4: padding=1
    for layer_params, pad in zip(params, pads):
        x = conv_bn_relu_pool(x, layer_params, pad)
    x = jnp.transpose(x, (0, 3, 1, 2))               # back to NCHW for PyTorch flatten order
    return x.reshape(x.shape[0], -1)                 # out.view(out.size(0), -1)


def _reference_forward(x_nchw, params):
    """Pure-JAX reference (lax.conv / reduce_window) for correctness checking.

    The conv uses bf16 operands + f32 accumulation to match the kernel's numerics
    model, so the comparison is a tight structural check.
    """
    x = jnp.transpose(x_nchw, (0, 2, 3, 1))
    pads = (0, 0, 1, 1)
    eps = 1e-5
    for (w, b, gamma, beta, rmean, rvar), pad in zip(params, pads):
        whwio = jnp.transpose(w, (2, 3, 1, 0))
        y = lax.conv_general_dilated(
            x.astype(jnp.bfloat16), whwio.astype(jnp.bfloat16),
            window_strides=(1, 1), padding=[(pad, pad), (pad, pad)],
            dimension_numbers=("NHWC", "HWIO", "NHWC"),
            preferred_element_type=jnp.float32) + b
        y = (y - rmean) / jnp.sqrt(rvar + eps) * gamma + beta
        y = jnp.maximum(y, 0.0)
        y = lax.reduce_window(y, -jnp.inf, lax.max,
                              (1, 2, 2, 1), (1, 2, 2, 1), "VALID")
        x = y
    x = jnp.transpose(x, (0, 3, 1, 2))
    return x.reshape(x.shape[0], -1)


if __name__ == "__main__":
    key = jax.random.PRNGKey(0)
    kx, kp = jax.random.split(key)
    # NCHW input like PyTorch: batch=2, 3 channels, 32x32 spatial
    # (32 -> 15 -> 6 -> 3 -> 1 through the four layers; final feature dim = 64).
    x = jax.random.normal(kx, (2, 3, 32, 32), jnp.float32)
    params = init_params(kp)

    feats = jax.block_until_ready(jax.jit(cnn_encoder_forward)(x, params))
    ref = jax.block_until_ready(_reference_forward(x, params))

    assert feats.shape == (2, 64), feats.shape
    assert jnp.allclose(feats, ref, rtol=2e-2, atol=2e-2), \
        float(jnp.max(jnp.abs(feats - ref)))
    print("KERNEL_OK")
</pallas_src>

<mosaic_0001>
module attributes {stable_mosaic.version = 11 : i64} {
  func.func @kernel(%arg0: i32, %arg1: memref<1x900x27xbf16, #tpu.memory_space<vmem>>, %arg2: memref<27x64xbf16, #tpu.memory_space<vmem>>, %arg3: memref<1x64xf32, #tpu.memory_space<vmem>>, %arg4: memref<1x64xf32, #tpu.memory_space<vmem>>, %arg5: memref<1x225x64xf32, #tpu.memory_space<vmem>>, %arg6: memref<900x64xf32, #tpu.memory_space<vmem>>) attributes {dimension_semantics = [#tpu.dimension_semantics<parallel>], iteration_bounds = array<i64: 2>, scalar_prefetch = 0 : i64, scratch_operands = 1 : i64, tpu.core_type = #tpu.core_type<tc>, window_params = [{transform_indices = @transform_0, window_bounds = array<i64: 1, 900, 27>}, {pipeline_mode = #tpu.pipeline_mode<synchronous>, transform_indices = @transform_1, window_bounds = array<i64: 27, 64>}, {pipeline_mode = #tpu.pipeline_mode<synchronous>, transform_indices = @transform_2, window_bounds = array<i64: 1, 64>}, {pipeline_mode = #tpu.pipeline_mode<synchronous>, transform_indices = @transform_3, window_bounds = array<i64: 1, 64>}, {transform_indices = @transform_4, window_bounds = array<i64: 1, 225, 64>}]} {
    %c0 = arith.constant 0 : index
    %c0_0 = arith.constant 0 : index
    %c0_1 = arith.constant 0 : index
    %0 = vector.load %arg1[%c0, %c0_0, %c0_1] : memref<1x900x27xbf16, #tpu.memory_space<vmem>>, vector<1x900x27xbf16>
    %1 = vector.shape_cast %0 : vector<1x900x27xbf16> to vector<900x27xbf16>
    %c0_2 = arith.constant 0 : index
    %c0_3 = arith.constant 0 : index
    %2 = vector.load %arg2[%c0_2, %c0_3] : memref<27x64xbf16, #tpu.memory_space<vmem>>, vector<27x64xbf16>
    %cst = arith.constant dense<0.000000e+00> : vector<900x64xf32>
    %3 = tpu.matmul %1, %2, %cst {dimension_numbers = #tpu.dot_dimension_numbers<[1], [0], [0], [1], [0, 0, 1, 1], [], []>} : vector<900x27xbf16>, vector<27x64xbf16>, vector<900x64xf32> -> vector<900x64xf32>
    %c0_4 = arith.constant 0 : index
    %c0_5 = arith.constant 0 : index
    %4 = vector.load %arg3[%c0_4, %c0_5] : memref<1x64xf32, #tpu.memory_space<vmem>>, vector<1x64xf32>
    %5 = vector.broadcast %4 : vector<1x64xf32> to vector<900x64xf32>
    %6 = arith.mulf %3, %5 : vector<900x64xf32>
    %c0_6 = arith.constant 0 : index
    %c0_7 = arith.constant 0 : index
    %7 = vector.load %arg4[%c0_6, %c0_7] : memref<1x64xf32, #tpu.memory_space<vmem>>, vector<1x64xf32>
    %8 = vector.broadcast %7 : vector<1x64xf32> to vector<900x64xf32>
    %9 = arith.addf %6, %8 : vector<900x64xf32>
    %cst_8 = arith.constant 0.000000e+00 : f32
    %10 = vector.broadcast %cst_8 : f32 to vector<900x64xf32>
    %11 = arith.maximumf %9, %10 : vector<900x64xf32>
    %c0_9 = arith.constant 0 : index
    %c0_10 = arith.constant 0 : index
    %12 = vector.load %arg6[%c0_9, %c0_10] : memref<900x64xf32, #tpu.memory_space<vmem>>, vector<900x64xf32>
    tpu.vector_store %arg6[%c0_9, %c0_10], %11 {strides = array<i32>} : memref<900x64xf32, #tpu.memory_space<vmem>>, vector<900x64xf32>,
    %c0_11 = arith.constant 0 : index
    %c0_12 = arith.constant 0 : index
    %13 = tpu.strided_load %arg6[%c0_11, %c0_12] {strides = array<i32: 2, 1>} : memref<900x64xf32, #tpu.memory_space<vmem>>, vector<15x64xf32>
    %c1 = arith.constant 1 : index
    %c0_13 = arith.constant 0 : index
    %14 = tpu.strided_load %arg6[%c1, %c0_13] {strides = array<i32: 2, 1>} : memref<900x64xf32, #tpu.memory_space<vmem>>, vector<15x64xf32>
    %15 = arith.maximumf %13, %14 : vector<15x64xf32>
    %c30 = arith.constant 30 : index
    %c0_14 = arith.constant 0 : index
    %16 = tpu.strided_load %arg6[%c30, %c0_14] {strides = array<i32: 2, 1>} : memref<900x64xf32, #tpu.memory_space<vmem>>, vector<15x64xf32>
    %c31 = arith.constant 31 : index
    %c0_15 = arith.constant 0 : index
    %17 = tpu.strided_load %arg6[%c31, %c0_15] {strides = array<i32: 2, 1>} : memref<900x64xf32, #tpu.memory_space<vmem>>, vector<15x64xf32>
    %18 = arith.maximumf %16, %17 : vector<15x64xf32>
    %19 = arith.maximumf %15, %18 : vector<15x64xf32>
    %c0_16 = arith.constant 0 : index
    %c0_17 = arith.constant 0 : index
    %c0_18 = arith.constant 0 : index
    %20 = vector.load %arg5[%c0_16, %c0_17, %c0_18] : memref<1x225x64xf32, #tpu.memory_space<vmem>>, vector<1x15x64xf32>
    %21 = vector.shape_cast %20 : vector<1x15x64xf32> to vector<15x64xf32>
    %22 = vector.shape_cast %19 : vector<15x64xf32> to vector<1x15x64xf32>
    tpu.vector_store %arg5[%c0_16, %c0_17, %c0_18], %22 {strides = array<i32>} : memref<1x225x64xf32, #tpu.memory_space<vmem>>, vector<1x15x64xf32>,
    %c60 = arith.constant 60 : index
    %c0_19 = arith.constant 0 : index
    %23 = tpu.strided_load %arg6[%c60, %c0_19] {strides = array<i32: 2, 1>} : memref<900x64xf32, #tpu.memory_space<vmem>>, vector<15x64xf32>
    %c61 = arith.constant 61 : index
    %c0_20 = arith.constant 0 : index
    %24 = tpu.strided_load %arg6[%c61, %c0_20] {strides = array<i32: 2, 1>} : memref<900x64xf32, #tpu.memory_space<vmem>>, vector<15x64xf32>
    %25 = arith.maximumf %23, %24 : vector<15x64xf32>
    %c90 = arith.constant 90 : index
    %c0_21 = arith.constant 0 : index
    %26 = tpu.strided_load %arg6[%c90, %c0_21] {strides = array<i32: 2, 1>} : memref<900x64xf32, #tpu.memory_space<vmem>>, vector<15x64xf32>
    %c91 = arith.constant 91 : index
    %c0_22 = arith.constant 0 : index
    %27 = tpu.strided_load %arg6[%c91, %c0_22] {strides = array<i32: 2, 1>} : memref<900x64xf32, #tpu.memory_space<vmem>>, vector<15x64xf32>
    %28 = arith.maximumf %26, %27 : vector<15x64xf32>
    %29 = arith.maximumf %25, %28 : vector<15x64xf32>
    %c0_23 = arith.constant 0 : index
    %c15 = arith.constant 15 : index
    %c0_24 = arith.constant 0 : index
    %30 = vector.load %arg5[%c0_23, %c15, %c0_24] : memref<1x225x64xf32, #tpu.memory_space<vmem>>, vector<1x15x64xf32>
    %31 = vector.shape_cast %30 : vector<1x15x64xf32> to vector<15x64xf32>
    %32 = vector.shape_cast %29 : vector<15x64xf32> to vector<1x15x64xf32>
    tpu.vector_store %arg5[%c0_23, %c15, %c0_24], %32 {strides = array<i32>} : memref<1x225x64xf32, #tpu.memory_space<vmem>>, vector<1x15x64xf32>,
    %c120 = arith.constant 120 : index
    %c0_25 = arith.constant 0 : index
    %33 = tpu.strided_load %arg6[%c120, %c0_25] {strides = array<i32: 2, 1>} : memref<900x64xf32, #tpu.memory_space<vmem>>, vector<15x64xf32>
    %c121 = arith.constant 121 : index
    %c0_26 = arith.constant 0 : index
    %34 = tpu.strided_load %arg6[%c121, %c0_26] {strides = array<i32: 2, 1>} : memref<900x64xf32, #tpu.memory_space<vmem>>, vector<15x64xf32>
    %35 = arith.maximumf %33, %34 : vector<15x64xf32>
    %c150 = arith.constant 150 : index
    %c0_27 = arith.constant 0 : index
    %36 = tpu.strided_load %arg6[%c150, %c0_27] {strides = array<i32: 2, 1>} : memref<900x64xf32, #tpu.memory_space<vmem>>, vector<15x64xf32>
    %c151 = arith.constant 151 : index
    %c0_28 = arith.constant 0 : index
    %37 = tpu.strided_load %arg6[%c151, %c0_28] {strides = array<i32: 2, 1>} : memref<900x64xf32, #tpu.memory_space<vmem>>, vector<15x64xf32>
    %38 = arith.maximumf %36, %37 : vector<15x64xf32>
    %39 = arith.maximumf %35, %38 : vector<15x64xf32>
    %c0_29 = arith.constant 0 : index
    %c30_30 = arith.constant 30 : index
    %c0_31 = arith.constant 0 : index
    %40 = vector.load %arg5[%c0_29, %c30_30, %c0_31] : memref<1x225x64xf32, #tpu.memory_space<vmem>>, vector<1x15x64xf32>
    %41 = vector.shape_cast %40 : vector<1x15x64xf32> to vector<15x64xf32>
    %42 = vector.shape_cast %39 : vector<15x64xf32> to vector<1x15x64xf32>
    tpu.vector_store %arg5[%c0_29, %c30_30, %c0_31], %42 {strides = array<i32>} : memref<1x225x64xf32, #tpu.memory_space<vmem>>, vector<1x15x64xf32>,
    %c180 = arith.constant 180 : index
    %c0_32 = arith.constant 0 : index
    %43 = tpu.strided_load %arg6[%c180, %c0_32] {strides = array<i32: 2, 1>} : memref<900x64xf32, #tpu.memory_space<vmem>>, vector<15x64xf32>
    %c181 = arith.constant 181 : index
    %c0_33 = arith.constant 0 : index
    %44 = tpu.strided_load %arg6[%c181, %c0_33] {strides = array<i32: 2, 1>} : memref<900x64xf32, #tpu.memory_space<vmem>>, vector<15x64xf32>
    %45 = arith.maximumf %43, %44 : vector<15x64xf32>
    %c210 = arith.constant 210 : index
    %c0_34 = arith.constant 0 : index
    %46 = tpu.strided_load %arg6[%c210, %c0_34] {strides = array<i32: 2, 1>} : memref<900x64xf32, #tpu.memory_space<vmem>>, vector<15x64xf32>
    %c211 = arith.constant 211 : index
    %c0_35 = arith.constant 0 : index
    %47 = tpu.strided_load %arg6[%c211, %c0_35] {strides = array<i32: 2, 1>} : memref<900x64xf32, #tpu.memory_space<vmem>>, vector<15x64xf32>
    %48 = arith.maximumf %46, %47 : vector<15x64xf32>
    %49 = arith.maximumf %45, %48 : vector<15x64xf32>
    %c0_36 = arith.constant 0 : index
    %c45 = arith.constant 45 : index
    %c0_37 = arith.constant 0 : index
    %50 = vector.load %arg5[%c0_36, %c45, %c0_37] : memref<1x225x64xf32, #tpu.memory_space<vmem>>, vector<1x15x64xf32>
    %51 = vector.shape_cast %50 : vector<1x15x64xf32> to vector<15x64xf32>
    %52 = vector.shape_cast %49 : vector<15x64xf32> to vector<1x15x64xf32>
    tpu.vector_store %arg5[%c0_36, %c45, %c0_37], %52 {strides = array<i32>} : memref<1x225x64xf32, #tpu.memory_space<vmem>>, vector<1x15x64xf32>,
    %c240 = arith.constant 240 : index
    %c0_38 = arith.constant 0 : index
    %53 = tpu.strided_load %arg6[%c240, %c0_38] {strides = array<i32: 2, 1>} : memref<900x64xf32, #tpu.memory_space<vmem>>, vector<15x64xf32>
    %c241 = arith.constant 241 : index
    %c0_39 = arith.constant 0 : index
    %54 = tpu.strided_load %arg6[%c241, %c0_39] {strides = array<i32: 2, 1>} : memref<900x64xf32, #tpu.memory_space<vmem>>, vector<15x64xf32>
    %55 = arith.maximumf %53, %54 : vector<15x64xf32>
    %c270 = arith.constant 270 : index
    %c0_40 = arith.constant 0 : index
    %56 = tpu.strided_load %arg6[%c270, %c0_40] {strides = array<i32: 2, 1>} : memref<900x64xf32, #tpu.memory_space<vmem>>, vector<15x64xf32>
    %c271 = arith.constant 271 : index
    %c0_41 = arith.constant 0 : index
    %57 = tpu.strided_load %arg6[%c271, %c0_41] {strides = array<i32: 2, 1>} : memref<900x64xf32, #tpu.memory_space<vmem>>, vector<15x64xf32>
    %58 = arith.maximumf %56, %57 : vector<15x64xf32>
    %59 = arith.maximumf %55, %58 : vector<15x64xf32>
    %c0_42 = arith.constant 0 : index
    %c60_43 = arith.constant 60 : index
    %c0_44 = arith.constant 0 : index
    %60 = vector.load %arg5[%c0_42, %c60_43, %c0_44] : memref<1x225x64xf32, #tpu.memory_space<vmem>>, vector<1x15x64xf32>
    %61 = vector.shape_cast %60 : vector<1x15x64xf32> to vector<15x64xf32>
    %62 = vector.shape_cast %59 : vector<15x64xf32> to vector<1x15x64xf32>
    tpu.vector_store %arg5[%c0_42, %c60_43, %c0_44], %62 {strides = array<i32>} : memref<1x225x64xf32, #tpu.memory_space<vmem>>, vector<1x15x64xf32>,
    %c300 = arith.constant 300 : index
    %c0_45 = arith.constant 0 : index
    %63 = tpu.strided_load %arg6[%c300, %c0_45] {strides = array<i32: 2, 1>} : memref<900x64xf32, #tpu.memory_space<vmem>>, vector<15x64xf32>
    %c301 = arith.constant 301 : index
    %c0_46 = arith.constant 0 : index
    %64 = tpu.strided_load %arg6[%c301, %c0_46] {strides = array<i32: 2, 1>} : memref<900x64xf32, #tpu.memory_space<vmem>>, vector<15x64xf32>
    %65 = arith.maximumf %63, %64 : vector<15x64xf32>
    %c330 = arith.constant 330 : index
    %c0_47 = arith.constant 0 : index
    %66 = tpu.strided_load %arg6[%c330, %c0_47] {strides = array<i32: 2, 1>} : memref<900x64xf32, #tpu.memory_space<vmem>>, vector<15x64xf32>
    %c331 = arith.constant 331 : index
    %c0_48 = arith.constant 0 : index
    %67 = tpu.strided_load %arg6[%c331, %c0_48] {strides = array<i32: 2, 1>} : memref<900x64xf32, #tpu.memory_space<vmem>>, vector<15x64xf32>
    %68 = arith.maximumf %66, %67 : vector<15x64xf32>
    %69 = arith.maximumf %65, %68 : vector<15x64xf32>
    %c0_49 = arith.constant 0 : index
    %c75 = arith.constant 75 : index
    %c0_50 = arith.constant 0 : index
    %70 = vector.load %arg5[%c0_49, %c75, %c0_50] : memref<1x225x64xf32, #tpu.memory_space<vmem>>, vector<1x15x64xf32>
    %71 = vector.shape_cast %70 : vector<1x15x64xf32> to vector<15x64xf32>
    %72 = vector.shape_cast %69 : vector<15x64xf32> to vector<1x15x64xf32>
    tpu.vector_store %arg5[%c0_49, %c75, %c0_50], %72 {strides = array<i32>} : memref<1x225x64xf32, #tpu.memory_space<vmem>>, vector<1x15x64xf32>,
    %c360 = arith.constant 360 : index
    %c0_51 = arith.constant 0 : index
    %73 = tpu.strided_load %arg6[%c360, %c0_51] {strides = array<i32: 2, 1>} : memref<900x64xf32, #tpu.memory_space<vmem>>, vector<15x64xf32>
    %c361 = arith.constant 361 : index
    %c0_52 = arith.constant 0 : index
    %74 = tpu.strided_load %arg6[%c361, %c0_52] {strides = array<i32: 2, 1>} : memref<900x64xf32, #tpu.memory_space<vmem>>, vector<15x64xf32>
    %75 = arith.maximumf %73, %74 : vector<15x64xf32>
    %c390 = arith.constant 390 : index
    %c0_53 = arith.constant 0 : index
    %76 = tpu.strided_load %arg6[%c390, %c0_53] {strides = array<i32: 2, 1>} : memref<900x64xf32, #tpu.memory_space<vmem>>, vector<15x64xf32>
    %c391 = arith.constant 391 : index
    %c0_54 = arith.constant 0 : index
    %77 = tpu.strided_load %arg6[%c391, %c0_54] {strides = array<i32: 2, 1>} : memref<900x64xf32, #tpu.memory_space<vmem>>, vector<15x64xf32>
    %78 = arith.maximumf %76, %77 : vector<15x64xf32>
    %79 = arith.maximumf %75, %78 : vector<15x64xf32>
    %c0_55 = arith.constant 0 : index
    %c90_56 = arith.constant 90 : index
    %c0_57 = arith.constant 0 : index
    %80 = vector.load %arg5[%c0_55, %c90_56, %c0_57] : memref<1x225x64xf32, #tpu.memory_space<vmem>>, vector<1x15x64xf32>
    %81 = vector.shape_cast %80 : vector<1x15x64xf32> to vector<15x64xf32>
    %82 = vector.shape_cast %79 : vector<15x64xf32> to vector<1x15x64xf32>
    tpu.vector_store %arg5[%c0_55, %c90_56, %c0_57], %82 {strides = array<i32>} : memref<1x225x64xf32, #tpu.memory_space<vmem>>, vector<1x15x64xf32>,
    %c420 = arith.constant 420 : index
    %c0_58 = arith.constant 0 : index
    %83 = tpu.strided_load %arg6[%c420, %c0_58] {strides = array<i32: 2, 1>} : memref<900x64xf32, #tpu.memory_space<vmem>>, vector<15x64xf32>
    %c421 = arith.constant 421 : index
    %c0_59 = arith.constant 0 : index
    %84 = tpu.strided_load %arg6[%c421, %c0_59] {strides = array<i32: 2, 1>} : memref<900x64xf32, #tpu.memory_space<vmem>>, vector<15x64xf32>
    %85 = arith.maximumf %83, %84 : vector<15x64xf32>
    %c450 = arith.constant 450 : index
    %c0_60 = arith.constant 0 : index
    %86 = tpu.strided_load %arg6[%c450, %c0_60] {strides = array<i32: 2, 1>} : memref<900x64xf32, #tpu.memory_space<vmem>>, vector<15x64xf32>
    %c451 = arith.constant 451 : index
    %c0_61 = arith.constant 0 : index
    %87 = tpu.strided_load %arg6[%c451, %c0_61] {strides = array<i32: 2, 1>} : memref<900x64xf32, #tpu.memory_space<vmem>>, vector<15x64xf32>
    %88 = arith.maximumf %86, %87 : vector<15x64xf32>
    %89 = arith.maximumf %85, %88 : vector<15x64xf32>
    %c0_62 = arith.constant 0 : index
    %c105 = arith.constant 105 : index
    %c0_63 = arith.constant 0 : index
    %90 = vector.load %arg5[%c0_62, %c105, %c0_63] : memref<1x225x64xf32, #tpu.memory_space<vmem>>, vector<1x15x64xf32>
    %91 = vector.shape_cast %90 : vector<1x15x64xf32> to vector<15x64xf32>
    %92 = vector.shape_cast %89 : vector<15x64xf32> to vector<1x15x64xf32>
    tpu.vector_store %arg5[%c0_62, %c105, %c0_63], %92 {strides = array<i32>} : memref<1x225x64xf32, #tpu.memory_space<vmem>>, vector<1x15x64xf32>,
    %c480 = arith.constant 480 : index
    %c0_64 = arith.constant 0 : index
    %93 = tpu.strided_load %arg6[%c480, %c0_64] {strides = array<i32: 2, 1>} : memref<900x64xf32, #tpu.memory_space<vmem>>, vector<15x64xf32>
    %c481 = arith.constant 481 : index
    %c0_65 = arith.constant 0 : index
    %94 = tpu.strided_load %arg6[%c481, %c0_65] {strides = array<i32: 2, 1>} : memref<900x64xf32, #tpu.memory_space<vmem>>, vector<15x64xf32>
    %95 = arith.maximumf %93, %94 : vector<15x64xf32>
    %c510 = arith.constant 510 : index
    %c0_66 = arith.constant 0 : index
    %96 = tpu.strided_load %arg6[%c510, %c0_66] {strides = array<i32: 2, 1>} : memref<900x64xf32, #tpu.memory_space<vmem>>, vector<15x64xf32>
    %c511 = arith.constant 511 : index
    %c0_67 = arith.constant 0 : index
    %97 = tpu.strided_load %arg6[%c511, %c0_67] {strides = array<i32: 2, 1>} : memref<900x64xf32, #tpu.memory_space<vmem>>, vector<15x64xf32>
    %98 = arith.maximumf %96, %97 : vector<15x64xf32>
    %99 = arith.maximumf %95, %98 : vector<15x64xf32>
    %c0_68 = arith.constant 0 : index
    %c120_69 = arith.constant 120 : index
    %c0_70 = arith.constant 0 : index
    %100 = vector.load %arg5[%c0_68, %c120_69, %c0_70] : memref<1x225x64xf32, #tpu.memory_space<vmem>>, vector<1x15x64xf32>
    %101 = vector.shape_cast %100 : vector<1x15x64xf32> to vector<15x64xf32>
    %102 = vector.shape_cast %99 : vector<15x64xf32> to vector<1x15x64xf32>
    tpu.vector_store %arg5[%c0_68, %c120_69, %c0_70], %102 {strides = array<i32>} : memref<1x225x64xf32, #tpu.memory_space<vmem>>, vector<1x15x64xf32>,
    %c540 = arith.constant 540 : index
    %c0_71 = arith.constant 0 : index
    %103 = tpu.strided_load %arg6[%c540, %c0_71] {strides = array<i32: 2, 1>} : memref<900x64xf32, #tpu.memory_space<vmem>>, vector<15x64xf32>
    %c541 = arith.constant 541 : index
    %c0_72 = arith.constant 0 : index
    %104 = tpu.strided_load %arg6[%c541, %c0_72] {strides = array<i32: 2, 1>} : memref<900x64xf32, #tpu.memory_space<vmem>>, vector<15x64xf32>
    %105 = arith.maximumf %103, %104 : vector<15x64xf32>
    %c570 = arith.constant 570 : index
    %c0_73 = arith.constant 0 : index
    %106 = tpu.strided_load %arg6[%c570, %c0_73] {strides = array<i32: 2, 1>} : memref<900x64xf32, #tpu.memory_space<vmem>>, vector<15x64xf32>
    %c571 = arith.constant 571 : index
    %c0_74 = arith.constant 0 : index
    %107 = tpu.strided_load %arg6[%c571, %c0_74] {strides = array<i32: 2, 1>} : memref<900x64xf32, #tpu.memory_space<vmem>>, vector<15x64xf32>
    %108 = arith.maximumf %106, %107 : vector<15x64xf32>
    %109 = arith.maximumf %105, %108 : vector<15x64xf32>
    %c0_75 = arith.constant 0 : index
    %c135 = arith.constant 135 : index
    %c0_76 = arith.constant 0 : index
    %110 = vector.load %arg5[%c0_75, %c135, %c0_76] : memref<1x225x64xf32, #tpu.memory_space<vmem>>, vector<1x15x64xf32>
    %111 = vector.shape_cast %110 : vector<1x15x64xf32> to vector<15x64xf32>
    %112 = vector.shape_cast %109 : vector<15x64xf32> to vector<1x15x64xf32>
    tpu.vector_store %arg5[%c0_75, %c135, %c0_76], %112 {strides = array<i32>} : memref<1x225x64xf32, #tpu.memory_space<vmem>>, vector<1x15x64xf32>,
    %c600 = arith.constant 600 : index
    %c0_77 = arith.constant 0 : index
    %113 = tpu.strided_load %arg6[%c600, %c0_77] {strides = array<i32: 2, 1>} : memref<900x64xf32, #tpu.memory_space<vmem>>, vector<15x64xf32>
    %c601 = arith.constant 601 : index
    %c0_78 = arith.constant 0 : index
    %114 = tpu.strided_load %arg6[%c601, %c0_78] {strides = array<i32: 2, 1>} : memref<900x64xf32, #tpu.memory_space<vmem>>, vector<15x64xf32>
    %115 = arith.maximumf %113, %114 : vector<15x64xf32>
    %c630 = arith.constant 630 : index
    %c0_79 = arith.constant 0 : index
    %116 = tpu.strided_load %arg6[%c630, %c0_79] {strides = array<i32: 2, 1>} : memref<900x64xf32, #tpu.memory_space<vmem>>, vector<15x64xf32>
    %c631 = arith.constant 631 : index
    %c0_80 = arith.constant 0 : index
    %117 = tpu.strided_load %arg6[%c631, %c0_80] {strides = array<i32: 2, 1>} : memref<900x64xf32, #tpu.memory_space<vmem>>, vector<15x64xf32>
    %118 = arith.maximumf %116, %117 : vector<15x64xf32>
    %119 = arith.maximumf %115, %118 : vector<15x64xf32>
    %c0_81 = arith.constant 0 : index
    %c150_82 = arith.constant 150 : index
    %c0_83 = arith.constant 0 : index
    %120 = vector.load %arg5[%c0_81, %c150_82, %c0_83] : memref<1x225x64xf32, #tpu.memory_space<vmem>>, vector<1x15x64xf32>
    %121 = vector.shape_cast %120 : vector<1x15x64xf32> to vector<15x64xf32>
    %122 = vector.shape_cast %119 : vector<15x64xf32> to vector<1x15x64xf32>
    tpu.vector_store %arg5[%c0_81, %c150_82, %c0_83], %122 {strides = array<i32>} : memref<1x225x64xf32, #tpu.memory_space<vmem>>, vector<1x15x64xf32>,
    %c660 = arith.constant 660 : index
    %c0_84 = arith.constant 0 : index
    %123 = tpu.strided_load %arg6[%c660, %c0_84] {strides = array<i32: 2, 1>} : memref<900x64xf32, #tpu.memory_space<vmem>>, vector<15x64xf32>
    %c661 = arith.constant 661 : index
    %c0_85 = arith.constant 0 : index
    %124 = tpu.strided_load %arg6[%c661, %c0_85] {strides = array<i32: 2, 1>} : memref<900x64xf32, #tpu.memory_space<vmem>>, vector<15x64xf32>
    %125 = arith.maximumf %123, %124 : vector<15x64xf32>
    %c690 = arith.constant 690 : index
    %c0_86 = arith.constant 0 : index
    %126 = tpu.strided_load %arg6[%c690, %c0_86] {strides = array<i32: 2, 1>} : memref<900x64xf32, #tpu.memory_space<vmem>>, vector<15x64xf32>
    %c691 = arith.constant 691 : index
    %c0_87 = arith.constant 0 : index
    %127 = tpu.strided_load %arg6[%c691, %c0_87] {strides = array<i32: 2, 1>} : memref<900x64xf32, #tpu.memory_space<vmem>>, vector<15x64xf32>
    %128 = arith.maximumf %126, %127 : vector<15x64xf32>
    %129 = arith.maximumf %125, %128 : vector<15x64xf32>
    %c0_88 = arith.constant 0 : index
    %c165 = arith.constant 165 : index
    %c0_89 = arith.constant 0 : index
    %130 = vector.load %arg5[%c0_88, %c165, %c0_89] : memref<1x225x64xf32, #tpu.memory_space<vmem>>, vector<1x15x64xf32>
    %131 = vector.shape_cast %130 : vector<1x15x64xf32> to vector<15x64xf32>
    %132 = vector.shape_cast %129 : vector<15x64xf32> to vector<1x15x64xf32>
    tpu.vector_store %arg5[%c0_88, %c165, %c0_89], %132 {strides = array<i32>} : memref<1x225x64xf32, #tpu.memory_space<vmem>>, vector<1x15x64xf32>,
    %c720 = arith.constant 720 : index
    %c0_90 = arith.constant 0 : index
    %133 = tpu.strided_load %arg6[%c720, %c0_90] {strides = array<i32: 2, 1>} : memref<900x64xf32, #tpu.memory_space<vmem>>, vector<15x64xf32>
    %c721 = arith.constant 721 : index
    %c0_91 = arith.constant 0 : index
    %134 = tpu.strided_load %arg6[%c721, %c0_91] {strides = array<i32: 2, 1>} : memref<900x64xf32, #tpu.memory_space<vmem>>, vector<15x64xf32>
    %135 = arith.maximumf %133, %134 : vector<15x64xf32>
    %c750 = arith.constant 750 : index
    %c0_92 = arith.constant 0 : index
    %136 = tpu.strided_load %arg6[%c750, %c0_92] {strides = array<i32: 2, 1>} : memref<900x64xf32, #tpu.memory_space<vmem>>, vector<15x64xf32>
    %c751 = arith.constant 751 : index
    %c0_93 = arith.constant 0 : index
    %137 = tpu.strided_load %arg6[%c751, %c0_93] {strides = array<i32: 2, 1>} : memref<900x64xf32, #tpu.memory_space<vmem>>, vector<15x64xf32>
    %138 = arith.maximumf %136, %137 : vector<15x64xf32>
    %139 = arith.maximumf %135, %138 : vector<15x64xf32>
    %c0_94 = arith.constant 0 : index
    %c180_95 = arith.constant 180 : index
    %c0_96 = arith.constant 0 : index
    %140 = vector.load %arg5[%c0_94, %c180_95, %c0_96] : memref<1x225x64xf32, #tpu.memory_space<vmem>>, vector<1x15x64xf32>
    %141 = vector.shape_cast %140 : vector<1x15x64xf32> to vector<15x64xf32>
    %142 = vector.shape_cast %139 : vector<15x64xf32> to vector<1x15x64xf32>
    tpu.vector_store %arg5[%c0_94, %c180_95, %c0_96], %142 {strides = array<i32>} : memref<1x225x64xf32, #tpu.memory_space<vmem>>, vector<1x15x64xf32>,
    %c780 = arith.constant 780 : index
    %c0_97 = arith.constant 0 : index
    %143 = tpu.strided_load %arg6[%c780, %c0_97] {strides = array<i32: 2, 1>} : memref<900x64xf32, #tpu.memory_space<vmem>>, vector<15x64xf32>
    %c781 = arith.constant 781 : index
    %c0_98 = arith.constant 0 : index
    %144 = tpu.strided_load %arg6[%c781, %c0_98] {strides = array<i32: 2, 1>} : memref<900x64xf32, #tpu.memory_space<vmem>>, vector<15x64xf32>
    %145 = arith.maximumf %143, %144 : vector<15x64xf32>
    %c810 = arith.constant 810 : index
    %c0_99 = arith.constant 0 : index
    %146 = tpu.strided_load %arg6[%c810, %c0_99] {strides = array<i32: 2, 1>} : memref<900x64xf32, #tpu.memory_space<vmem>>, vector<15x64xf32>
    %c811 = arith.constant 811 : index
    %c0_100 = arith.constant 0 : index
    %147 = tpu.strided_load %arg6[%c811, %c0_100] {strides = array<i32: 2, 1>} : memref<900x64xf32, #tpu.memory_space<vmem>>, vector<15x64xf32>
    %148 = arith.maximumf %146, %147 : vector<15x64xf32>
    %149 = arith.maximumf %145, %148 : vector<15x64xf32>
    %c0_101 = arith.constant 0 : index
    %c195 = arith.constant 195 : index
    %c0_102 = arith.constant 0 : index
    %150 = vector.load %arg5[%c0_101, %c195, %c0_102] : memref<1x225x64xf32, #tpu.memory_space<vmem>>, vector<1x15x64xf32>
    %151 = vector.shape_cast %150 : vector<1x15x64xf32> to vector<15x64xf32>
    %152 = vector.shape_cast %149 : vector<15x64xf32> to vector<1x15x64xf32>
    tpu.vector_store %arg5[%c0_101, %c195, %c0_102], %152 {strides = array<i32>} : memref<1x225x64xf32, #tpu.memory_space<vmem>>, vector<1x15x64xf32>,
    %c840 = arith.constant 840 : index
    %c0_103 = arith.constant 0 : index
    %153 = tpu.strided_load %arg6[%c840, %c0_103] {strides = array<i32: 2, 1>} : memref<900x64xf32, #tpu.memory_space<vmem>>, vector<15x64xf32>
    %c841 = arith.constant 841 : index
    %c0_104 = arith.constant 0 : index
    %154 = tpu.strided_load %arg6[%c841, %c0_104] {strides = array<i32: 2, 1>} : memref<900x64xf32, #tpu.memory_space<vmem>>, vector<15x64xf32>
    %155 = arith.maximumf %153, %154 : vector<15x64xf32>
    %c870 = arith.constant 870 : index
    %c0_105 = arith.constant 0 : index
    %156 = tpu.strided_load %arg6[%c870, %c0_105] {strides = array<i32: 2, 1>} : memref<900x64xf32, #tpu.memory_space<vmem>>, vector<15x64xf32>
    %c871 = arith.constant 871 : index
    %c0_106 = arith.constant 0 : index
    %157 = tpu.strided_load %arg6[%c871, %c0_106] {strides = array<i32: 2, 1>} : memref<900x64xf32, #tpu.memory_space<vmem>>, vector<15x64xf32>
    %158 = arith.maximumf %156, %157 : vector<15x64xf32>
    %159 = arith.maximumf %155, %158 : vector<15x64xf32>
    %c0_107 = arith.constant 0 : index
    %c210_108 = arith.constant 210 : index
    %c0_109 = arith.constant 0 : index
    %160 = vector.load %arg5[%c0_107, %c210_108, %c0_109] : memref<1x225x64xf32, #tpu.memory_space<vmem>>, vector<1x15x64xf32>
    %161 = vector.shape_cast %160 : vector<1x15x64xf32> to vector<15x64xf32>
    %162 = vector.shape_cast %159 : vector<15x64xf32> to vector<1x15x64xf32>
    tpu.vector_store %arg5[%c0_107, %c210_108, %c0_109], %162 {strides = array<i32>} : memref<1x225x64xf32, #tpu.memory_space<vmem>>, vector<1x15x64xf32>,
    return
  }
  func.func @transform_0(%arg0: i32) -> (i32, i32, i32) {
    %c0_i32 = arith.constant 0 : i32
    %c0_i32_0 = arith.constant 0 : i32
    %c0_i32_1 = arith.constant 0 : i32
    return %arg0, %c0_i32, %c0_i32_0 : i32, i32, i32
  }
  func.func @transform_1(%arg0: i32) -> (i32, i32) {
    %c0_i32 = arith.constant 0 : i32
    %c0_i32_0 = arith.constant 0 : i32
    %c0_i32_1 = arith.constant 0 : i32
    return %c0_i32, %c0_i32_0 : i32, i32
  }
  func.func @transform_2(%arg0: i32) -> (i32, i32) {
    %c0_i32 = arith.constant 0 : i32
    %c0_i32_0 = arith.constant 0 : i32
    %c0_i32_1 = arith.constant 0 : i32
    return %c0_i32, %c0_i32_0 : i32, i32
  }
  func.func @transform_3(%arg0: i32) -> (i32, i32) {
    %c0_i32 = arith.constant 0 : i32
    %c0_i32_0 = arith.constant 0 : i32
    %c0_i32_1 = arith.constant 0 : i32
    return %c0_i32, %c0_i32_0 : i32, i32
  }
  func.func @transform_4(%arg0: i32) -> (i32, i32, i32) {
    %c0_i32 = arith.constant 0 : i32
    %c0_i32_0 = arith.constant 0 : i32
    %c0_i32_1 = arith.constant 0 : i32
    return %arg0, %c0_i32, %c0_i32_0 : i32, i32, i32
  }
}

module attributes {stable_mosaic.version = 11 : i64} {
  func.func @kernel(%arg0: i32, %arg1: memref<1x338x576xbf16, #tpu.memory_space<vmem>>, %arg2: memref<576x64xbf16, #tpu.memory_space<vmem>>, %arg3: memref<1x64xf32, #tpu.memory_space<vmem>>, %arg4: memref<1x64xf32, #tpu.memory_space<vmem>>, %arg5: memref<1x72x64xf32, #tpu.memory_space<vmem>>, %arg6: memref<338x64xf32, #tpu.memory_space<vmem>>) attributes {dimension_semantics = [#tpu.dimension_semantics<parallel>], iteration_bounds = array<i64: 1>, scalar_prefetch = 0 : i64, scratch_operands = 1 : i64, tpu.core_type = #tpu.core_type<tc>, window_params = [{transform_indices = @transform_0, window_bounds = array<i64: 1, 338, 576>}, {pipeline_mode = #tpu.pipeline_mode<synchronous>, transform_indices = @transform_1, window_bounds = array<i64: 576, 64>}, {pipeline_mode = #tpu.pipeline_mode<synchronous>, transform_indices = @transform_2, window_bounds = array<i64: 1, 64>}, {pipeline_mode = #tpu.pipeline_mode<synchronous>, transform_indices = @transform_3, window_bounds = array<i64: 1, 64>}, {transform_indices = @transform_4, window_bounds = array<i64: 1, 72, 64>}]} {
    %c0 = arith.constant 0 : index
    %c0_0 = arith.constant 0 : index
    %c0_1 = arith.constant 0 : index
    %0 = vector.load %arg1[%c0, %c0_0, %c0_1] : memref<1x338x576xbf16, #tpu.memory_space<vmem>>, vector<1x338x576xbf16>
    %1 = vector.shape_cast %0 : vector<1x338x576xbf16> to vector<338x576xbf16>
    %c0_2 = arith.constant 0 : index
    %c0_3 = arith.constant 0 : index
    %2 = vector.load %arg2[%c0_2, %c0_3] : memref<576x64xbf16, #tpu.memory_space<vmem>>, vector<576x64xbf16>
    %cst = arith.constant dense<0.000000e+00> : vector<338x64xf32>
    %3 = tpu.matmul %1, %2, %cst {dimension_numbers = #tpu.dot_dimension_numbers<[1], [0], [0], [1], [0, 0, 1, 1], [], []>} : vector<338x576xbf16>, vector<576x64xbf16>, vector<338x64xf32> -> vector<338x64xf32>
    %c0_4 = arith.constant 0 : index
    %c0_5 = arith.constant 0 : index
    %4 = vector.load %arg3[%c0_4, %c0_5] : memref<1x64xf32, #tpu.memory_space<vmem>>, vector<1x64xf32>
    %5 = vector.broadcast %4 : vector<1x64xf32> to vector<338x64xf32>
    %6 = arith.mulf %3, %5 : vector<338x64xf32>
    %c0_6 = arith.constant 0 : index
    %c0_7 = arith.constant 0 : index
    %7 = vector.load %arg4[%c0_6, %c0_7] : memref<1x64xf32, #tpu.memory_space<vmem>>, vector<1x64xf32>
    %8 = vector.broadcast %7 : vector<1x64xf32> to vector<338x64xf32>
    %9 = arith.addf %6, %8 : vector<338x64xf32>
    %cst_8 = arith.constant 0.000000e+00 : f32
    %10 = vector.broadcast %cst_8 : f32 to vector<338x64xf32>
    %11 = arith.maximumf %9, %10 : vector<338x64xf32>
    %c0_9 = arith.constant 0 : index
    %c0_10 = arith.constant 0 : index
    %12 = vector.load %arg6[%c0_9, %c0_10] : memref<338x64xf32, #tpu.memory_space<vmem>>, vector<338x64xf32>
    tpu.vector_store %arg6[%c0_9, %c0_10], %11 {strides = array<i32>} : memref<338x64xf32, #tpu.memory_space<vmem>>, vector<338x64xf32>,
    %c0_11 = arith.constant 0 : index
    %c0_12 = arith.constant 0 : index
    %13 = tpu.strided_load %arg6[%c0_11, %c0_12] {strides = array<i32: 2, 1>} : memref<338x64xf32, #tpu.memory_space<vmem>>, vector<6x64xf32>
    %c1 = arith.constant 1 : index
    %c0_13 = arith.constant 0 : index
    %14 = tpu.strided_load %arg6[%c1, %c0_13] {strides = array<i32: 2, 1>} : memref<338x64xf32, #tpu.memory_space<vmem>>, vector<6x64xf32>
    %15 = arith.maximumf %13, %14 : vector<6x64xf32>
    %c13 = arith.constant 13 : index
    %c0_14 = arith.constant 0 : index
    %16 = tpu.strided_load %arg6[%c13, %c0_14] {strides = array<i32: 2, 1>} : memref<338x64xf32, #tpu.memory_space<vmem>>, vector<6x64xf32>
    %c14 = arith.constant 14 : index
    %c0_15 = arith.constant 0 : index
    %17 = tpu.strided_load %arg6[%c14, %c0_15] {strides = array<i32: 2, 1>} : memref<338x64xf32, #tpu.memory_space<vmem>>, vector<6x64xf32>
    %18 = arith.maximumf %16, %17 : vector<6x64xf32>
    %19 = arith.maximumf %15, %18 : vector<6x64xf32>
    %c0_16 = arith.constant 0 : index
    %c0_17 = arith.constant 0 : index
    %c0_18 = arith.constant 0 : index
    %20 = vector.load %arg5[%c0_16, %c0_17, %c0_18] : memref<1x72x64xf32, #tpu.memory_space<vmem>>, vector<1x6x64xf32>
    %21 = vector.shape_cast %20 : vector<1x6x64xf32> to vector<6x64xf32>
    %22 = vector.shape_cast %19 : vector<6x64xf32> to vector<1x6x64xf32>
    tpu.vector_store %arg5[%c0_16, %c0_17, %c0_18], %22 {strides = array<i32>} : memref<1x72x64xf32, #tpu.memory_space<vmem>>, vector<1x6x64xf32>,
    %c26 = arith.constant 26 : index
    %c0_19 = arith.constant 0 : index
    %23 = tpu.strided_load %arg6[%c26, %c0_19] {strides = array<i32: 2, 1>} : memref<338x64xf32, #tpu.memory_space<vmem>>, vector<6x64xf32>
    %c27 = arith.constant 27 : index
    %c0_20 = arith.constant 0 : index
    %24 = tpu.strided_load %arg6[%c27, %c0_20] {strides = array<i32: 2, 1>} : memref<338x64xf32, #tpu.memory_space<vmem>>, vector<6x64xf32>
    %25 = arith.maximumf %23, %24 : vector<6x64xf32>
    %c39 = arith.constant 39 : index
    %c0_21 = arith.constant 0 : index
    %26 = tpu.strided_load %arg6[%c39, %c0_21] {strides = array<i32: 2, 1>} : memref<338x64xf32, #tpu.memory_space<vmem>>, vector<6x64xf32>
    %c40 = arith.constant 40 : index
    %c0_22 = arith.constant 0 : index
    %27 = tpu.strided_load %arg6[%c40, %c0_22] {strides = array<i32: 2, 1>} : memref<338x64xf32, #tpu.memory_space<vmem>>, vector<6x64xf32>
    %28 = arith.maximumf %26, %27 : vector<6x64xf32>
    %29 = arith.maximumf %25, %28 : vector<6x64xf32>
    %c0_23 = arith.constant 0 : index
    %c6 = arith.constant 6 : index
    %c0_24 = arith.constant 0 : index
    %30 = vector.load %arg5[%c0_23, %c6, %c0_24] : memref<1x72x64xf32, #tpu.memory_space<vmem>>, vector<1x6x64xf32>
    %31 = vector.shape_cast %30 : vector<1x6x64xf32> to vector<6x64xf32>
    %32 = vector.shape_cast %29 : vector<6x64xf32> to vector<1x6x64xf32>
    tpu.vector_store %arg5[%c0_23, %c6, %c0_24], %32 {strides = array<i32>} : memref<1x72x64xf32, #tpu.memory_space<vmem>>, vector<1x6x64xf32>,
    %c52 = arith.constant 52 : index
    %c0_25 = arith.constant 0 : index
    %33 = tpu.strided_load %arg6[%c52, %c0_25] {strides = array<i32: 2, 1>} : memref<338x64xf32, #tpu.memory_space<vmem>>, vector<6x64xf32>
    %c53 = arith.constant 53 : index
    %c0_26 = arith.constant 0 : index
    %34 = tpu.strided_load %arg6[%c53, %c0_26] {strides = array<i32: 2, 1>} : memref<338x64xf32, #tpu.memory_space<vmem>>, vector<6x64xf32>
    %35 = arith.maximumf %33, %34 : vector<6x64xf32>
    %c65 = arith.constant 65 : index
    %c0_27 = arith.constant 0 : index
    %36 = tpu.strided_load %arg6[%c65, %c0_27] {strides = array<i32: 2, 1>} : memref<338x64xf32, #tpu.memory_space<vmem>>, vector<6x64xf32>
    %c66 = arith.constant 66 : index
    %c0_28 = arith.constant 0 : index
    %37 = tpu.strided_load %arg6[%c66, %c0_28] {strides = array<i32: 2, 1>} : memref<338x64xf32, #tpu.memory_space<vmem>>, vector<6x64xf32>
    %38 = arith.maximumf %36, %37 : vector<6x64xf32>
    %39 = arith.maximumf %35, %38 : vector<6x64xf32>
    %c0_29 = arith.constant 0 : index
    %c12 = arith.constant 12 : index
    %c0_30 = arith.constant 0 : index
    %40 = vector.load %arg5[%c0_29, %c12, %c0_30] : memref<1x72x64xf32, #tpu.memory_space<vmem>>, vector<1x6x64xf32>
    %41 = vector.shape_cast %40 : vector<1x6x64xf32> to vector<6x64xf32>
    %42 = vector.shape_cast %39 : vector<6x64xf32> to vector<1x6x64xf32>
    tpu.vector_store %arg5[%c0_29, %c12, %c0_30], %42 {strides = array<i32>} : memref<1x72x64xf32, #tpu.memory_space<vmem>>, vector<1x6x64xf32>,
    %c78 = arith.constant 78 : index
    %c0_31 = arith.constant 0 : index
    %43 = tpu.strided_load %arg6[%c78, %c0_31] {strides = array<i32: 2, 1>} : memref<338x64xf32, #tpu.memory_space<vmem>>, vector<6x64xf32>
    %c79 = arith.constant 79 : index
    %c0_32 = arith.constant 0 : index
    %44 = tpu.strided_load %arg6[%c79, %c0_32] {strides = array<i32: 2, 1>} : memref<338x64xf32, #tpu.memory_space<vmem>>, vector<6x64xf32>
    %45 = arith.maximumf %43, %44 : vector<6x64xf32>
    %c91 = arith.constant 91 : index
    %c0_33 = arith.constant 0 : index
    %46 = tpu.strided_load %arg6[%c91, %c0_33] {strides = array<i32: 2, 1>} : memref<338x64xf32, #tpu.memory_space<vmem>>, vector<6x64xf32>
    %c92 = arith.constant 92 : index
    %c0_34 = arith.constant 0 : index
    %47 = tpu.strided_load %arg6[%c92, %c0_34] {strides = array<i32: 2, 1>} : memref<338x64xf32, #tpu.memory_space<vmem>>, vector<6x64xf32>
    %48 = arith.maximumf %46, %47 : vector<6x64xf32>
    %49 = arith.maximumf %45, %48 : vector<6x64xf32>
    %c0_35 = arith.constant 0 : index
    %c18 = arith.constant 18 : index
    %c0_36 = arith.constant 0 : index
    %50 = vector.load %arg5[%c0_35, %c18, %c0_36] : memref<1x72x64xf32, #tpu.memory_space<vmem>>, vector<1x6x64xf32>
    %51 = vector.shape_cast %50 : vector<1x6x64xf32> to vector<6x64xf32>
    %52 = vector.shape_cast %49 : vector<6x64xf32> to vector<1x6x64xf32>
    tpu.vector_store %arg5[%c0_35, %c18, %c0_36], %52 {strides = array<i32>} : memref<1x72x64xf32, #tpu.memory_space<vmem>>, vector<1x6x64xf32>,
    %c104 = arith.constant 104 : index
    %c0_37 = arith.constant 0 : index
    %53 = tpu.strided_load %arg6[%c104, %c0_37] {strides = array<i32: 2, 1>} : memref<338x64xf32, #tpu.memory_space<vmem>>, vector<6x64xf32>
    %c105 = arith.constant 105 : index
    %c0_38 = arith.constant 0 : index
    %54 = tpu.strided_load %arg6[%c105, %c0_38] {strides = array<i32: 2, 1>} : memref<338x64xf32, #tpu.memory_space<vmem>>, vector<6x64xf32>
    %55 = arith.maximumf %53, %54 : vector<6x64xf32>
    %c117 = arith.constant 117 : index
    %c0_39 = arith.constant 0 : index
    %56 = tpu.strided_load %arg6[%c117, %c0_39] {strides = array<i32: 2, 1>} : memref<338x64xf32, #tpu.memory_space<vmem>>, vector<6x64xf32>
    %c118 = arith.constant 118 : index
    %c0_40 = arith.constant 0 : index
    %57 = tpu.strided_load %arg6[%c118, %c0_40] {strides = array<i32: 2, 1>} : memref<338x64xf32, #tpu.memory_space<vmem>>, vector<6x64xf32>
    %58 = arith.maximumf %56, %57 : vector<6x64xf32>
    %59 = arith.maximumf %55, %58 : vector<6x64xf32>
    %c0_41 = arith.constant 0 : index
    %c24 = arith.constant 24 : index
    %c0_42 = arith.constant 0 : index
    %60 = vector.load %arg5[%c0_41, %c24, %c0_42] : memref<1x72x64xf32, #tpu.memory_space<vmem>>, vector<1x6x64xf32>
    %61 = vector.shape_cast %60 : vector<1x6x64xf32> to vector<6x64xf32>
    %62 = vector.shape_cast %59 : vector<6x64xf32> to vector<1x6x64xf32>
    tpu.vector_store %arg5[%c0_41, %c24, %c0_42], %62 {strides = array<i32>} : memref<1x72x64xf32, #tpu.memory_space<vmem>>, vector<1x6x64xf32>,
    %c130 = arith.constant 130 : index
    %c0_43 = arith.constant 0 : index
    %63 = tpu.strided_load %arg6[%c130, %c0_43] {strides = array<i32: 2, 1>} : memref<338x64xf32, #tpu.memory_space<vmem>>, vector<6x64xf32>
    %c131 = arith.constant 131 : index
    %c0_44 = arith.constant 0 : index
    %64 = tpu.strided_load %arg6[%c131, %c0_44] {strides = array<i32: 2, 1>} : memref<338x64xf32, #tpu.memory_space<vmem>>, vector<6x64xf32>
    %65 = arith.maximumf %63, %64 : vector<6x64xf32>
    %c143 = arith.constant 143 : index
    %c0_45 = arith.constant 0 : index
    %66 = tpu.strided_load %arg6[%c143, %c0_45] {strides = array<i32: 2, 1>} : memref<338x64xf32, #tpu.memory_space<vmem>>, vector<6x64xf32>
    %c144 = arith.constant 144 : index
    %c0_46 = arith.constant 0 : index
    %67 = tpu.strided_load %arg6[%c144, %c0_46] {strides = array<i32: 2, 1>} : memref<338x64xf32, #tpu.memory_space<vmem>>, vector<6x64xf32>
    %68 = arith.maximumf %66, %67 : vector<6x64xf32>
    %69 = arith.maximumf %65, %68 : vector<6x64xf32>
    %c0_47 = arith.constant 0 : index
    %c30 = arith.constant 30 : index
    %c0_48 = arith.constant 0 : index
    %70 = vector.load %arg5[%c0_47, %c30, %c0_48] : memref<1x72x64xf32, #tpu.memory_space<vmem>>, vector<1x6x64xf32>
    %71 = vector.shape_cast %70 : vector<1x6x64xf32> to vector<6x64xf32>
    %72 = vector.shape_cast %69 : vector<6x64xf32> to vector<1x6x64xf32>
    tpu.vector_store %arg5[%c0_47, %c30, %c0_48], %72 {strides = array<i32>} : memref<1x72x64xf32, #tpu.memory_space<vmem>>, vector<1x6x64xf32>,
    %c169 = arith.constant 169 : index
    %c0_49 = arith.constant 0 : index
    %73 = tpu.strided_load %arg6[%c169, %c0_49] {strides = array<i32: 2, 1>} : memref<338x64xf32, #tpu.memory_space<vmem>>, vector<6x64xf32>
    %c170 = arith.constant 170 : index
    %c0_50 = arith.constant 0 : index
    %74 = tpu.strided_load %arg6[%c170, %c0_50] {strides = array<i32: 2, 1>} : memref<338x64xf32, #tpu.memory_space<vmem>>, vector<6x64xf32>
    %75 = arith.maximumf %73, %74 : vector<6x64xf32>
    %c182 = arith.constant 182 : index
    %c0_51 = arith.constant 0 : index
    %76 = tpu.strided_load %arg6[%c182, %c0_51] {strides = array<i32: 2, 1>} : memref<338x64xf32, #tpu.memory_space<vmem>>, vector<6x64xf32>
    %c183 = arith.constant 183 : index
    %c0_52 = arith.constant 0 : index
    %77 = tpu.strided_load %arg6[%c183, %c0_52] {strides = array<i32: 2, 1>} : memref<338x64xf32, #tpu.memory_space<vmem>>, vector<6x64xf32>
    %78 = arith.maximumf %76, %77 : vector<6x64xf32>
    %79 = arith.maximumf %75, %78 : vector<6x64xf32>
    %c0_53 = arith.constant 0 : index
    %c36 = arith.constant 36 : index
    %c0_54 = arith.constant 0 : index
    %80 = vector.load %arg5[%c0_53, %c36, %c0_54] : memref<1x72x64xf32, #tpu.memory_space<vmem>>, vector<1x6x64xf32>
    %81 = vector.shape_cast %80 : vector<1x6x64xf32> to vector<6x64xf32>
    %82 = vector.shape_cast %79 : vector<6x64xf32> to vector<1x6x64xf32>
    tpu.vector_store %arg5[%c0_53, %c36, %c0_54], %82 {strides = array<i32>} : memref<1x72x64xf32, #tpu.memory_space<vmem>>, vector<1x6x64xf32>,
    %c195 = arith.constant 195 : index
    %c0_55 = arith.constant 0 : index
    %83 = tpu.strided_load %arg6[%c195, %c0_55] {strides = array<i32: 2, 1>} : memref<338x64xf32, #tpu.memory_space<vmem>>, vector<6x64xf32>
    %c196 = arith.constant 196 : index
    %c0_56 = arith.constant 0 : index
    %84 = tpu.strided_load %arg6[%c196, %c0_56] {strides = array<i32: 2, 1>} : memref<338x64xf32, #tpu.memory_space<vmem>>, vector<6x64xf32>
    %85 = arith.maximumf %83, %84 : vector<6x64xf32>
    %c208 = arith.constant 208 : index
    %c0_57 = arith.constant 0 : index
    %86 = tpu.strided_load %arg6[%c208, %c0_57] {strides = array<i32: 2, 1>} : memref<338x64xf32, #tpu.memory_space<vmem>>, vector<6x64xf32>
    %c209 = arith.constant 209 : index
    %c0_58 = arith.constant 0 : index
    %87 = tpu.strided_load %arg6[%c209, %c0_58] {strides = array<i32: 2, 1>} : memref<338x64xf32, #tpu.memory_space<vmem>>, vector<6x64xf32>
    %88 = arith.maximumf %86, %87 : vector<6x64xf32>
    %89 = arith.maximumf %85, %88 : vector<6x64xf32>
    %c0_59 = arith.constant 0 : index
    %c42 = arith.constant 42 : index
    %c0_60 = arith.constant 0 : index
    %90 = vector.load %arg5[%c0_59, %c42, %c0_60] : memref<1x72x64xf32, #tpu.memory_space<vmem>>, vector<1x6x64xf32>
    %91 = vector.shape_cast %90 : vector<1x6x64xf32> to vector<6x64xf32>
    %92 = vector.shape_cast %89 : vector<6x64xf32> to vector<1x6x64xf32>
    tpu.vector_store %arg5[%c0_59, %c42, %c0_60], %92 {strides = array<i32>} : memref<1x72x64xf32, #tpu.memory_space<vmem>>, vector<1x6x64xf32>,
    %c221 = arith.constant 221 : index
    %c0_61 = arith.constant 0 : index
    %93 = tpu.strided_load %arg6[%c221, %c0_61] {strides = array<i32: 2, 1>} : memref<338x64xf32, #tpu.memory_space<vmem>>, vector<6x64xf32>
    %c222 = arith.constant 222 : index
    %c0_62 = arith.constant 0 : index
    %94 = tpu.strided_load %arg6[%c222, %c0_62] {strides = array<i32: 2, 1>} : memref<338x64xf32, #tpu.memory_space<vmem>>, vector<6x64xf32>
    %95 = arith.maximumf %93, %94 : vector<6x64xf32>
    %c234 = arith.constant 234 : index
    %c0_63 = arith.constant 0 : index
    %96 = tpu.strided_load %arg6[%c234, %c0_63] {strides = array<i32: 2, 1>} : memref<338x64xf32, #tpu.memory_space<vmem>>, vector<6x64xf32>
    %c235 = arith.constant 235 : index
    %c0_64 = arith.constant 0 : index
    %97 = tpu.strided_load %arg6[%c235, %c0_64] {strides = array<i32: 2, 1>} : memref<338x64xf32, #tpu.memory_space<vmem>>, vector<6x64xf32>
    %98 = arith.maximumf %96, %97 : vector<6x64xf32>
    %99 = arith.maximumf %95, %98 : vector<6x64xf32>
    %c0_65 = arith.constant 0 : index
    %c48 = arith.constant 48 : index
    %c0_66 = arith.constant 0 : index
    %100 = vector.load %arg5[%c0_65, %c48, %c0_66] : memref<1x72x64xf32, #tpu.memory_space<vmem>>, vector<1x6x64xf32>
    %101 = vector.shape_cast %100 : vector<1x6x64xf32> to vector<6x64xf32>
    %102 = vector.shape_cast %99 : vector<6x64xf32> to vector<1x6x64xf32>
    tpu.vector_store %arg5[%c0_65, %c48, %c0_66], %102 {strides = array<i32>} : memref<1x72x64xf32, #tpu.memory_space<vmem>>, vector<1x6x64xf32>,
    %c247 = arith.constant 247 : index
    %c0_67 = arith.constant 0 : index
    %103 = tpu.strided_load %arg6[%c247, %c0_67] {strides = array<i32: 2, 1>} : memref<338x64xf32, #tpu.memory_space<vmem>>, vector<6x64xf32>
    %c248 = arith.constant 248 : index
    %c0_68 = arith.constant 0 : index
    %104 = tpu.strided_load %arg6[%c248, %c0_68] {strides = array<i32: 2, 1>} : memref<338x64xf32, #tpu.memory_space<vmem>>, vector<6x64xf32>
    %105 = arith.maximumf %103, %104 : vector<6x64xf32>
    %c260 = arith.constant 260 : index
    %c0_69 = arith.constant 0 : index
    %106 = tpu.strided_load %arg6[%c260, %c0_69] {strides = array<i32: 2, 1>} : memref<338x64xf32, #tpu.memory_space<vmem>>, vector<6x64xf32>
    %c261 = arith.constant 261 : index
    %c0_70 = arith.constant 0 : index
    %107 = tpu.strided_load %arg6[%c261, %c0_70] {strides = array<i32: 2, 1>} : memref<338x64xf32, #tpu.memory_space<vmem>>, vector<6x64xf32>
    %108 = arith.maximumf %106, %107 : vector<6x64xf32>
    %109 = arith.maximumf %105, %108 : vector<6x64xf32>
    %c0_71 = arith.constant 0 : index
    %c54 = arith.constant 54 : index
    %c0_72 = arith.constant 0 : index
    %110 = vector.load %arg5[%c0_71, %c54, %c0_72] : memref<1x72x64xf32, #tpu.memory_space<vmem>>, vector<1x6x64xf32>
    %111 = vector.shape_cast %110 : vector<1x6x64xf32> to vector<6x64xf32>
    %112 = vector.shape_cast %109 : vector<6x64xf32> to vector<1x6x64xf32>
    tpu.vector_store %arg5[%c0_71, %c54, %c0_72], %112 {strides = array<i32>} : memref<1x72x64xf32, #tpu.memory_space<vmem>>, vector<1x6x64xf32>,
    %c273 = arith.constant 273 : index
    %c0_73 = arith.constant 0 : index
    %113 = tpu.strided_load %arg6[%c273, %c0_73] {strides = array<i32: 2, 1>} : memref<338x64xf32, #tpu.memory_space<vmem>>, vector<6x64xf32>
    %c274 = arith.constant 274 : index
    %c0_74 = arith.constant 0 : index
    %114 = tpu.strided_load %arg6[%c274, %c0_74] {strides = array<i32: 2, 1>} : memref<338x64xf32, #tpu.memory_space<vmem>>, vector<6x64xf32>
    %115 = arith.maximumf %113, %114 : vector<6x64xf32>
    %c286 = arith.constant 286 : index
    %c0_75 = arith.constant 0 : index
    %116 = tpu.strided_load %arg6[%c286, %c0_75] {strides = array<i32: 2, 1>} : memref<338x64xf32, #tpu.memory_space<vmem>>, vector<6x64xf32>
    %c287 = arith.constant 287 : index
    %c0_76 = arith.constant 0 : index
    %117 = tpu.strided_load %arg6[%c287, %c0_76] {strides = array<i32: 2, 1>} : memref<338x64xf32, #tpu.memory_space<vmem>>, vector<6x64xf32>
    %118 = arith.maximumf %116, %117 : vector<6x64xf32>
    %119 = arith.maximumf %115, %118 : vector<6x64xf32>
    %c0_77 = arith.constant 0 : index
    %c60 = arith.constant 60 : index
    %c0_78 = arith.constant 0 : index
    %120 = vector.load %arg5[%c0_77, %c60, %c0_78] : memref<1x72x64xf32, #tpu.memory_space<vmem>>, vector<1x6x64xf32>
    %121 = vector.shape_cast %120 : vector<1x6x64xf32> to vector<6x64xf32>
    %122 = vector.shape_cast %119 : vector<6x64xf32> to vector<1x6x64xf32>
    tpu.vector_store %arg5[%c0_77, %c60, %c0_78], %122 {strides = array<i32>} : memref<1x72x64xf32, #tpu.memory_space<vmem>>, vector<1x6x64xf32>,
    %c299 = arith.constant 299 : index
    %c0_79 = arith.constant 0 : index
    %123 = tpu.strided_load %arg6[%c299, %c0_79] {strides = array<i32: 2, 1>} : memref<338x64xf32, #tpu.memory_space<vmem>>, vector<6x64xf32>
    %c300 = arith.constant 300 : index
    %c0_80 = arith.constant 0 : index
    %124 = tpu.strided_load %arg6[%c300, %c0_80] {strides = array<i32: 2, 1>} : memref<338x64xf32, #tpu.memory_space<vmem>>, vector<6x64xf32>
    %125 = arith.maximumf %123, %124 : vector<6x64xf32>
    %c312 = arith.constant 312 : index
    %c0_81 = arith.constant 0 : index
    %126 = tpu.strided_load %arg6[%c312, %c0_81] {strides = array<i32: 2, 1>} : memref<338x64xf32, #tpu.memory_space<vmem>>, vector<6x64xf32>
    %c313 = arith.constant 313 : index
    %c0_82 = arith.constant 0 : index
    %127 = tpu.strided_load %arg6[%c313, %c0_82] {strides = array<i32: 2, 1>} : memref<338x64xf32, #tpu.memory_space<vmem>>, vector<6x64xf32>
    %128 = arith.maximumf %126, %127 : vector<6x64xf32>
    %129 = arith.maximumf %125, %128 : vector<6x64xf32>
    %c0_83 = arith.constant 0 : index
    %c66_84 = arith.constant 66 : index
    %c0_85 = arith.constant 0 : index
    %130 = vector.load %arg5[%c0_83, %c66_84, %c0_85] : memref<1x72x64xf32, #tpu.memory_space<vmem>>, vector<1x6x64xf32>
    %131 = vector.shape_cast %130 : vector<1x6x64xf32> to vector<6x64xf32>
    %132 = vector.shape_cast %129 : vector<6x64xf32> to vector<1x6x64xf32>
    tpu.vector_store %arg5[%c0_83, %c66_84, %c0_85], %132 {strides = array<i32>} : memref<1x72x64xf32, #tpu.memory_space<vmem>>, vector<1x6x64xf32>,
    return
  }
  func.func @transform_0(%arg0: i32) -> (i32, i32, i32) {
    %c0_i32 = arith.constant 0 : i32
    %c0_i32_0 = arith.constant 0 : i32
    %c0_i32_1 = arith.constant 0 : i32
    return %arg0, %c0_i32, %c0_i32_0 : i32, i32, i32
  }
  func.func @transform_1(%arg0: i32) -> (i32, i32) {
    %c0_i32 = arith.constant 0 : i32
    %c0_i32_0 = arith.constant 0 : i32
    %c0_i32_1 = arith.constant 0 : i32
    return %c0_i32, %c0_i32_0 : i32, i32
  }
  func.func @transform_2(%arg0: i32) -> (i32, i32) {
    %c0_i32 = arith.constant 0 : i32
    %c0_i32_0 = arith.constant 0 : i32
    %c0_i32_1 = arith.constant 0 : i32
    return %c0_i32, %c0_i32_0 : i32, i32
  }
  func.func @transform_3(%arg0: i32) -> (i32, i32) {
    %c0_i32 = arith.constant 0 : i32
    %c0_i32_0 = arith.constant 0 : i32
    %c0_i32_1 = arith.constant 0 : i32
    return %c0_i32, %c0_i32_0 : i32, i32
  }
  func.func @transform_4(%arg0: i32) -> (i32, i32, i32) {
    %c0_i32 = arith.constant 0 : i32
    %c0_i32_0 = arith.constant 0 : i32
    %c0_i32_1 = arith.constant 0 : i32
    return %arg0, %c0_i32, %c0_i32_0 : i32, i32, i32
  }
}

module attributes {stable_mosaic.version = 11 : i64} {
  func.func @kernel(%arg0: i32, %arg1: memref<1x72x576xbf16, #tpu.memory_space<vmem>>, %arg2: memref<576x64xbf16, #tpu.memory_space<vmem>>, %arg3: memref<1x64xf32, #tpu.memory_space<vmem>>, %arg4: memref<1x64xf32, #tpu.memory_space<vmem>>, %arg5: memref<1x18x64xf32, #tpu.memory_space<vmem>>, %arg6: memref<72x64xf32, #tpu.memory_space<vmem>>) attributes {dimension_semantics = [#tpu.dimension_semantics<parallel>], iteration_bounds = array<i64: 1>, scalar_prefetch = 0 : i64, scratch_operands = 1 : i64, tpu.core_type = #tpu.core_type<tc>, window_params = [{transform_indices = @transform_0, window_bounds = array<i64: 1, 72, 576>}, {pipeline_mode = #tpu.pipeline_mode<synchronous>, transform_indices = @transform_1, window_bounds = array<i64: 576, 64>}, {pipeline_mode = #tpu.pipeline_mode<synchronous>, transform_indices = @transform_2, window_bounds = array<i64: 1, 64>}, {pipeline_mode = #tpu.pipeline_mode<synchronous>, transform_indices = @transform_3, window_bounds = array<i64: 1, 64>}, {transform_indices = @transform_4, window_bounds = array<i64: 1, 18, 64>}]} {
    %c0 = arith.constant 0 : index
    %c0_0 = arith.constant 0 : index
    %c0_1 = arith.constant 0 : index
    %0 = vector.load %arg1[%c0, %c0_0, %c0_1] : memref<1x72x576xbf16, #tpu.memory_space<vmem>>, vector<1x72x576xbf16>
    %1 = vector.shape_cast %0 : vector<1x72x576xbf16> to vector<72x576xbf16>
    %c0_2 = arith.constant 0 : index
    %c0_3 = arith.constant 0 : index
    %2 = vector.load %arg2[%c0_2, %c0_3] : memref<576x64xbf16, #tpu.memory_space<vmem>>, vector<576x64xbf16>
    %cst = arith.constant dense<0.000000e+00> : vector<72x64xf32>
    %3 = tpu.matmul %1, %2, %cst {dimension_numbers = #tpu.dot_dimension_numbers<[1], [0], [0], [1], [0, 0, 1, 1], [], []>} : vector<72x576xbf16>, vector<576x64xbf16>, vector<72x64xf32> -> vector<72x64xf32>
    %c0_4 = arith.constant 0 : index
    %c0_5 = arith.constant 0 : index
    %4 = vector.load %arg3[%c0_4, %c0_5] : memref<1x64xf32, #tpu.memory_space<vmem>>, vector<1x64xf32>
    %5 = vector.broadcast %4 : vector<1x64xf32> to vector<72x64xf32>
    %6 = arith.mulf %3, %5 : vector<72x64xf32>
    %c0_6 = arith.constant 0 : index
    %c0_7 = arith.constant 0 : index
    %7 = vector.load %arg4[%c0_6, %c0_7] : memref<1x64xf32, #tpu.memory_space<vmem>>, vector<1x64xf32>
    %8 = vector.broadcast %7 : vector<1x64xf32> to vector<72x64xf32>
    %9 = arith.addf %6, %8 : vector<72x64xf32>
    %cst_8 = arith.constant 0.000000e+00 : f32
    %10 = vector.broadcast %cst_8 : f32 to vector<72x64xf32>
    %11 = arith.maximumf %9, %10 : vector<72x64xf32>
    %c0_9 = arith.constant 0 : index
    %c0_10 = arith.constant 0 : index
    %12 = vector.load %arg6[%c0_9, %c0_10] : memref<72x64xf32, #tpu.memory_space<vmem>>, vector<72x64xf32>
    tpu.vector_store %arg6[%c0_9, %c0_10], %11 {strides = array<i32>} : memref<72x64xf32, #tpu.memory_space<vmem>>, vector<72x64xf32>,
    %c0_11 = arith.constant 0 : index
    %c0_12 = arith.constant 0 : index
    %13 = tpu.strided_load %arg6[%c0_11, %c0_12] {strides = array<i32: 2, 1>} : memref<72x64xf32, #tpu.memory_space<vmem>>, vector<3x64xf32>
    %c1 = arith.constant 1 : index
    %c0_13 = arith.constant 0 : index
    %14 = tpu.strided_load %arg6[%c1, %c0_13] {strides = array<i32: 2, 1>} : memref<72x64xf32, #tpu.memory_space<vmem>>, vector<3x64xf32>
    %15 = arith.maximumf %13, %14 : vector<3x64xf32>
    %c6 = arith.constant 6 : index
    %c0_14 = arith.constant 0 : index
    %16 = tpu.strided_load %arg6[%c6, %c0_14] {strides = array<i32: 2, 1>} : memref<72x64xf32, #tpu.memory_space<vmem>>, vector<3x64xf32>
    %c7 = arith.constant 7 : index
    %c0_15 = arith.constant 0 : index
    %17 = tpu.strided_load %arg6[%c7, %c0_15] {strides = array<i32: 2, 1>} : memref<72x64xf32, #tpu.memory_space<vmem>>, vector<3x64xf32>
    %18 = arith.maximumf %16, %17 : vector<3x64xf32>
    %19 = arith.maximumf %15, %18 : vector<3x64xf32>
    %c0_16 = arith.constant 0 : index
    %c0_17 = arith.constant 0 : index
    %c0_18 = arith.constant 0 : index
    %20 = vector.load %arg5[%c0_16, %c0_17, %c0_18] : memref<1x18x64xf32, #tpu.memory_space<vmem>>, vector<1x3x64xf32>
    %21 = vector.shape_cast %20 : vector<1x3x64xf32> to vector<3x64xf32>
    %22 = vector.shape_cast %19 : vector<3x64xf32> to vector<1x3x64xf32>
    tpu.vector_store %arg5[%c0_16, %c0_17, %c0_18], %22 {strides = array<i32>} : memref<1x18x64xf32, #tpu.memory_space<vmem>>, vector<1x3x64xf32>,
    %c12 = arith.constant 12 : index
    %c0_19 = arith.constant 0 : index
    %23 = tpu.strided_load %arg6[%c12, %c0_19] {strides = array<i32: 2, 1>} : memref<72x64xf32, #tpu.memory_space<vmem>>, vector<3x64xf32>
    %c13 = arith.constant 13 : index
    %c0_20 = arith.constant 0 : index
    %24 = tpu.strided_load %arg6[%c13, %c0_20] {strides = array<i32: 2, 1>} : memref<72x64xf32, #tpu.memory_space<vmem>>, vector<3x64xf32>
    %25 = arith.maximumf %23, %24 : vector<3x64xf32>
    %c18 = arith.constant 18 : index
    %c0_21 = arith.constant 0 : index
    %26 = tpu.strided_load %arg6[%c18, %c0_21] {strides = array<i32: 2, 1>} : memref<72x64xf32, #tpu.memory_space<vmem>>, vector<3x64xf32>
    %c19 = arith.constant 19 : index
    %c0_22 = arith.constant 0 : index
    %27 = tpu.strided_load %arg6[%c19, %c0_22] {strides = array<i32: 2, 1>} : memref<72x64xf32, #tpu.memory_space<vmem>>, vector<3x64xf32>
    %28 = arith.maximumf %26, %27 : vector<3x64xf32>
    %29 = arith.maximumf %25, %28 : vector<3x64xf32>
    %c0_23 = arith.constant 0 : index
    %c3 = arith.constant 3 : index
    %c0_24 = arith.constant 0 : index
    %30 = vector.load %arg5[%c0_23, %c3, %c0_24] : memref<1x18x64xf32, #tpu.memory_space<vmem>>, vector<1x3x64xf32>
    %31 = vector.shape_cast %30 : vector<1x3x64xf32> to vector<3x64xf32>
    %32 = vector.shape_cast %29 : vector<3x64xf32> to vector<1x3x64xf32>
    tpu.vector_store %arg5[%c0_23, %c3, %c0_24], %32 {strides = array<i32>} : memref<1x18x64xf32, #tpu.memory_space<vmem>>, vector<1x3x64xf32>,
    %c24 = arith.constant 24 : index
    %c0_25 = arith.constant 0 : index
    %33 = tpu.strided_load %arg6[%c24, %c0_25] {strides = array<i32: 2, 1>} : memref<72x64xf32, #tpu.memory_space<vmem>>, vector<3x64xf32>
    %c25 = arith.constant 25 : index
    %c0_26 = arith.constant 0 : index
    %34 = tpu.strided_load %arg6[%c25, %c0_26] {strides = array<i32: 2, 1>} : memref<72x64xf32, #tpu.memory_space<vmem>>, vector<3x64xf32>
    %35 = arith.maximumf %33, %34 : vector<3x64xf32>
    %c30 = arith.constant 30 : index
    %c0_27 = arith.constant 0 : index
    %36 = tpu.strided_load %arg6[%c30, %c0_27] {strides = array<i32: 2, 1>} : memref<72x64xf32, #tpu.memory_space<vmem>>, vector<3x64xf32>
    %c31 = arith.constant 31 : index
    %c0_28 = arith.constant 0 : index
    %37 = tpu.strided_load %arg6[%c31, %c0_28] {strides = array<i32: 2, 1>} : memref<72x64xf32, #tpu.memory_space<vmem>>, vector<3x64xf32>
    %38 = arith.maximumf %36, %37 : vector<3x64xf32>
    %39 = arith.maximumf %35, %38 : vector<3x64xf32>
    %c0_29 = arith.constant 0 : index
    %c6_30 = arith.constant 6 : index
    %c0_31 = arith.constant 0 : index
    %40 = vector.load %arg5[%c0_29, %c6_30, %c0_31] : memref<1x18x64xf32, #tpu.memory_space<vmem>>, vector<1x3x64xf32>
    %41 = vector.shape_cast %40 : vector<1x3x64xf32> to vector<3x64xf32>
    %42 = vector.shape_cast %39 : vector<3x64xf32> to vector<1x3x64xf32>
    tpu.vector_store %arg5[%c0_29, %c6_30, %c0_31], %42 {strides = array<i32>} : memref<1x18x64xf32, #tpu.memory_space<vmem>>, vector<1x3x64xf32>,
    %c36 = arith.constant 36 : index
    %c0_32 = arith.constant 0 : index
    %43 = tpu.strided_load %arg6[%c36, %c0_32] {strides = array<i32: 2, 1>} : memref<72x64xf32, #tpu.memory_space<vmem>>, vector<3x64xf32>
    %c37 = arith.constant 37 : index
    %c0_33 = arith.constant 0 : index
    %44 = tpu.strided_load %arg6[%c37, %c0_33] {strides = array<i32: 2, 1>} : memref<72x64xf32, #tpu.memory_space<vmem>>, vector<3x64xf32>
    %45 = arith.maximumf %43, %44 : vector<3x64xf32>
    %c42 = arith.constant 42 : index
    %c0_34 = arith.constant 0 : index
    %46 = tpu.strided_load %arg6[%c42, %c0_34] {strides = array<i32: 2, 1>} : memref<72x64xf32, #tpu.memory_space<vmem>>, vector<3x64xf32>
    %c43 = arith.constant 43 : index
    %c0_35 = arith.constant 0 : index
    %47 = tpu.strided_load %arg6[%c43, %c0_35] {strides = array<i32: 2, 1>} : memref<72x64xf32, #tpu.memory_space<vmem>>, vector<3x64xf32>
    %48 = arith.maximumf %46, %47 : vector<3x64xf32>
    %49 = arith.maximumf %45, %48 : vector<3x64xf32>
    %c0_36 = arith.constant 0 : index
    %c9 = arith.constant 9 : index
    %c0_37 = arith.constant 0 : index
    %50 = vector.load %arg5[%c0_36, %c9, %c0_37] : memref<1x18x64xf32, #tpu.memory_space<vmem>>, vector<1x3x64xf32>
    %51 = vector.shape_cast %50 : vector<1x3x64xf32> to vector<3x64xf32>
    %52 = vector.shape_cast %49 : vector<3x64xf32> to vector<1x3x64xf32>
    tpu.vector_store %arg5[%c0_36, %c9, %c0_37], %52 {strides = array<i32>} : memref<1x18x64xf32, #tpu.memory_space<vmem>>, vector<1x3x64xf32>,
    %c48 = arith.constant 48 : index
    %c0_38 = arith.constant 0 : index
    %53 = tpu.strided_load %arg6[%c48, %c0_38] {strides = array<i32: 2, 1>} : memref<72x64xf32, #tpu.memory_space<vmem>>, vector<3x64xf32>
    %c49 = arith.constant 49 : index
    %c0_39 = arith.constant 0 : index
    %54 = tpu.strided_load %arg6[%c49, %c0_39] {strides = array<i32: 2, 1>} : memref<72x64xf32, #tpu.memory_space<vmem>>, vector<3x64xf32>
    %55 = arith.maximumf %53, %54 : vector<3x64xf32>
    %c54 = arith.constant 54 : index
    %c0_40 = arith.constant 0 : index
    %56 = tpu.strided_load %arg6[%c54, %c0_40] {strides = array<i32: 2, 1>} : memref<72x64xf32, #tpu.memory_space<vmem>>, vector<3x64xf32>
    %c55 = arith.constant 55 : index
    %c0_41 = arith.constant 0 : index
    %57 = tpu.strided_load %arg6[%c55, %c0_41] {strides = array<i32: 2, 1>} : memref<72x64xf32, #tpu.memory_space<vmem>>, vector<3x64xf32>
    %58 = arith.maximumf %56, %57 : vector<3x64xf32>
    %59 = arith.maximumf %55, %58 : vector<3x64xf32>
    %c0_42 = arith.constant 0 : index
    %c12_43 = arith.constant 12 : index
    %c0_44 = arith.constant 0 : index
    %60 = vector.load %arg5[%c0_42, %c12_43, %c0_44] : memref<1x18x64xf32, #tpu.memory_space<vmem>>, vector<1x3x64xf32>
    %61 = vector.shape_cast %60 : vector<1x3x64xf32> to vector<3x64xf32>
    %62 = vector.shape_cast %59 : vector<3x64xf32> to vector<1x3x64xf32>
    tpu.vector_store %arg5[%c0_42, %c12_43, %c0_44], %62 {strides = array<i32>} : memref<1x18x64xf32, #tpu.memory_space<vmem>>, vector<1x3x64xf32>,
    %c60 = arith.constant 60 : index
    %c0_45 = arith.constant 0 : index
    %63 = tpu.strided_load %arg6[%c60, %c0_45] {strides = array<i32: 2, 1>} : memref<72x64xf32, #tpu.memory_space<vmem>>, vector<3x64xf32>
    %c61 = arith.constant 61 : index
    %c0_46 = arith.constant 0 : index
    %64 = tpu.strided_load %arg6[%c61, %c0_46] {strides = array<i32: 2, 1>} : memref<72x64xf32, #tpu.memory_space<vmem>>, vector<3x64xf32>
    %65 = arith.maximumf %63, %64 : vector<3x64xf32>
    %c66 = arith.constant 66 : index
    %c0_47 = arith.constant 0 : index
    %66 = tpu.strided_load %arg6[%c66, %c0_47] {strides = array<i32: 2, 1>} : memref<72x64xf32, #tpu.memory_space<vmem>>, vector<3x64xf32>
    %c67 = arith.constant 67 : index
    %c0_48 = arith.constant 0 : index
    %67 = tpu.strided_load %arg6[%c67, %c0_48] {strides = array<i32: 2, 1>} : memref<72x64xf32, #tpu.memory_space<vmem>>, vector<3x64xf32>
    %68 = arith.maximumf %66, %67 : vector<3x64xf32>
    %69 = arith.maximumf %65, %68 : vector<3x64xf32>
    %c0_49 = arith.constant 0 : index
    %c15 = arith.constant 15 : index
    %c0_50 = arith.constant 0 : index
    %70 = vector.load %arg5[%c0_49, %c15, %c0_50] : memref<1x18x64xf32, #tpu.memory_space<vmem>>, vector<1x3x64xf32>
    %71 = vector.shape_cast %70 : vector<1x3x64xf32> to vector<3x64xf32>
    %72 = vector.shape_cast %69 : vector<3x64xf32> to vector<1x3x64xf32>
    tpu.vector_store %arg5[%c0_49, %c15, %c0_50], %72 {strides = array<i32>} : memref<1x18x64xf32, #tpu.memory_space<vmem>>, vector<1x3x64xf32>,
    return
  }
  func.func @transform_0(%arg0: i32) -> (i32, i32, i32) {
    %c0_i32 = arith.constant 0 : i32
    %c0_i32_0 = arith.constant 0 : i32
    %c0_i32_1 = arith.constant 0 : i32
    return %arg0, %c0_i32, %c0_i32_0 : i32, i32, i32
  }
  func.func @transform_1(%arg0: i32) -> (i32, i32) {
    %c0_i32 = arith.constant 0 : i32
    %c0_i32_0 = arith.constant 0 : i32
    %c0_i32_1 = arith.constant 0 : i32
    return %c0_i32, %c0_i32_0 : i32, i32
  }
  func.func @transform_2(%arg0: i32) -> (i32, i32) {
    %c0_i32 = arith.constant 0 : i32
    %c0_i32_0 = arith.constant 0 : i32
    %c0_i32_1 = arith.constant 0 : i32
    return %c0_i32, %c0_i32_0 : i32, i32
  }
  func.func @transform_3(%arg0: i32) -> (i32, i32) {
    %c0_i32 = arith.constant 0 : i32
    %c0_i32_0 = arith.constant 0 : i32
    %c0_i32_1 = arith.constant 0 : i32
    return %c0_i32, %c0_i32_0 : i32, i32
  }
  func.func @transform_4(%arg0: i32) -> (i32, i32, i32) {
    %c0_i32 = arith.constant 0 : i32
    %c0_i32_0 = arith.constant 0 : i32
    %c0_i32_1 = arith.constant 0 : i32
    return %arg0, %c0_i32, %c0_i32_0 : i32, i32, i32
  }
}

module attributes {stable_mosaic.version = 11 : i64} {
  func.func @kernel(%arg0: i32, %arg1: memref<1x18x576xbf16, #tpu.memory_space<vmem>>, %arg2: memref<576x64xbf16, #tpu.memory_space<vmem>>, %arg3: memref<1x64xf32, #tpu.memory_space<vmem>>, %arg4: memref<1x64xf32, #tpu.memory_space<vmem>>, %arg5: memref<1x2x64xf32, #tpu.memory_space<vmem>>, %arg6: memref<18x64xf32, #tpu.memory_space<vmem>>) attributes {dimension_semantics = [#tpu.dimension_semantics<parallel>], iteration_bounds = array<i64: 1>, scalar_prefetch = 0 : i64, scratch_operands = 1 : i64, tpu.core_type = #tpu.core_type<tc>, window_params = [{transform_indices = @transform_0, window_bounds = array<i64: 1, 18, 576>}, {pipeline_mode = #tpu.pipeline_mode<synchronous>, transform_indices = @transform_1, window_bounds = array<i64: 576, 64>}, {pipeline_mode = #tpu.pipeline_mode<synchronous>, transform_indices = @transform_2, window_bounds = array<i64: 1, 64>}, {pipeline_mode = #tpu.pipeline_mode<synchronous>, transform_indices = @transform_3, window_bounds = array<i64: 1, 64>}, {transform_indices = @transform_4, window_bounds = array<i64: 1, 2, 64>}]} {
    %c0 = arith.constant 0 : index
    %c0_0 = arith.constant 0 : index
    %c0_1 = arith.constant 0 : index
    %0 = vector.load %arg1[%c0, %c0_0, %c0_1] : memref<1x18x576xbf16, #tpu.memory_space<vmem>>, vector<1x18x576xbf16>
    %1 = vector.shape_cast %0 : vector<1x18x576xbf16> to vector<18x576xbf16>
    %c0_2 = arith.constant 0 : index
    %c0_3 = arith.constant 0 : index
    %2 = vector.load %arg2[%c0_2, %c0_3] : memref<576x64xbf16, #tpu.memory_space<vmem>>, vector<576x64xbf16>
    %cst = arith.constant dense<0.000000e+00> : vector<18x64xf32>
    %3 = tpu.matmul %1, %2, %cst {dimension_numbers = #tpu.dot_dimension_numbers<[1], [0], [0], [1], [0, 0, 1, 1], [], []>} : vector<18x576xbf16>, vector<576x64xbf16>, vector<18x64xf32> -> vector<18x64xf32>
    %c0_4 = arith.constant 0 : index
    %c0_5 = arith.constant 0 : index
    %4 = vector.load %arg3[%c0_4, %c0_5] : memref<1x64xf32, #tpu.memory_space<vmem>>, vector<1x64xf32>
    %5 = vector.broadcast %4 : vector<1x64xf32> to vector<18x64xf32>
    %6 = arith.mulf %3, %5 : vector<18x64xf32>
    %c0_6 = arith.constant 0 : index
    %c0_7 = arith.constant 0 : index
    %7 = vector.load %arg4[%c0_6, %c0_7] : memref<1x64xf32, #tpu.memory_space<vmem>>, vector<1x64xf32>
    %8 = vector.broadcast %7 : vector<1x64xf32> to vector<18x64xf32>
    %9 = arith.addf %6, %8 : vector<18x64xf32>
    %cst_8 = arith.constant 0.000000e+00 : f32
    %10 = vector.broadcast %cst_8 : f32 to vector<18x64xf32>
    %11 = arith.maximumf %9, %10 : vector<18x64xf32>
    %c0_9 = arith.constant 0 : index
    %c0_10 = arith.constant 0 : index
    %12 = vector.load %arg6[%c0_9, %c0_10] : memref<18x64xf32, #tpu.memory_space<vmem>>, vector<18x64xf32>
    tpu.vector_store %arg6[%c0_9, %c0_10], %11 {strides = array<i32>} : memref<18x64xf32, #tpu.memory_space<vmem>>, vector<18x64xf32>,
    %c0_11 = arith.constant 0 : index
    %c0_12 = arith.constant 0 : index
    %13 = vector.load %arg6[%c0_11, %c0_12] : memref<18x64xf32, #tpu.memory_space<vmem>>, vector<1x64xf32>
    %c1 = arith.constant 1 : index
    %c0_13 = arith.constant 0 : index
    %14 = vector.load %arg6[%c1, %c0_13] : memref<18x64xf32, #tpu.memory_space<vmem>>, vector<1x64xf32>
    %15 = arith.maximumf %13, %14 : vector<1x64xf32>
    %c3 = arith.constant 3 : index
    %c0_14 = arith.constant 0 : index
    %16 = vector.load %arg6[%c3, %c0_14] : memref<18x64xf32, #tpu.memory_space<vmem>>, vector<1x64xf32>
    %c4 = arith.constant 4 : index
    %c0_15 = arith.constant 0 : index
    %17 = vector.load %arg6[%c4, %c0_15] : memref<18x64xf32, #tpu.memory_space<vmem>>, vector<1x64xf32>
    %18 = arith.maximumf %16, %17 : vector<1x64xf32>
    %19 = arith.maximumf %15, %18 : vector<1x64xf32>
    %c0_16 = arith.constant 0 : index
    %c0_17 = arith.constant 0 : index
    %c0_18 = arith.constant 0 : index
    %20 = vector.load %arg5[%c0_16, %c0_17, %c0_18] : memref<1x2x64xf32, #tpu.memory_space<vmem>>, vector<1x1x64xf32>
    %21 = vector.shape_cast %20 : vector<1x1x64xf32> to vector<1x64xf32>
    %22 = vector.shape_cast %19 : vector<1x64xf32> to vector<1x1x64xf32>
    tpu.vector_store %arg5[%c0_16, %c0_17, %c0_18], %22 {strides = array<i32>} : memref<1x2x64xf32, #tpu.memory_space<vmem>>, vector<1x1x64xf32>,
    %c9 = arith.constant 9 : index
    %c0_19 = arith.constant 0 : index
    %23 = vector.load %arg6[%c9, %c0_19] : memref<18x64xf32, #tpu.memory_space<vmem>>, vector<1x64xf32>
    %c10 = arith.constant 10 : index
    %c0_20 = arith.constant 0 : index
    %24 = vector.load %arg6[%c10, %c0_20] : memref<18x64xf32, #tpu.memory_space<vmem>>, vector<1x64xf32>
    %25 = arith.maximumf %23, %24 : vector<1x64xf32>
    %c12 = arith.constant 12 : index
    %c0_21 = arith.constant 0 : index
    %26 = vector.load %arg6[%c12, %c0_21] : memref<18x64xf32, #tpu.memory_space<vmem>>, vector<1x64xf32>
    %c13 = arith.constant 13 : index
    %c0_22 = arith.constant 0 : index
    %27 = vector.load %arg6[%c13, %c0_22] : memref<18x64xf32, #tpu.memory_space<vmem>>, vector<1x64xf32>
    %28 = arith.maximumf %26, %27 : vector<1x64xf32>
    %29 = arith.maximumf %25, %28 : vector<1x64xf32>
    %c0_23 = arith.constant 0 : index
    %c1_24 = arith.constant 1 : index
    %c0_25 = arith.constant 0 : index
    %30 = vector.load %arg5[%c0_23, %c1_24, %c0_25] : memref<1x2x64xf32, #tpu.memory_space<vmem>>, vector<1x1x64xf32>
    %31 = vector.shape_cast %30 : vector<1x1x64xf32> to vector<1x64xf32>
    %32 = vector.shape_cast %29 : vector<1x64xf32> to vector<1x1x64xf32>
    tpu.vector_store %arg5[%c0_23, %c1_24, %c0_25], %32 {strides = array<i32>} : memref<1x2x64xf32, #tpu.memory_space<vmem>>, vector<1x1x64xf32>,
    return
  }
  func.func @transform_0(%arg0: i32) -> (i32, i32, i32) {
    %c0_i32 = arith.constant 0 : i32
    %c0_i32_0 = arith.constant 0 : i32
    %c0_i32_1 = arith.constant 0 : i32
    return %arg0, %c0_i32, %c0_i32_0 : i32, i32, i32
  }
  func.func @transform_1(%arg0: i32) -> (i32, i32) {
    %c0_i32 = arith.constant 0 : i32
    %c0_i32_0 = arith.constant 0 : i32
    %c0_i32_1 = arith.constant 0 : i32
    return %c0_i32, %c0_i32_0 : i32, i32
  }
  func.func @transform_2(%arg0: i32) -> (i32, i32) {
    %c0_i32 = arith.constant 0 : i32
    %c0_i32_0 = arith.constant 0 : i32
    %c0_i32_1 = arith.constant 0 : i32
    return %c0_i32, %c0_i32_0 : i32, i32
  }
  func.func @transform_3(%arg0: i32) -> (i32, i32) {
    %c0_i32 = arith.constant 0 : i32
    %c0_i32_0 = arith.constant 0 : i32
    %c0_i32_1 = arith.constant 0 : i32
    return %c0_i32, %c0_i32_0 : i32, i32
  }
  func.func @transform_4(%arg0: i32) -> (i32, i32, i32) {
    %c0_i32 = arith.constant 0 : i32
    %c0_i32_0 = arith.constant 0 : i32
    %c0_i32_1 = arith.constant 0 : i32
    return %arg0, %c0_i32, %c0_i32_0 : i32, i32, i32
  }
}

</mosaic_0001>

<bundles_post_ra>
// kernel: cnn_encoder_forward.4
= control target key start
LH: loop header
LB: loop body
LE: loop exit
PB: predicated region body
PF: predicated region fallthrough
CT: control target
= control target key end

     0   :  { %s2692_s15 = smov 0   ;;  %s3374_s0 = inlined_call_operand.vmem [shape: bf16[2,900,27], index: 0, kind: input, shape index: {}]   ;;  %s3375_s1 = inlined_call_operand.vmem [shape: bf16[27,64], index: 1, kind: input, shape index: {}]   ;;  %s3376_s2 = inlined_call_operand.vmem [shape: f32[1,64], index: 2, kind: input, shape index: {}]   ;;  %s3377_s3 = inlined_call_operand.vmem [shape: f32[1,64], index: 3, kind: input, shape index: {}]   ;;  %s3378_s4 = inlined_call_operand.vmem [shape: f32[2,225,64], index: 4, kind: output, shape index: {}]  }
   0x1 LB: > { %s2160_s16 = sadd.s32 4294967295, %s2662_s15   ;;  %p2164_p0 = scmp.ge.s32.totalorder %s2662_s15, 1  ;;  %s2662_s15 = sphi %s2692_s15, %s14_s15  }
   0x2   : > { %p162_p1 = scmp.lt.s32.totalorder %s2662_s15, 3 }
   0x4   : > { %p163_p2 = pnand %p2164_p0, %p162_p1 }
   0x5   : > { %p188_p3 = scmp.lt.s32.totalorder (!%p163_p2), %s2160_s16, 1 }
   0x6   : > { %166 = sbr.rel (%p163_p2) target bundleno = 463 (0x1cf), region = 36 }
   0xb   : > { %vm782_vm0 = vcmask 1044480   ;;  %v2664_v0 = vmov 0.0   ;;  %v2595_v1 = vld [vmem:[%s3375_s1 + $0x8] sm:$0x3f]   ;;  %vm783_vm1 = vcmask 1045504   ;;  %v2665_v2 = vmov 65535  }
   0xc   : > { %2346 = vmatprep.subr.bf16.mxu0 %v2664_v0  ;;  %2578 = vmatprep.subr.bf16.mxu1 %v2664_v0  ;;  %v784_v3 = vsel %vm782_vm0, 4294967295, %v2665_v2  ;;  %vm2666_vm2 = vmmov 0   ;;  %s3380_s16 = smov (!%p188_p3, %s2160_s16), 1  ;;  %v2596_v6 = vld [vmem:[%s3375_s1] sm:$0xff]   ;;  %vm610_vm3 = vcmask 220160   ;;  %vm1630_vm4 = vcmask 523264  }
   0xd   : > { %v785_v4 = vsel %vm783_vm1, %v784_v3, 0  ;;  %2350 = vmatprep.mubr.msk.bf16.mxu0 %vm2666_vm2, %v2664_v0  ;;  %2466 = vmatprep.mubr.msk.bf16.mxu1 %vm2666_vm2, %v2664_v0  ;;  %s2582_s21 = smul.u32 452, %s3380_s16  ;;  %v2919_v57 = vld [vmem:[%s3376_s2] ss:$0 sm:$0xff]  ;;  %vm1767_vm5 = vcmask 522240   ;;  %vm1743_vm6 = vcmask 519168  }
   0xe   : > { %v787_v5 = vand.u32 %v2595_v1, %v785_v4  ;;  %v2924_v59 = vld [vmem:[%s3377_s3] ss:$0 sm:$0xff]  ;;  %s2583_s29 = smul.u32 232, %s3380_s16 }
   0xf   : > { %s2720_s24 = scalar_lea.vmem %s3374_s0, %s2582_s21 }
  0x10   : > { %2347 = vmatpush3.bf16.msra.mxu0 %v787_v5  ;;  %2580 = vmatpush3.bf16.msra.mxu1 %v787_v5  ;;  %v2597_v7 = vld [vmem:[%s2720_s24] sm:$0xff]   ;;  %v2598_v8 = vld [vmem:[%s2720_s24 + $0xe8] sm:$0xff]   ;;  %v2600_v10 = vld [vmem:[%s2720_s24 + $0xf0] sm:$0xff]   ;;  %s3012_s6 = scalar_lea.vmem %s3378_s4, %s2583_s29 }
  0x11   : > { %2348 = vmatprep.subr.bf16.mxu0 %v2664_v0  ;;  %2579 = vmatprep.subr.bf16.mxu1 %v2664_v0  ;;  %v2599_v9 = vld [vmem:[%s2720_s24 + $0x8] sm:$0xff]   ;;  %v2601_v11 = vld [vmem:[%s2720_s24 + $0x10] sm:$0xff]   ;;  %v2602_v12 = vld [vmem:[%s2720_s24 + $0xf8] sm:$0xff]  }
  0x12   : > { %v2603_v13 = vld [vmem:[%s2720_s24 + $0x18] sm:$0xff]   ;;  %v2604_v14 = vld [vmem:[%s2720_s24 + $0x100] sm:$0xff]   ;;  %v2606_v16 = vld [vmem:[%s2720_s24 + $0x108] sm:$0xff]  }
  0x13   : > { %v2605_v15 = vld [vmem:[%s2720_s24 + $0x20] sm:$0xff]   ;;  %v2607_v17 = vld [vmem:[%s2720_s24 + $0x28] sm:$0xff]   ;;  %v2608_v18 = vld [vmem:[%s2720_s24 + $0x110] sm:$0xff]  }
  0x14   : > { %2349 = vmatpush3.bf16.msra.mxu0 %v2596_v6  ;;  %2581 = vmatpush3.bf16.msra.mxu1 %v2596_v6  ;;  %v2609_v19 = vld [vmem:[%s2720_s24 + $0x30] sm:$0xff]   ;;  %v2610_v20 = vld [vmem:[%s2720_s24 + $0x118] sm:$0xff]   ;;  %v2612_v22 = vld [vmem:[%s2720_s24 + $0x120] sm:$0xff]  }
  0x15   : > { %v2611_v21 = vld [vmem:[%s2720_s24 + $0x38] sm:$0xff]   ;;  %v2613_v23 = vld [vmem:[%s2720_s24 + $0x40] sm:$0xff]   ;;  %v2614_v24 = vld [vmem:[%s2720_s24 + $0x128] sm:$0xff]  }
  0x16   : > { %v2615_v25 = vld [vmem:[%s2720_s24 + $0x48] sm:$0xff]   ;;  %v2616_v26 = vld [vmem:[%s2720_s24 + $0x130] sm:$0xff]   ;;  %v2618_v28 = vld [vmem:[%s2720_s24 + $0x138] sm:$0xff]  }
  0x17   : > { %2351 = vmatmul.mubr.msk.bf16.vlgmr.msra.gmra.mxu0 %vm610_vm3, %v2597_v7  ;;  %2467 = vmatmul.mubr.msk.bf16.vlgmr.msra.gmra.mxu1 %vm610_vm3, %v2598_v8  ;;  %v2617_v27 = vld [vmem:[%s2720_s24 + $0x50] sm:$0xff]   ;;  %v2619_v29 = vld [vmem:[%s2720_s24 + $0x58] sm:$0xff]   ;;  %v2620_v30 = vld [vmem:[%s2720_s24 + $0x140] sm:$0xff]  }
  0x18   : > { %2354 = vmatprep.mubr.msk.bf16.mxu0 %vm2666_vm2, %v2664_v0  ;;  %2470 = vmatprep.mubr.msk.bf16.mxu1 %vm2666_vm2, %v2664_v0  ;;  %v2621_v31 = vld [vmem:[%s2720_s24 + $0x60] sm:$0xff]   ;;  %v2622_v32 = vld [vmem:[%s2720_s24 + $0x148] sm:$0xff]   ;;  %v2624_v34 = vld [vmem:[%s2720_s24 + $0x150] sm:$0xff]  }
  0x19   : > { %v2623_v33 = vld [vmem:[%s2720_s24 + $0x68] sm:$0xff]   ;;  %v2625_v35 = vld [vmem:[%s2720_s24 + $0x70] sm:$0xff]   ;;  %v2626_v36 = vld [vmem:[%s2720_s24 + $0x158] sm:$0xff]  }
  0x1a   : > { %v2627_v37 = vld [vmem:[%s2720_s24 + $0x78] sm:$0xff]   ;;  %v2628_v38 = vld [vmem:[%s2720_s24 + $0x160] sm:$0xff]   ;;  %v2630_v40 = vld [vmem:[%s2720_s24 + $0x168] sm:$0xff]  }
  0x1b   : > { %v2629_v39 = vld [vmem:[%s2720_s24 + $0x80] sm:$0xff]   ;;  %v2631_v41 = vld [vmem:[%s2720_s24 + $0x88] sm:$0xff]   ;;  %v2632_v42 = vld [vmem:[%s2720_s24 + $0x170] sm:$0xff]  }
  0x1c   : > { %v2633_v43 = vld [vmem:[%s2720_s24 + $0x90] sm:$0xff]   ;;  %v2634_v44 = vld [vmem:[%s2720_s24 + $0x178] sm:$0xff]   ;;  %v2636_v46 = vld [vmem:[%s2720_s24 + $0x180] sm:$0xff]  }
  0x1d   : > { %v2635_v45 = vld [vmem:[%s2720_s24 + $0x98] sm:$0xff]   ;;  %v2637_v47 = vld [vmem:[%s2720_s24 + $0xa0] sm:$0xff]   ;;  %v2638_v48 = vld [vmem:[%s2720_s24 + $0x188] sm:$0xff]  }
  0x1e   : > { %v2639_v49 = vld [vmem:[%s2720_s24 + $0xa8] sm:$0xff]   ;;  %v2640_v50 = vld [vmem:[%s2720_s24 + $0x190] sm:$0xff]   ;;  %v2642_v52 = vld [vmem:[%s2720_s24 + $0x198] sm:$0xff]  }
  0x1f   : > { %2355 = vmatmul.mubr.msk.bf16.gmra.mxu0 %vm610_vm3, %v2599_v9  ;;  %2471 = vmatmul.mubr.msk.bf16.gmra.mxu1 %vm610_vm3, %v2600_v10  ;;  %v2641_v51 = vld [vmem:[%s2720_s24 + $0xb0] sm:$0xff]   ;;  %v2643_v53 = vld [vmem:[%s2720_s24 + $0xb8] sm:$0xff]   ;;  %v2644_v54 = vld [vmem:[%s2720_s24 + $0x1a0] sm:$0xff]  }
  0x20   : > { %2358 = vmatprep.mubr.msk.bf16.mxu0 %vm2666_vm2, %v2664_v0  ;;  %2474 = vmatprep.mubr.msk.bf16.mxu1 %vm2666_vm2, %v2664_v0  ;;  %v2645_v55 = vld [vmem:[%s2720_s24 + $0xc0] sm:$0xff]   ;;  %v2646_v56 = vld [vmem:[%s2720_s24 + $0x1a8] sm:$0xff]   ;;  %v2648_v7 = vld [vmem:[%s2720_s24 + $0x1b0] sm:$0xff]  }
  0x21   : > { %v2647_v6 = vld [vmem:[%s2720_s24 + $0xc8] sm:$0xff]  }
  0x27   : > { %2359 = vmatmul.mubr.msk.bf16.gmra.mxu0 %vm610_vm3, %v2601_v11  ;;  %2475 = vmatmul.mubr.msk.bf16.gmra.mxu1 %vm610_vm3, %v2602_v12 }
  0x28   : > { %2362 = vmatprep.mubr.msk.bf16.mxu0 %vm2666_vm2, %v2664_v0  ;;  %2478 = vmatprep.mubr.msk.bf16.mxu1 %vm2666_vm2, %v2664_v0 }
  0x2f   : > { %2363 = vmatmul.mubr.msk.bf16.gmra.mxu0 %vm610_vm3, %v2603_v13  ;;  %2479 = vmatmul.mubr.msk.bf16.gmra.mxu1 %vm610_vm3, %v2604_v14 }
  0x30   : > { %2366 = vmatprep.mubr.msk.bf16.mxu0 %vm2666_vm2, %v2664_v0  ;;  %2482 = vmatprep.mubr.msk.bf16.mxu1 %vm2666_vm2, %v2664_v0 }
  0x37   : > { %2367 = vmatmul.mubr.msk.bf16.gmra.mxu0 %vm610_vm3, %v2605_v15  ;;  %2483 = vmatmul.mubr.msk.bf16.gmra.mxu1 %vm610_vm3, %v2606_v16 }
  0x38   : > { %2370 = vmatprep.mubr.msk.bf16.mxu0 %vm2666_vm2, %v2664_v0  ;;  %2486 = vmatprep.mubr.msk.bf16.mxu1 %vm2666_vm2, %v2664_v0 }
  0x3f   : > { %2371 = vmatmul.mubr.msk.bf16.gmra.mxu0 %vm610_vm3, %v2607_v17  ;;  %2487 = vmatmul.mubr.msk.bf16.gmra.mxu1 %vm610_vm3, %v2608_v18 }
  0x40   : > { %2374 = vmatprep.mubr.msk.bf16.mxu0 %vm2666_vm2, %v2664_v0  ;;  %2490 = vmatprep.mubr.msk.bf16.mxu1 %vm2666_vm2, %v2664_v0 }
  0x47   : > { %2375 = vmatmul.mubr.msk.bf16.gmra.mxu0 %vm610_vm3, %v2609_v19  ;;  %2491 = vmatmul.mubr.msk.bf16.gmra.mxu1 %vm610_vm3, %v2610_v20 }
  0x48   : > { %2378 = vmatprep.mubr.msk.bf16.mxu0 %vm2666_vm2, %v2664_v0  ;;  %2494 = vmatprep.mubr.msk.bf16.mxu1 %vm2666_vm2, %v2664_v0 }
  0x4f   : > { %2379 = vmatmul.mubr.msk.bf16.gmra.mxu0 %vm610_vm3, %v2611_v21  ;;  %2495 = vmatmul.mubr.msk.bf16.gmra.mxu1 %vm610_vm3, %v2612_v22 }
  0x50   : > { %2382 = vmatprep.mubr.msk.bf16.mxu0 %vm2666_vm2, %v2664_v0  ;;  %2498 = vmatprep.mubr.msk.bf16.mxu1 %vm2666_vm2, %v2664_v0 }
  0x57   : > { %2383 = vmatmul.mubr.msk.bf16.gmra.mxu0 %vm610_vm3, %v2613_v23  ;;  %2499 = vmatmul.mubr.msk.bf16.gmra.mxu1 %vm610_vm3, %v2614_v24 }
  0x58   : > { %2386 = vmatprep.mubr.msk.bf16.mxu0 %vm2666_vm2, %v2664_v0  ;;  %2502 = vmatprep.mubr.msk.bf16.mxu1 %vm2666_vm2, %v2664_v0 }
  0x5f   : > { %2387 = vmatmul.mubr.msk.bf16.gmra.mxu0 %vm610_vm3, %v2615_v25  ;;  %2503 = vmatmul.mubr.msk.bf16.gmra.mxu1 %vm610_vm3, %v2616_v26 }
  0x60   : > { %2390 = vmatprep.mubr.msk.bf16.mxu0 %vm2666_vm2, %v2664_v0  ;;  %2506 = vmatprep.mubr.msk.bf16.mxu1 %vm2666_vm2, %v2664_v0 }
  0x67   : > { %2391 = vmatmul.mubr.msk.bf16.gmra.mxu0 %vm610_vm3, %v2617_v27  ;;  %2507 = vmatmul.mubr.msk.bf16.gmra.mxu1 %vm610_vm3, %v2618_v28  ;;  %v2649_v28 = vld [vmem:[%s2720_s24 + $0xd0] sm:$0xff]  }
  0x68   : > { %2394 = vmatprep.mubr.msk.bf16.mxu0 %vm2666_vm2, %v2664_v0  ;;  %2510 = vmatprep.mubr.msk.bf16.mxu1 %vm2666_vm2, %v2664_v0 }
  0x6f   : > { %2395 = vmatmul.mubr.msk.bf16.gmra.mxu0 %vm610_vm3, %v2619_v29  ;;  %2511 = vmatmul.mubr.msk.bf16.gmra.mxu1 %vm610_vm3, %v2620_v30  ;;  %v2650_v29 = vld [vmem:[%s2720_s24 + $0x1b8] sm:$0xff]  }
  0x70   : > { %2398 = vmatprep.mubr.msk.bf16.mxu0 %vm2666_vm2, %v2664_v0  ;;  %2514 = vmatprep.mubr.msk.bf16.mxu1 %vm2666_vm2, %v2664_v0 }
  0x77   : > { %2399 = vmatmul.mubr.msk.bf16.gmra.mxu0 %vm610_vm3, %v2621_v31  ;;  %2515 = vmatmul.mubr.msk.bf16.gmra.mxu1 %vm610_vm3, %v2622_v32 }
  0x78   : > { %2402 = vmatprep.mubr.msk.bf16.mxu0 %vm2666_vm2, %v2664_v0  ;;  %2518 = vmatprep.mubr.msk.bf16.mxu1 %vm2666_vm2, %v2664_v0 }
  0x7f   : > { %2403 = vmatmul.mubr.msk.bf16.gmra.mxu0 %vm610_vm3, %v2623_v33  ;;  %2519 = vmatmul.mubr.msk.bf16.gmra.mxu1 %vm610_vm3, %v2624_v34 }
  0x80   : > { %2406 = vmatprep.mubr.msk.bf16.mxu0 %vm2666_vm2, %v2664_v0  ;;  %2522 = vmatprep.mubr.msk.bf16.mxu1 %vm2666_vm2, %v2664_v0 }
  0x87   : > { %2407 = vmatmul.mubr.msk.bf16.gmra.mxu0 %vm610_vm3, %v2625_v35  ;;  %2523 = vmatmul.mubr.msk.bf16.gmra.mxu1 %vm610_vm3, %v2626_v36 }
  0x88   : > { %2410 = vmatprep.mubr.msk.bf16.mxu0 %vm2666_vm2, %v2664_v0  ;;  %2526 = vmatprep.mubr.msk.bf16.mxu1 %vm2666_vm2, %v2664_v0 }
  0x8f   : > { %2411 = vmatmul.mubr.msk.bf16.gmra.mxu0 %vm610_vm3, %v2627_v37  ;;  %2527 = vmatmul.mubr.msk.bf16.gmra.mxu1 %vm610_vm3, %v2628_v38 }
  0x90   : > { %2414 = vmatprep.mubr.msk.bf16.mxu0 %vm2666_vm2, %v2664_v0  ;;  %2530 = vmatprep.mubr.msk.bf16.mxu1 %vm2666_vm2, %v2664_v0 }
  0x97   : > { %2415 = vmatmul.mubr.msk.bf16.gmra.mxu0 %vm610_vm3, %v2629_v39  ;;  %2531 = vmatmul.mubr.msk.bf16.gmra.mxu1 %vm610_vm3, %v2630_v40 }
  0x98   : > { %2418 = vmatprep.mubr.msk.bf16.mxu0 %vm2666_vm2, %v2664_v0  ;;  %2534 = vmatprep.mubr.msk.bf16.mxu1 %vm2666_vm2, %v2664_v0 }
  0x9f   : > { %2419 = vmatmul.mubr.msk.bf16.gmra.mxu0 %vm610_vm3, %v2631_v41  ;;  %2535 = vmatmul.mubr.msk.bf16.gmra.mxu1 %vm610_vm3, %v2632_v42 }
  0xa0   : > { %2422 = vmatprep.mubr.msk.bf16.mxu0 %vm2666_vm2, %v2664_v0  ;;  %2538 = vmatprep.mubr.msk.bf16.mxu1 %vm2666_vm2, %v2664_v0 }
  0xa7   : > { %2423 = vmatmul.mubr.msk.bf16.gmra.mxu0 %vm610_vm3, %v2633_v43  ;;  %2539 = vmatmul.mubr.msk.bf16.gmra.mxu1 %vm610_vm3, %v2634_v44 }
  0xa8   : > { %2426 = vmatprep.mubr.msk.bf16.mxu0 %vm2666_vm2, %v2664_v0  ;;  %2542 = vmatprep.mubr.msk.bf16.mxu1 %vm2666_vm2, %v2664_v0 }
  0xaf   : > { %2427 = vmatmul.mubr.msk.bf16.gmra.mxu0 %vm610_vm3, %v2635_v45  ;;  %2543 = vmatmul.mubr.msk.bf16.gmra.mxu1 %vm610_vm3, %v2636_v46 }
  0xb0   : > { %2430 = vmatprep.mubr.msk.bf16.mxu0 %vm2666_vm2, %v2664_v0  ;;  %2546 = vmatprep.mubr.msk.bf16.mxu1 %vm2666_vm2, %v2664_v0 }
  0xb7   : > { %2431 = vmatmul.mubr.msk.bf16.gmra.mxu0 %vm610_vm3, %v2637_v47  ;;  %2547 = vmatmul.mubr.msk.bf16.gmra.mxu1 %vm610_vm3, %v2638_v48 }
  0xb8   : > { %2434 = vmatprep.mubr.msk.bf16.mxu0 %vm2666_vm2, %v2664_v0  ;;  %2550 = vmatprep.mubr.msk.bf16.mxu1 %vm2666_vm2, %v2664_v0 }
  0xbf   : > { %2435 = vmatmul.mubr.msk.bf16.gmra.mxu0 %vm610_vm3, %v2639_v49  ;;  %2551 = vmatmul.mubr.msk.bf16.gmra.mxu1 %vm610_vm3, %v2640_v50  ;;  %v2651_v50 = vld [vmem:[%s2720_s24 + $0xd8] sm:$0xff]  }
  0xc0   : > { %2438 = vmatprep.mubr.msk.bf16.mxu0 %vm2666_vm2, %v2664_v0  ;;  %2554 = vmatprep.mubr.msk.bf16.mxu1 %vm2666_vm2, %v2664_v0 }
  0xc7   : > { %2439 = vmatmul.mubr.msk.bf16.gmra.mxu0 %vm610_vm3, %v2641_v51  ;;  %2555 = vmatmul.mubr.msk.bf16.gmra.mxu1 %vm610_vm3, %v2642_v52  ;;  %v2652_v51 = vld [vmem:[%s2720_s24 + $0x1c0] ss:$0 sps:$4 sm:$0x33]  }
  0xc8   : > { %2442 = vmatprep.mubr.msk.bf16.mxu0 %vm2666_vm2, %v2664_v0  ;;  %2558 = vmatprep.mubr.msk.bf16.mxu1 %vm2666_vm2, %v2664_v0 }
  0xcf   : > { %2443 = vmatmul.mubr.msk.bf16.gmra.mxu0 %vm610_vm3, %v2643_v53  ;;  %2559 = vmatmul.mubr.msk.bf16.gmra.mxu1 %vm610_vm3, %v2644_v54 }
  0xd0   : > { %2446 = vmatprep.mubr.msk.bf16.mxu0 %vm2666_vm2, %v2664_v0  ;;  %2562 = vmatprep.mubr.msk.bf16.mxu1 %vm2666_vm2, %v2664_v0 }
  0xd7   : > { %v823_v58 = vpop.f32.mrf.mxu0  ;;  %2447 = vmatmul.mubr.msk.bf16.gmra.mxu0 %vm610_vm3, %v2645_v55  ;;  %v1055_v60 = vpop.f32.mrf.mxu1  ;;  %2563 = vmatmul.mubr.msk.bf16.gmra.mxu1 %vm610_vm3, %v2646_v56 }
  0xd8   : > { %v1284_v61 = vmul.f32 %v2919_v57, %v823_v58  ;;  %v1342_v62 = vmul.f32 %v2919_v57, %v1055_v60  ;;  %2450 = vmatprep.mubr.msk.bf16.mxu0 %vm2666_vm2, %v2664_v0  ;;  %2566 = vmatprep.mubr.msk.bf16.mxu1 %vm2666_vm2, %v2664_v0 }
  0xd9   : > { %v2352_v63 = vpop.f32.mrf.mxu0  ;;  %v2468_v1 = vpop.f32.mrf.mxu1 }
  0xda   : > { %v1404_v2 = vadd.f32 %v2924_v59, %v1284_v61  ;;  %v1462_v3 = vadd.f32 %v2924_v59, %v1342_v62 }
  0xdb   : > { %v826_v4 = vpop.f32.mrf.mxu0  ;;  %v1058_v5 = vpop.f32.mrf.mxu1 }
  0xdc   : > { %v1517_v8 = vmax.f32 %v1404_v2, 0.0  ;;  %v1575_v9 = vmax.f32 %v1462_v3, 0.0  ;;  %v1285_v10 = vmul.f32 %v2919_v57, %v826_v4  ;;  %v1343_v11 = vmul.f32 %v2919_v57, %v1058_v5 }
  0xdd   : > { %v2353_v12 = vpop.f32.mrf.mxu0  ;;  %v2469_v13 = vpop.f32.mrf.mxu1 }
  0xde   : > { %1631 = vst.msk [vmem:[#allocation2] sm:$0xff] %vm1630_vm4, %v1517_v8  ;;  %1689 = vst.msk [vmem:[#allocation2 + $0x1d0] sm:$0xff] %vm1630_vm4, %v1575_v9  ;;  %v1405_v14 = vadd.f32 %v2924_v59, %v1285_v10  ;;  %v1463_v15 = vadd.f32 %v2924_v59, %v1343_v11  ;;  %v2653_v11 = vld [vmem:[%s2720_s24 + $0xe0] sm:$0xff]  }
  0xdf   : > { %v831_v16 = vpop.f32.mrf.mxu0  ;;  %2451 = vmatmul.mubr.msk.bf16.gmra.mxu0 %vm610_vm3, %v2647_v6  ;;  %v1063_v17 = vpop.f32.mrf.mxu1  ;;  %2567 = vmatmul.mubr.msk.bf16.gmra.mxu1 %vm610_vm3, %v2648_v7 }
  0xe0   : > { %v1518_v18 = vmax.f32 %v1405_v14, 0.0  ;;  %v1576_v19 = vmax.f32 %v1463_v15, 0.0  ;;  %v1286_v20 = vmul.f32 %v2919_v57, %v831_v16  ;;  %v1344_v21 = vmul.f32 %v2919_v57, %v1063_v17  ;;  %2454 = vmatprep.mubr.msk.bf16.mxu0 %vm2666_vm2, %v2664_v0  ;;  %2570 = vmatprep.mubr.msk.bf16.mxu1 %vm2666_vm2, %v2664_v0 }
  0xe1   : > { %v2356_v22 = vpop.f32.mrf.mxu0  ;;  %v2472_v23 = vpop.f32.mrf.mxu1 }
  0xe2   : > { %1632 = vst.msk [vmem:[#allocation2 + $0x8] sm:$0xff] %vm1630_vm4, %v1518_v18  ;;  %1690 = vst.msk [vmem:[#allocation2 + $0x1d8] sm:$0xff] %vm1630_vm4, %v1576_v19  ;;  %v1406_v24 = vadd.f32 %v2924_v59, %v1286_v20  ;;  %v1464_v25 = vadd.f32 %v2924_v59, %v1344_v21 }
  0xe3   : > { %v834_v26 = vpop.f32.mrf.mxu0  ;;  %v1066_v27 = vpop.f32.mrf.mxu1 }
  0xe4   : > { %v1519_v30 = vmax.f32 %v1406_v24, 0.0  ;;  %v1577_v31 = vmax.f32 %v1464_v25, 0.0  ;;  %v1287_v32 = vmul.f32 %v2919_v57, %v834_v26  ;;  %v1345_v33 = vmul.f32 %v2919_v57, %v1066_v27 }
  0xe5   : > { %v2357_v34 = vpop.f32.mrf.mxu0  ;;  %v2473_v35 = vpop.f32.mrf.mxu1 }
  0xe6   : > { %1633 = vst.msk [vmem:[#allocation2 + $0x10] sm:$0xff] %vm1630_vm4, %v1519_v30  ;;  %1691 = vst.msk [vmem:[#allocation2 + $0x1e0] sm:$0xff] %vm1630_vm4, %v1577_v31  ;;  %v1407_v36 = vadd.f32 %v2924_v59, %v1287_v32  ;;  %v1465_v37 = vadd.f32 %v2924_v59, %v1345_v33 }
  0xe7   : > { %v839_v38 = vpop.f32.mrf.mxu0  ;;  %2455 = vmatmul.mubr.msk.bf16.gmra.mxu0 %vm610_vm3, %v2649_v28  ;;  %v1071_v39 = vpop.f32.mrf.mxu1  ;;  %2571 = vmatmul.mubr.msk.bf16.gmra.mxu1 %vm610_vm3, %v2650_v29 }
  0xe8   : > { %v1520_v40 = vmax.f32 %v1407_v36, 0.0  ;;  %v1578_v41 = vmax.f32 %v1465_v37, 0.0  ;;  %v1288_v42 = vmul.f32 %v2919_v57, %v839_v38  ;;  %v1346_v43 = vmul.f32 %v2919_v57, %v1071_v39  ;;  %2458 = vmatprep.mubr.msk.bf16.mxu0 %vm2666_vm2, %v2664_v0  ;;  %2574 = vmatprep.mubr.msk.bf16.mxu1 %vm2666_vm2, %v2664_v0 }
  0xe9   : > { %v2360_v44 = vpop.f32.mrf.mxu0  ;;  %v2476_v45 = vpop.f32.mrf.mxu1  ;;  %v1745_v19 = vld [vmem:[#allocation2] ss:$2 sm:$0xff]  ;;  %v1749_v20 = vld [vmem:[#allocation2 + $0x1] ss:$2 sm:$0xff] }
  0xea   : > { %1634 = vst.msk [vmem:[#allocation2 + $0x18] sm:$0xff] %vm1630_vm4, %v1520_v40  ;;  %1692 = vst.msk [vmem:[#allocation2 + $0x1e8] sm:$0xff] %vm1630_vm4, %v1578_v41  ;;  %v1408_v46 = vadd.f32 %v2924_v59, %v1288_v42  ;;  %v1466_v47 = vadd.f32 %v2924_v59, %v1346_v43  ;;  %v1752_v31 = vmax.f32 %v1745_v19, %v1749_v20 }
  0xeb   : > { %v842_v48 = vpop.f32.mrf.mxu0  ;;  %v1074_v49 = vpop.f32.mrf.mxu1 }
  0xec   : > { %v1521_v52 = vmax.f32 %v1408_v46, 0.0  ;;  %v1579_v53 = vmax.f32 %v1466_v47, 0.0  ;;  %v1289_v54 = vmul.f32 %v2919_v57, %v842_v48  ;;  %v1347_v55 = vmul.f32 %v2919_v57, %v1074_v49 }
  0xed   : > { %v2361_v56 = vpop.f32.mrf.mxu0  ;;  %v2477_v58 = vpop.f32.mrf.mxu1 }
  0xee   : > { %1635 = vst.msk [vmem:[#allocation2 + $0x20] sm:$0xff] %vm1630_vm4, %v1521_v52  ;;  %1693 = vst.msk [vmem:[#allocation2 + $0x1f0] sm:$0xff] %vm1630_vm4, %v1579_v53  ;;  %v1409_v60 = vadd.f32 %v2924_v59, %v1289_v54  ;;  %v1467_v61 = vadd.f32 %v2924_v59, %v1347_v55 }
  0xef   : > { %v847_v62 = vpop.f32.mrf.mxu0  ;;  %2459 = vmatmul.mubr.msk.bf16.gmra.mxu0 %vm610_vm3, %v2651_v50  ;;  %v1079_v63 = vpop.f32.mrf.mxu1  ;;  %2575 = vmatmul.mubr.msk.bf16.gmra.mxu1 %vm610_vm3, %v2652_v51 }
  0xf0   : > { %v1522_v1 = vmax.f32 %v1409_v60, 0.0  ;;  %v1580_v2 = vmax.f32 %v1467_v61, 0.0  ;;  %v1290_v3 = vmul.f32 %v2919_v57, %v847_v62  ;;  %v1348_v4 = vmul.f32 %v2919_v57, %v1079_v63  ;;  %2462 = vmatprep.mubr.msk.bf16.mxu0 %vm2666_vm2, %v2664_v0 }
  0xf1   : > { %v2364_v5 = vpop.f32.mrf.mxu0  ;;  %v2480_v6 = vpop.f32.mrf.mxu1  ;;  %v1747_v44 = vld [vmem:[#allocation2 + $0x10] ss:$2 sm:$0x7f]  ;;  %v1751_v45 = vld [vmem:[#allocation2 + $0x11] ss:$2 sm:$0x7f] }
  0xf2   : > { %1636 = vst.msk [vmem:[#allocation2 + $0x28] sm:$0xff] %vm1630_vm4, %v1522_v1  ;;  %1694 = vst.msk [vmem:[#allocation2 + $0x1f8] sm:$0xff] %vm1630_vm4, %v1580_v2  ;;  %v1410_v7 = vadd.f32 %v2924_v59, %v1290_v3  ;;  %v1468_v8 = vadd.f32 %v2924_v59, %v1348_v4  ;;  %v1938_v50 = vld [vmem:[#allocation2 + $0x1e0] ss:$2 sm:$0xff]  ;;  %v1942_v51 = vld [vmem:[#allocation2 + $0x1e1] ss:$2 sm:$0xff]  ;;  %v1753_v55 = vmax.f32 %v1747_v44, %v1751_v45 }
  0xf3   : > { %v850_v9 = vpop.f32.mrf.mxu0  ;;  %v1082_v10 = vpop.f32.mrf.mxu1  ;;  %v1945_v5 = vmax.f32 %v1938_v50, %v1942_v51 }
  0xf4   : > { %v1523_v12 = vmax.f32 %v1410_v7, 0.0  ;;  %v1581_v13 = vmax.f32 %v1468_v8, 0.0  ;;  %v1291_v14 = vmul.f32 %v2919_v57, %v850_v9  ;;  %v1349_v0 = vmul.f32 %v2919_v57, %v1082_v10 }
  0xf5   : > { %v2365_v15 = vpop.f32.mrf.mxu0  ;;  %v2481_v16 = vpop.f32.mrf.mxu1 }
  0xf6   : > { %1637 = vst.msk [vmem:[#allocation2 + $0x30] sm:$0xff] %vm1630_vm4, %v1523_v12  ;;  %1695 = vst.msk [vmem:[#allocation2 + $0x200] sm:$0xff] %vm1630_vm4, %v1581_v13  ;;  %v1411_v17 = vadd.f32 %v2924_v59, %v1291_v14  ;;  %v1469_v18 = vadd.f32 %v2924_v59, %v1349_v0 }
  0xf7   : > { %v855_v21 = vpop.f32.mrf.mxu0  ;;  %2463 = vmatmul.mubr.msk.bf16.gmra.mxu0 %vm610_vm3, %v2653_v11  ;;  %v1087_v22 = vpop.f32.mrf.mxu1 }
  0xf8   : > { %v1524_v23 = vmax.f32 %v1411_v17, 0.0  ;;  %v1582_v24 = vmax.f32 %v1469_v18, 0.0  ;;  %v1292_v25 = vmul.f32 %v2919_v57, %v855_v21  ;;  %v1350_v26 = vmul.f32 %v2919_v57, %v1087_v22 }
  0xf9   : > { %v1755_v27 = vld [vmem:[#allocation2 + $0x1e] ss:$2 sm:$0xff]  ;;  %v1759_v28 = vld [vmem:[#allocation2 + $0x1f] ss:$2 sm:$0xff]  ;;  %v2368_v29 = vpop.f32.mrf.mxu0  ;;  %v2484_v30 = vpop.f32.mrf.mxu1 }
  0xfa   : > { %v1762_v32 = vmax.f32 %v1755_v27, %v1759_v28  ;;  %1638 = vst.msk [vmem:[#allocation2 + $0x38] sm:$0xff] %vm1630_vm4, %v1524_v23  ;;  %1696 = vst.msk [vmem:[#allocation2 + $0x208] sm:$0xff] %vm1630_vm4, %v1582_v24  ;;  %v1412_v33 = vadd.f32 %v2924_v59, %v1292_v25  ;;  %v1470_v34 = vadd.f32 %v2924_v59, %v1350_v26  ;;  %v1940_v17 = vld [vmem:[#allocation2 + $0x1f0] ss:$2 sm:$0x7f] }
  0xfb   : > { %v858_v35 = vpop.f32.mrf.mxu0  ;;  %v1090_v36 = vpop.f32.mrf.mxu1  ;;  %v1944_v21 = vld [vmem:[#allocation2 + $0x1f1] ss:$2 sm:$0x7f] }
  0xfc   : > { %v1764_v37 = vmax.f32 %v1752_v31, %v1762_v32  ;;  %v1525_v38 = vmax.f32 %v1412_v33, 0.0  ;;  %v1583_v39 = vmax.f32 %v1470_v34, 0.0  ;;  %v1293_v40 = vmul.f32 %v2919_v57, %v858_v35 }
  0xfd   : > { %v1351_v41 = vmul.f32 %v2919_v57, %v1090_v36  ;;  %v2369_v42 = vpop.f32.mrf.mxu0  ;;  %v2485_v43 = vpop.f32.mrf.mxu1  ;;  %v1946_v30 = vmax.f32 %v1940_v17, %v1944_v21 }
  0xfe   : > { %1766 = vst.msk [vmem:[%s3012_s6] sm:$0xff] %vm1630_vm4, %v1764_v37  ;;  %1639 = vst.msk [vmem:[#allocation2 + $0x40] sm:$0xff] %vm1630_vm4, %v1525_v38  ;;  %v1413_v46 = vadd.f32 %v2924_v59, %v1293_v40 }
  0xff   : > { %1697 = vst.msk [vmem:[#allocation2 + $0x210] sm:$0xff] %vm1630_vm4, %v1583_v39  ;;  %v1471_v47 = vadd.f32 %v2924_v59, %v1351_v41  ;;  %v863_v48 = vpop.f32.mrf.mxu0  ;;  %v1095_v49 = vpop.f32.mrf.mxu1 }
 0x100   : > { %v1526_v52 = vmax.f32 %v1413_v46, 0.0  ;;  %v1294_v53 = vmul.f32 %v2919_v57, %v863_v48  ;;  %v1352_v54 = vmul.f32 %v2919_v57, %v1095_v49 }
 0x101   : > { %v1757_v56 = vld [vmem:[#allocation2 + $0x2e] ss:$2 sm:$0x7f]  ;;  %v1761_v58 = vld [vmem:[#allocation2 + $0x2f] ss:$2 sm:$0x7f]  ;;  %v2372_v60 = vpop.f32.mrf.mxu0  ;;  %v2488_v61 = vpop.f32.mrf.mxu1 }
 0x102   : > { %v1763_v62 = vmax.f32 %v1757_v56, %v1761_v58  ;;  %v1948_v63 = vld [vmem:[#allocation2 + $0x1fe] ss:$2 sm:$0xff]  ;;  %v1952_v1 = vld [vmem:[#allocation2 + $0x1ff] ss:$2 sm:$0xff]  ;;  %1640 = vst.msk [vmem:[#allocation2 + $0x48] sm:$0xff] %vm1630_vm4, %v1526_v52  ;;  %v1584_v2 = vmax.f32 %v1471_v47, 0.0  ;;  %v1414_v3 = vadd.f32 %v2924_v59, %v1294_v53  ;;  %v1472_v4 = vadd.f32 %v2924_v59, %v1352_v54 }
 0x103   : > { %v1955_v6 = vmax.f32 %v1948_v63, %v1952_v1  ;;  %v866_v7 = vpop.f32.mrf.mxu0  ;;  %v1098_v8 = vpop.f32.mrf.mxu1 }
 0x104   : > { %v1765_v9 = vmax.f32 %v1753_v55, %v1763_v62  ;;  %1698 = vst.msk [vmem:[#allocation2 + $0x218] sm:$0xff] %vm1630_vm4, %v1584_v2  ;;  %v1527_v10 = vmax.f32 %v1414_v3, 0.0  ;;  %v1585_v11 = vmax.f32 %v1472_v4, 0.0  ;;  %v1295_v12 = vmul.f32 %v2919_v57, %v866_v7 }
 0x105   : > { %v1957_v13 = vmax.f32 %v1945_v5, %v1955_v6  ;;  %v1353_v14 = vmul.f32 %v2919_v57, %v1098_v8  ;;  %v2373_v0 = vpop.f32.mrf.mxu0  ;;  %v2489_v15 = vpop.f32.mrf.mxu1 }
 0x106   : > { %1768 = vst.msk [vmem:[%s3012_s6 + $0x8] sm:$0x7f] %vm1767_vm5, %v1765_v9  ;;  %v1415_v16 = vadd.f32 %v2924_v59, %v1295_v12 }
 0x107   : > { %1641 = vst.msk [vmem:[#allocation2 + $0x50] sm:$0xff] %vm1630_vm4, %v1527_v10  ;;  %1699 = vst.msk [vmem:[#allocation2 + $0x220] sm:$0xff] %vm1630_vm4, %v1585_v11  ;;  %v1473_v18 = vadd.f32 %v2924_v59, %v1353_v14  ;;  %v871_v19 = vpop.f32.mrf.mxu0  ;;  %v1103_v20 = vpop.f32.mrf.mxu1 }
 0x108   : > { %1959 = vst.msk [vmem:[%s3012_s6 + $0x78] sm:$0xff] %vm1630_vm4, %v1957_v13  ;;  %v1528_v22 = vmax.f32 %v1415_v16, 0.0  ;;  %v1296_v23 = vmul.f32 %v2919_v57, %v871_v19  ;;  %v1354_v24 = vmul.f32 %v2919_v57, %v1103_v20 }
 0x109   : > { %v1586_v25 = vmax.f32 %v1473_v18, 0.0  ;;  %v2376_v26 = vpop.f32.mrf.mxu0  ;;  %v2492_v27 = vpop.f32.mrf.mxu1  ;;  %v1770_v4 = vld [vmem:[#allocation2 + $0x3c] ss:$2 sm:$0xff]  ;;  %v1774_v5 = vld [vmem:[#allocation2 + $0x3d] ss:$2 sm:$0xff] }
 0x10a   : > { %1642 = vst.msk [vmem:[#allocation2 + $0x58] sm:$0xff] %vm1630_vm4, %v1528_v22  ;;  %v1416_v28 = vadd.f32 %v2924_v59, %v1296_v23  ;;  %v1474_v29 = vadd.f32 %v2924_v59, %v1354_v24  ;;  %v1777_v15 = vmax.f32 %v1770_v4, %v1774_v5 }
 0x10b   : > { %v1950_v31 = vld [vmem:[#allocation2 + $0x20e] ss:$2 sm:$0x7f]  ;;  %v1954_v32 = vld [vmem:[#allocation2 + $0x20f] ss:$2 sm:$0x7f]  ;;  %v874_v33 = vpop.f32.mrf.mxu0  ;;  %v1106_v34 = vpop.f32.mrf.mxu1 }
 0x10c   : > { %1700 = vst.msk [vmem:[#allocation2 + $0x228] sm:$0xff] %vm1630_vm4, %v1586_v25  ;;  %v1956_v35 = vmax.f32 %v1950_v31, %v1954_v32  ;;  %v1529_v36 = vmax.f32 %v1416_v28, 0.0  ;;  %v1587_v37 = vmax.f32 %v1474_v29, 0.0  ;;  %v1297_v38 = vmul.f32 %v2919_v57, %v874_v33 }
 0x10d   : > { %v1355_v39 = vmul.f32 %v2919_v57, %v1106_v34  ;;  %v2377_v40 = vpop.f32.mrf.mxu0  ;;  %v2493_v41 = vpop.f32.mrf.mxu1 }
 0x10e   : > { %v1958_v42 = vmax.f32 %v1946_v30, %v1956_v35  ;;  %1643 = vst.msk [vmem:[#allocation2 + $0x60] sm:$0xff] %vm1630_vm4, %v1529_v36  ;;  %1701 = vst.msk [vmem:[#allocation2 + $0x230] sm:$0xff] %vm1630_vm4, %v1587_v37  ;;  %v1417_v43 = vadd.f32 %v2924_v59, %v1297_v38 }
 0x10f   : > { %v1475_v44 = vadd.f32 %v2924_v59, %v1355_v39  ;;  %v879_v45 = vpop.f32.mrf.mxu0  ;;  %v1111_v46 = vpop.f32.mrf.mxu1 }
 0x110   : > { %1960 = vst.msk [vmem:[%s3012_s6 + $0x80] sm:$0x7f] %vm1767_vm5, %v1958_v42  ;;  %v1530_v47 = vmax.f32 %v1417_v43, 0.0  ;;  %v1298_v48 = vmul.f32 %v2919_v57, %v879_v45  ;;  %v1356_v49 = vmul.f32 %v2919_v57, %v1111_v46 }
 0x111   : > { %v2380_v50 = vpop.f32.mrf.mxu0  ;;  %v2496_v51 = vpop.f32.mrf.mxu1  ;;  %v1588_v52 = vmax.f32 %v1475_v44, 0.0  ;;  %v1772_v19 = vld [vmem:[#allocation2 + $0x4c] ss:$2 sm:$0x7f] }
 0x112   : > { %1644 = vst.msk [vmem:[#allocation2 + $0x68] sm:$0xff] %vm1630_vm4, %v1530_v47  ;;  %v1418_v53 = vadd.f32 %v2924_v59, %v1298_v48  ;;  %v1476_v54 = vadd.f32 %v2924_v59, %v1356_v49  ;;  %v1776_v20 = vld [vmem:[#allocation2 + $0x4d] ss:$2 sm:$0x7f] }
 0x113   : > { %v882_v55 = vpop.f32.mrf.mxu0  ;;  %v1114_v56 = vpop.f32.mrf.mxu1  ;;  %1702 = vst.msk [vmem:[#allocation2 + $0x238] sm:$0xff] %vm1630_vm4, %v1588_v52  ;;  %v1778_v32 = vmax.f32 %v1772_v19, %v1776_v20  ;;  %v1962_v34 = vld [vmem:[#allocation2 + $0x21c] ss:$2 sm:$0xff]  ;;  %v1966_v35 = vld [vmem:[#allocation2 + $0x21d] ss:$2 sm:$0xff] }
 0x114   : > { %v1531_v58 = vmax.f32 %v1418_v53, 0.0  ;;  %v1589_v60 = vmax.f32 %v1476_v54, 0.0  ;;  %v1299_v61 = vmul.f32 %v2919_v57, %v882_v55  ;;  %v1357_v62 = vmul.f32 %v2919_v57, %v1114_v56 }
 0x115   : > { %v2381_v63 = vpop.f32.mrf.mxu0  ;;  %v2497_v1 = vpop.f32.mrf.mxu1  ;;  %v1969_v49 = vmax.f32 %v1962_v34, %v1966_v35 }
 0x116   : > { %1645 = vst.msk [vmem:[#allocation2 + $0x70] sm:$0xff] %vm1630_vm4, %v1531_v58  ;;  %1703 = vst.msk [vmem:[#allocation2 + $0x240] sm:$0xff] %vm1630_vm4, %v1589_v60  ;;  %v1419_v2 = vadd.f32 %v2924_v59, %v1299_v61  ;;  %v1477_v3 = vadd.f32 %v2924_v59, %v1357_v62 }
 0x117   : > { %v887_v6 = vpop.f32.mrf.mxu0  ;;  %v1119_v7 = vpop.f32.mrf.mxu1 }
 0x118   : > { %v1532_v8 = vmax.f32 %v1419_v2, 0.0  ;;  %v1590_v9 = vmax.f32 %v1477_v3, 0.0  ;;  %v1300_v10 = vmul.f32 %v2919_v57, %v887_v6  ;;  %v1358_v11 = vmul.f32 %v2919_v57, %v1119_v7 }
 0x119   : > { %v1780_v12 = vld [vmem:[#allocation2 + $0x5a] ss:$2 sm:$0xff]  ;;  %v1784_v13 = vld [vmem:[#allocation2 + $0x5b] ss:$2 sm:$0xff]  ;;  %v2384_v14 = vpop.f32.mrf.mxu0  ;;  %v2500_v0 = vpop.f32.mrf.mxu1 }
 0x11a   : > { %v1787_v16 = vmax.f32 %v1780_v12, %v1784_v13  ;;  %1646 = vst.msk [vmem:[#allocation2 + $0x78] sm:$0xff] %vm1630_vm4, %v1532_v8  ;;  %1704 = vst.msk [vmem:[#allocation2 + $0x248] sm:$0xff] %vm1630_vm4, %v1590_v9  ;;  %v1420_v17 = vadd.f32 %v2924_v59, %v1300_v10  ;;  %v1478_v18 = vadd.f32 %v2924_v59, %v1358_v11  ;;  %v1964_v53 = vld [vmem:[#allocation2 + $0x22c] ss:$2 sm:$0x7f] }
 0x11b   : > { %v890_v21 = vpop.f32.mrf.mxu0  ;;  %v1122_v22 = vpop.f32.mrf.mxu1  ;;  %v1968_v56 = vld [vmem:[#allocation2 + $0x22d] ss:$2 sm:$0x7f] }
 0x11c   : > { %v1789_v23 = vmax.f32 %v1777_v15, %v1787_v16  ;;  %v1533_v24 = vmax.f32 %v1420_v17, 0.0  ;;  %v1591_v25 = vmax.f32 %v1478_v18, 0.0  ;;  %v1301_v28 = vmul.f32 %v2919_v57, %v890_v21 }
 0x11d   : > { %v1782_v26 = vld [vmem:[#allocation2 + $0x6a] ss:$2 sm:$0x7f]  ;;  %v1786_v27 = vld [vmem:[#allocation2 + $0x6b] ss:$2 sm:$0x7f]  ;;  %v1359_v29 = vmul.f32 %v2919_v57, %v1122_v22  ;;  %v2385_v30 = vpop.f32.mrf.mxu0  ;;  %v2501_v31 = vpop.f32.mrf.mxu1  ;;  %v1970_v6 = vmax.f32 %v1964_v53, %v1968_v56 }
 0x11e   : > { %1791 = vst.msk [vmem:[%s3012_s6 + $0xf] sm:$0xff] %vm1630_vm4, %v1789_v23  ;;  %v1788_v33 = vmax.f32 %v1782_v26, %v1786_v27  ;;  %1647 = vst.msk [vmem:[#allocation2 + $0x80] sm:$0xff] %vm1630_vm4, %v1533_v24  ;;  %v1421_v36 = vadd.f32 %v2924_v59, %v1301_v28 }
 0x11f   : > { %1705 = vst.msk [vmem:[#allocation2 + $0x250] sm:$0xff] %vm1630_vm4, %v1591_v25  ;;  %v1479_v37 = vadd.f32 %v2924_v59, %v1359_v29  ;;  %v895_v38 = vpop.f32.mrf.mxu0  ;;  %v1127_v39 = vpop.f32.mrf.mxu1 }
 0x120   : > { %v1790_v40 = vmax.f32 %v1778_v32, %v1788_v33  ;;  %v1302_v41 = vmul.f32 %v2919_v57, %v895_v38  ;;  %v1360_v42 = vmul.f32 %v2919_v57, %v1127_v39  ;;  %v1534_v45 = vmax.f32 %v1421_v36, 0.0 }
 0x121   : > { %v1972_v43 = vld [vmem:[#allocation2 + $0x23a] ss:$2 sm:$0xff]  ;;  %v1976_v44 = vld [vmem:[#allocation2 + $0x23b] ss:$2 sm:$0xff]  ;;  %v1592_v46 = vmax.f32 %v1479_v37, 0.0  ;;  %v2388_v47 = vpop.f32.mrf.mxu0  ;;  %v2504_v48 = vpop.f32.mrf.mxu1 }
 0x122   : > { %1792 = vst.msk [vmem:[%s3012_s6 + $0x17] sm:$0x7f] %vm1767_vm5, %v1790_v40  ;;  %v1979_v50 = vmax.f32 %v1972_v43, %v1976_v44  ;;  %v1422_v51 = vadd.f32 %v2924_v59, %v1302_v41  ;;  %v1480_v52 = vadd.f32 %v2924_v59, %v1360_v42 }
 0x123   : > { %1648 = vst.msk [vmem:[#allocation2 + $0x88] sm:$0xff] %vm1630_vm4, %v1534_v45  ;;  %1706 = vst.msk [vmem:[#allocation2 + $0x258] sm:$0xff] %vm1630_vm4, %v1592_v46  ;;  %v898_v54 = vpop.f32.mrf.mxu0  ;;  %v1130_v55 = vpop.f32.mrf.mxu1 }
 0x124   : > { %v1981_v58 = vmax.f32 %v1969_v49, %v1979_v50  ;;  %v1535_v60 = vmax.f32 %v1422_v51, 0.0  ;;  %v1593_v61 = vmax.f32 %v1480_v52, 0.0  ;;  %v1303_v62 = vmul.f32 %v2919_v57, %v898_v54 }
 0x125   : > { %v1361_v63 = vmul.f32 %v2919_v57, %v1130_v55  ;;  %v2389_v1 = vpop.f32.mrf.mxu0  ;;  %v2505_v2 = vpop.f32.mrf.mxu1  ;;  %v1794_v39 = vld [vmem:[#allocation2 + $0x78] ss:$2 sm:$0xff]  ;;  %v1798_v40 = vld [vmem:[#allocation2 + $0x79] ss:$2 sm:$0xff] }
 0x126   : > { %1983 = vst.msk [vmem:[%s3012_s6 + $0x87] sm:$0xff] %vm1630_vm4, %v1981_v58  ;;  %v1974_v3 = vld [vmem:[#allocation2 + $0x24a] ss:$2 sm:$0x7f]  ;;  %1649 = vst.msk [vmem:[#allocation2 + $0x90] sm:$0xff] %vm1630_vm4, %v1535_v60  ;;  %v1423_v5 = vadd.f32 %v2924_v59, %v1303_v62  ;;  %v1801_v51 = vmax.f32 %v1794_v39, %v1798_v40 }
 0x127   : > { %v1978_v4 = vld [vmem:[#allocation2 + $0x24b] ss:$2 sm:$0x7f]  ;;  %1707 = vst.msk [vmem:[#allocation2 + $0x260] sm:$0xff] %vm1630_vm4, %v1593_v61  ;;  %v1481_v8 = vadd.f32 %v2924_v59, %v1361_v63  ;;  %v903_v9 = vpop.f32.mrf.mxu0  ;;  %v1135_v10 = vpop.f32.mrf.mxu1 }
 0x128   : > { %v1980_v7 = vmax.f32 %v1974_v3, %v1978_v4  ;;  %v1536_v11 = vmax.f32 %v1423_v5, 0.0  ;;  %v1304_v12 = vmul.f32 %v2919_v57, %v903_v9  ;;  %v1362_v13 = vmul.f32 %v2919_v57, %v1135_v10 }
 0x129   : > { %v1594_v0 = vmax.f32 %v1481_v8, 0.0  ;;  %v2392_v15 = vpop.f32.mrf.mxu0  ;;  %v2508_v16 = vpop.f32.mrf.mxu1 }
 0x12a   : > { %v1982_v14 = vmax.f32 %v1970_v6, %v1980_v7  ;;  %1650 = vst.msk [vmem:[#allocation2 + $0x98] sm:$0xff] %vm1630_vm4, %v1536_v11  ;;  %v1424_v17 = vadd.f32 %v2924_v59, %v1304_v12  ;;  %v1482_v18 = vadd.f32 %v2924_v59, %v1362_v13 }
 0x12b   : > { %1708 = vst.msk [vmem:[#allocation2 + $0x268] sm:$0xff] %vm1630_vm4, %v1594_v0  ;;  %v906_v19 = vpop.f32.mrf.mxu0  ;;  %v1138_v20 = vpop.f32.mrf.mxu1 }
 0x12c   : > { %1984 = vst.msk [vmem:[%s3012_s6 + $0x8f] sm:$0x7f] %vm1767_vm5, %v1982_v14  ;;  %v1537_v21 = vmax.f32 %v1424_v17, 0.0  ;;  %v1595_v22 = vmax.f32 %v1482_v18, 0.0  ;;  %v1305_v23 = vmul.f32 %v2919_v57, %v906_v19  ;;  %v1363_v24 = vmul.f32 %v2919_v57, %v1138_v20 }
 0x12d   : > { %v2393_v25 = vpop.f32.mrf.mxu0  ;;  %v2509_v26 = vpop.f32.mrf.mxu1  ;;  %v1796_v3 = vld [vmem:[#allocation2 + $0x88] ss:$2 sm:$0x7f]  ;;  %v1800_v4 = vld [vmem:[#allocation2 + $0x89] ss:$2 sm:$0x7f] }
 0x12e   : > { %1651 = vst.msk [vmem:[#allocation2 + $0xa0] sm:$0xff] %vm1630_vm4, %v1537_v21  ;;  %1709 = vst.msk [vmem:[#allocation2 + $0x270] sm:$0xff] %vm1630_vm4, %v1595_v22  ;;  %v1425_v27 = vadd.f32 %v2924_v59, %v1305_v23  ;;  %v1483_v28 = vadd.f32 %v2924_v59, %v1363_v24  ;;  %v1986_v9 = vld [vmem:[#allocation2 + $0x258] ss:$2 sm:$0xff]  ;;  %v1990_v10 = vld [vmem:[#allocation2 + $0x259] ss:$2 sm:$0xff]  ;;  %v1802_v14 = vmax.f32 %v1796_v3, %v1800_v4 }
 0x12f   : > { %v911_v29 = vpop.f32.mrf.mxu0  ;;  %v1143_v30 = vpop.f32.mrf.mxu1  ;;  %v1993_v24 = vmax.f32 %v1986_v9, %v1990_v10 }
 0x130   : > { %v1538_v31 = vmax.f32 %v1425_v27, 0.0  ;;  %v1596_v32 = vmax.f32 %v1483_v28, 0.0  ;;  %v1306_v33 = vmul.f32 %v2919_v57, %v911_v29  ;;  %v1364_v34 = vmul.f32 %v2919_v57, %v1143_v30 }
 0x131   : > { %v2396_v35 = vpop.f32.mrf.mxu0  ;;  %v2512_v36 = vpop.f32.mrf.mxu1 }
 0x132   : > { %1652 = vst.msk [vmem:[#allocation2 + $0xa8] sm:$0xff] %vm1630_vm4, %v1538_v31  ;;  %1710 = vst.msk [vmem:[#allocation2 + $0x278] sm:$0xff] %vm1630_vm4, %v1596_v32  ;;  %v1426_v37 = vadd.f32 %v2924_v59, %v1306_v33  ;;  %v1484_v38 = vadd.f32 %v2924_v59, %v1364_v34 }
 0x133   : > { %v914_v41 = vpop.f32.mrf.mxu0  ;;  %v1146_v42 = vpop.f32.mrf.mxu1 }
 0x134   : > { %v1539_v43 = vmax.f32 %v1426_v37, 0.0  ;;  %v1597_v44 = vmax.f32 %v1484_v38, 0.0  ;;  %v1307_v45 = vmul.f32 %v2919_v57, %v914_v41  ;;  %v1365_v46 = vmul.f32 %v2919_v57, %v1146_v42 }
 0x135   : > { %v1804_v47 = vld [vmem:[#allocation2 + $0x96] ss:$2 sm:$0xff]  ;;  %v1808_v48 = vld [vmem:[#allocation2 + $0x97] ss:$2 sm:$0xff]  ;;  %v2397_v49 = vpop.f32.mrf.mxu0  ;;  %v2513_v50 = vpop.f32.mrf.mxu1 }
 0x136   : > { %v1811_v52 = vmax.f32 %v1804_v47, %v1808_v48  ;;  %1653 = vst.msk [vmem:[#allocation2 + $0xb0] sm:$0xff] %vm1630_vm4, %v1539_v43  ;;  %1711 = vst.msk [vmem:[#allocation2 + $0x280] sm:$0xff] %vm1630_vm4, %v1597_v44  ;;  %v1427_v53 = vadd.f32 %v2924_v59, %v1307_v45  ;;  %v1485_v54 = vadd.f32 %v2924_v59, %v1365_v46  ;;  %v1988_v37 = vld [vmem:[#allocation2 + $0x268] ss:$2 sm:$0x7f] }
 0x137   : > { %v919_v55 = vpop.f32.mrf.mxu0  ;;  %v1151_v56 = vpop.f32.mrf.mxu1  ;;  %v1992_v41 = vld [vmem:[#allocation2 + $0x269] ss:$2 sm:$0x7f] }
 0x138   : > { %v1813_v58 = vmax.f32 %v1801_v51, %v1811_v52  ;;  %v1540_v60 = vmax.f32 %v1427_v53, 0.0  ;;  %v1598_v61 = vmax.f32 %v1485_v54, 0.0  ;;  %v1308_v62 = vmul.f32 %v2919_v57, %v919_v55 }
 0x139   : > { %v1366_v63 = vmul.f32 %v2919_v57, %v1151_v56  ;;  %v2400_v1 = vpop.f32.mrf.mxu0  ;;  %v2516_v2 = vpop.f32.mrf.mxu1  ;;  %v1994_v50 = vmax.f32 %v1988_v37, %v1992_v41 }
 0x13a   : > { %1815 = vst.msk [vmem:[%s3012_s6 + $0x1e] sm:$0xff] %vm1630_vm4, %v1813_v58  ;;  %1654 = vst.msk [vmem:[#allocation2 + $0xb8] sm:$0xff] %vm1630_vm4, %v1540_v60  ;;  %v1428_v5 = vadd.f32 %v2924_v59, %v1308_v62 }
 0x13b   : > { %1712 = vst.msk [vmem:[#allocation2 + $0x288] sm:$0xff] %vm1630_vm4, %v1598_v61  ;;  %v1486_v6 = vadd.f32 %v2924_v59, %v1366_v63  ;;  %v922_v7 = vpop.f32.mrf.mxu0  ;;  %v1154_v8 = vpop.f32.mrf.mxu1 }
 0x13c   : > { %v1541_v11 = vmax.f32 %v1428_v5, 0.0  ;;  %v1309_v12 = vmul.f32 %v2919_v57, %v922_v7  ;;  %v1367_v13 = vmul.f32 %v2919_v57, %v1154_v8 }
 0x13d   : > { %v1806_v0 = vld [vmem:[#allocation2 + $0xa6] ss:$2 sm:$0x7f]  ;;  %v1810_v15 = vld [vmem:[#allocation2 + $0xa7] ss:$2 sm:$0x7f]  ;;  %v2401_v16 = vpop.f32.mrf.mxu0  ;;  %v2517_v17 = vpop.f32.mrf.mxu1 }
 0x13e   : > { %v1812_v18 = vmax.f32 %v1806_v0, %v1810_v15  ;;  %v1996_v19 = vld [vmem:[#allocation2 + $0x276] ss:$2 sm:$0xff]  ;;  %v2000_v20 = vld [vmem:[#allocation2 + $0x277] ss:$2 sm:$0xff]  ;;  %1655 = vst.msk [vmem:[#allocation2 + $0xc0] sm:$0xff] %vm1630_vm4, %v1541_v11  ;;  %v1599_v21 = vmax.f32 %v1486_v6, 0.0  ;;  %v1429_v22 = vadd.f32 %v2924_v59, %v1309_v12  ;;  %v1487_v23 = vadd.f32 %v2924_v59, %v1367_v13 }
 0x13f   : > { %v2003_v25 = vmax.f32 %v1996_v19, %v2000_v20  ;;  %v927_v26 = vpop.f32.mrf.mxu0  ;;  %v1159_v27 = vpop.f32.mrf.mxu1 }
 0x140   : > { %v1814_v28 = vmax.f32 %v1802_v14, %v1812_v18  ;;  %1713 = vst.msk [vmem:[#allocation2 + $0x290] sm:$0xff] %vm1630_vm4, %v1599_v21  ;;  %v1542_v29 = vmax.f32 %v1429_v22, 0.0  ;;  %v1600_v30 = vmax.f32 %v1487_v23, 0.0  ;;  %v1310_v31 = vmul.f32 %v2919_v57, %v927_v26 }
 0x141   : > { %v2005_v32 = vmax.f32 %v1993_v24, %v2003_v25  ;;  %v1368_v33 = vmul.f32 %v2919_v57, %v1159_v27  ;;  %v2404_v34 = vpop.f32.mrf.mxu0  ;;  %v2520_v35 = vpop.f32.mrf.mxu1 }
 0x142   : > { %1816 = vst.msk [vmem:[%s3012_s6 + $0x26] sm:$0x7f] %vm1767_vm5, %v1814_v28  ;;  %v1430_v36 = vadd.f32 %v2924_v59, %v1310_v31 }
 0x143   : > { %1656 = vst.msk [vmem:[#allocation2 + $0xc8] sm:$0xff] %vm1630_vm4, %v1542_v29  ;;  %1714 = vst.msk [vmem:[#allocation2 + $0x298] sm:$0xff] %vm1630_vm4, %v1600_v30  ;;  %v1488_v38 = vadd.f32 %v2924_v59, %v1368_v33  ;;  %v930_v39 = vpop.f32.mrf.mxu0  ;;  %v1162_v40 = vpop.f32.mrf.mxu1 }
 0x144   : > { %2007 = vst.msk [vmem:[%s3012_s6 + $0x96] sm:$0xff] %vm1630_vm4, %v2005_v32  ;;  %v1543_v42 = vmax.f32 %v1430_v36, 0.0  ;;  %v1311_v43 = vmul.f32 %v2919_v57, %v930_v39  ;;  %v1369_v44 = vmul.f32 %v2919_v57, %v1162_v40 }
 0x145   : > { %v1601_v45 = vmax.f32 %v1488_v38, 0.0  ;;  %v2405_v46 = vpop.f32.mrf.mxu0  ;;  %v2521_v47 = vpop.f32.mrf.mxu1  ;;  %v1818_v23 = vld [vmem:[#allocation2 + $0xb4] ss:$2 sm:$0xff]  ;;  %v1822_v24 = vld [vmem:[#allocation2 + $0xb5] ss:$2 sm:$0xff] }
 0x146   : > { %1657 = vst.msk [vmem:[#allocation2 + $0xd0] sm:$0xff] %vm1630_vm4, %v1543_v42  ;;  %v1431_v48 = vadd.f32 %v2924_v59, %v1311_v43  ;;  %v1489_v49 = vadd.f32 %v2924_v59, %v1369_v44  ;;  %v1825_v35 = vmax.f32 %v1818_v23, %v1822_v24  ;;  %v3179_v47 = vld [vmem:[%s3376_s2] ss:$0 sm:$0xff] }
 0x147   : > { %v1998_v51 = vld [vmem:[#allocation2 + $0x286] ss:$2 sm:$0x7f]  ;;  %v2002_v52 = vld [vmem:[#allocation2 + $0x287] ss:$2 sm:$0x7f]  ;;  %v935_v53 = vpop.f32.mrf.mxu0  ;;  %v1167_v54 = vpop.f32.mrf.mxu1 }
 0x148   : > { %1715 = vst.msk [vmem:[#allocation2 + $0x2a0] sm:$0xff] %vm1630_vm4, %v1601_v45  ;;  %v2004_v55 = vmax.f32 %v1998_v51, %v2002_v52  ;;  %v1544_v56 = vmax.f32 %v1431_v48, 0.0  ;;  %v1602_v58 = vmax.f32 %v1489_v49, 0.0  ;;  %v1312_v60 = vmul.f32 %v2919_v57, %v935_v53 }
 0x149   : > { %v1370_v61 = vmul.f32 %v2919_v57, %v1167_v54  ;;  %v2408_v62 = vpop.f32.mrf.mxu0  ;;  %v2524_v63 = vpop.f32.mrf.mxu1 }
 0x14a   : > { %v2006_v1 = vmax.f32 %v1994_v50, %v2004_v55  ;;  %1658 = vst.msk [vmem:[#allocation2 + $0xd8] sm:$0xff] %vm1630_vm4, %v1544_v56  ;;  %1716 = vst.msk [vmem:[#allocation2 + $0x2a8] sm:$0xff] %vm1630_vm4, %v1602_v58  ;;  %v1432_v2 = vadd.f32 %v2924_v59, %v1312_v60  ;;  %v3190_v55 = vld [vmem:[%s3377_s3] ss:$0 sm:$0xff] }
 0x14b   : > { %v1490_v3 = vadd.f32 %v2924_v59, %v1370_v61  ;;  %v938_v4 = vpop.f32.mrf.mxu0  ;;  %v1170_v5 = vpop.f32.mrf.mxu1 }
 0x14c   : > { %2008 = vst.msk [vmem:[%s3012_s6 + $0x9e] sm:$0x7f] %vm1767_vm5, %v2006_v1  ;;  %v1545_v6 = vmax.f32 %v1432_v2, 0.0  ;;  %v1313_v7 = vmul.f32 %v2919_v57, %v938_v4  ;;  %v1371_v8 = vmul.f32 %v2919_v57, %v1170_v5 }
 0x14d   : > { %v2409_v9 = vpop.f32.mrf.mxu0  ;;  %v2525_v10 = vpop.f32.mrf.mxu1  ;;  %v1603_v11 = vmax.f32 %v1490_v3, 0.0  ;;  %v1820_v39 = vld [vmem:[#allocation2 + $0xc4] ss:$2 sm:$0x7f] }
 0x14e   : > { %1659 = vst.msk [vmem:[#allocation2 + $0xe0] sm:$0xff] %vm1630_vm4, %v1545_v6  ;;  %v1433_v12 = vadd.f32 %v2924_v59, %v1313_v7  ;;  %v1491_v13 = vadd.f32 %v2924_v59, %v1371_v8  ;;  %v1824_v40 = vld [vmem:[#allocation2 + $0xc5] ss:$2 sm:$0x7f] }
 0x14f   : > { %v943_v14 = vpop.f32.mrf.mxu0  ;;  %v1175_v0 = vpop.f32.mrf.mxu1  ;;  %1717 = vst.msk [vmem:[#allocation2 + $0x2b0] sm:$0xff] %vm1630_vm4, %v1603_v11  ;;  %v1826_v51 = vmax.f32 %v1820_v39, %v1824_v40  ;;  %v2010_v53 = vld [vmem:[#allocation2 + $0x294] ss:$2 sm:$0xff]  ;;  %v2014_v54 = vld [vmem:[#allocation2 + $0x295] ss:$2 sm:$0xff] }
 0x150   : > { %v1546_v15 = vmax.f32 %v1433_v12, 0.0  ;;  %v1604_v16 = vmax.f32 %v1491_v13, 0.0  ;;  %v1314_v17 = vmul.f32 %v2919_v57, %v943_v14  ;;  %v1372_v18 = vmul.f32 %v2919_v57, %v1175_v0 }
 0x151   : > { %v2412_v19 = vpop.f32.mrf.mxu0  ;;  %v2528_v20 = vpop.f32.mrf.mxu1  ;;  %v2017_v8 = vmax.f32 %v2010_v53, %v2014_v54 }
 0x152   : > { %1660 = vst.msk [vmem:[#allocation2 + $0xe8] sm:$0xff] %vm1630_vm4, %v1546_v15  ;;  %1718 = vst.msk [vmem:[#allocation2 + $0x2b8] sm:$0xff] %vm1630_vm4, %v1604_v16  ;;  %v1434_v21 = vadd.f32 %v2924_v59, %v1314_v17  ;;  %v1492_v22 = vadd.f32 %v2924_v59, %v1372_v18 }
 0x153   : > { %v946_v25 = vpop.f32.mrf.mxu0  ;;  %v1178_v26 = vpop.f32.mrf.mxu1 }
 0x154   : > { %v1547_v27 = vmax.f32 %v1434_v21, 0.0  ;;  %v1605_v28 = vmax.f32 %v1492_v22, 0.0  ;;  %v1315_v29 = vmul.f32 %v2919_v57, %v946_v25  ;;  %v1373_v30 = vmul.f32 %v2919_v57, %v1178_v26 }
 0x155   : > { %v1828_v31 = vld [vmem:[#allocation2 + $0xd2] ss:$2 sm:$0xff]  ;;  %v1832_v32 = vld [vmem:[#allocation2 + $0xd3] ss:$2 sm:$0xff]  ;;  %v2413_v33 = vpop.f32.mrf.mxu0  ;;  %v2529_v34 = vpop.f32.mrf.mxu1 }
 0x156   : > { %v1835_v36 = vmax.f32 %v1828_v31, %v1832_v32  ;;  %1661 = vst.msk [vmem:[#allocation2 + $0xf0] sm:$0xff] %vm1630_vm4, %v1547_v27  ;;  %1719 = vst.msk [vmem:[#allocation2 + $0x2c0] sm:$0xff] %vm1630_vm4, %v1605_v28  ;;  %v1435_v37 = vadd.f32 %v2924_v59, %v1315_v29  ;;  %v1493_v38 = vadd.f32 %v2924_v59, %v1373_v30  ;;  %v2012_v12 = vld [vmem:[#allocation2 + $0x2a4] ss:$2 sm:$0x7f] }
 0x157   : > { %v951_v41 = vpop.f32.mrf.mxu0  ;;  %v1183_v42 = vpop.f32.mrf.mxu1  ;;  %v2016_v0 = vld [vmem:[#allocation2 + $0x2a5] ss:$2 sm:$0x7f] }
 0x158   : > { %v1837_v57 = vmax.f32 %v1825_v35, %v1835_v36  ;;  %v1548_v43 = vmax.f32 %v1435_v37, 0.0  ;;  %v1606_v44 = vmax.f32 %v1493_v38, 0.0  ;;  %v1316_v48 = vmul.f32 %v3179_v47, %v951_v41 }
 0x159   : > { %v1830_v45 = vld [vmem:[#allocation2 + $0xe2] ss:$2 sm:$0x7f]  ;;  %v1834_v46 = vld [vmem:[#allocation2 + $0xe3] ss:$2 sm:$0x7f]  ;;  %v1374_v49 = vmul.f32 %v3179_v47, %v1183_v42  ;;  %v2416_v59 = vpop.f32.mrf.mxu0  ;;  %v2532_v50 = vpop.f32.mrf.mxu1  ;;  %v2018_v25 = vmax.f32 %v2012_v12, %v2016_v0 }
 0x15a   : > { %1839 = vst.msk [vmem:[%s3012_s6 + $0x2d] sm:$0xff] %vm1630_vm4, %v1837_v57  ;;  %v1836_v52 = vmax.f32 %v1830_v45, %v1834_v46  ;;  %1662 = vst.msk [vmem:[#allocation2 + $0xf8] sm:$0xff] %vm1630_vm4, %v1548_v43  ;;  %v1436_v56 = vadd.f32 %v3190_v55, %v1316_v48 }
 0x15b   : > { %1720 = vst.msk [vmem:[#allocation2 + $0x2c8] sm:$0xff] %vm1630_vm4, %v1606_v44  ;;  %v1494_v58 = vadd.f32 %v3190_v55, %v1374_v49  ;;  %v954_v60 = vpop.f32.mrf.mxu0  ;;  %v1186_v61 = vpop.f32.mrf.mxu1 }
 0x15c   : > { %v1838_v62 = vmax.f32 %v1826_v51, %v1836_v52  ;;  %v1317_v63 = vmul.f32 %v3179_v47, %v954_v60  ;;  %v1375_v1 = vmul.f32 %v3179_v47, %v1186_v61  ;;  %v1549_v4 = vmax.f32 %v1436_v56, 0.0 }
 0x15d   : > { %v2020_v2 = vld [vmem:[#allocation2 + $0x2b2] ss:$2 sm:$0xff]  ;;  %v2024_v3 = vld [vmem:[#allocation2 + $0x2b3] ss:$2 sm:$0xff]  ;;  %v1607_v5 = vmax.f32 %v1494_v58, 0.0  ;;  %v2417_v6 = vpop.f32.mrf.mxu0  ;;  %v2533_v7 = vpop.f32.mrf.mxu1 }
 0x15e   : > { %1840 = vst.msk [vmem:[%s3012_s6 + $0x35] sm:$0x7f] %vm1767_vm5, %v1838_v62  ;;  %v2027_v9 = vmax.f32 %v2020_v2, %v2024_v3  ;;  %v1437_v10 = vadd.f32 %v3190_v55, %v1317_v63  ;;  %v1495_v11 = vadd.f32 %v3190_v55, %v1375_v1 }
 0x15f   : > { %1663 = vst.msk [vmem:[#allocation2 + $0x100] sm:$0xff] %vm1630_vm4, %v1549_v4  ;;  %1721 = vst.msk [vmem:[#allocation2 + $0x2d0] sm:$0xff] %vm1630_vm4, %v1607_v5  ;;  %v959_v13 = vpop.f32.mrf.mxu0  ;;  %v1191_v14 = vpop.f32.mrf.mxu1 }
 0x160   : > { %v2029_v15 = vmax.f32 %v2017_v8, %v2027_v9  ;;  %v1550_v16 = vmax.f32 %v1437_v10, 0.0  ;;  %v1608_v17 = vmax.f32 %v1495_v11, 0.0  ;;  %v1318_v18 = vmul.f32 %v3179_v47, %v959_v13 }
 0x161   : > { %v1376_v19 = vmul.f32 %v3179_v47, %v1191_v14  ;;  %v2420_v20 = vpop.f32.mrf.mxu0  ;;  %v2536_v21 = vpop.f32.mrf.mxu1  ;;  %v1842_v61 = vld [vmem:[#allocation2 + $0xf0] ss:$2 sm:$0xff]  ;;  %v1846_v62 = vld [vmem:[#allocation2 + $0xf1] ss:$2 sm:$0xff] }
 0x162   : > { %2031 = vst.msk [vmem:[%s3012_s6 + $0xa5] sm:$0xff] %vm1630_vm4, %v2029_v15  ;;  %v2022_v22 = vld [vmem:[#allocation2 + $0x2c2] ss:$2 sm:$0x7f]  ;;  %1664 = vst.msk [vmem:[#allocation2 + $0x108] sm:$0xff] %vm1630_vm4, %v1550_v16  ;;  %v1438_v24 = vadd.f32 %v3190_v55, %v1318_v18  ;;  %v1849_v10 = vmax.f32 %v1842_v61, %v1846_v62 }
 0x163   : > { %v2026_v23 = vld [vmem:[#allocation2 + $0x2c3] ss:$2 sm:$0x7f]  ;;  %1722 = vst.msk [vmem:[#allocation2 + $0x2d8] sm:$0xff] %vm1630_vm4, %v1608_v17  ;;  %v1496_v27 = vadd.f32 %v3190_v55, %v1376_v19  ;;  %v962_v28 = vpop.f32.mrf.mxu0  ;;  %v1194_v29 = vpop.f32.mrf.mxu1 }
 0x164   : > { %v2028_v26 = vmax.f32 %v2022_v22, %v2026_v23  ;;  %v1551_v30 = vmax.f32 %v1438_v24, 0.0  ;;  %v1319_v31 = vmul.f32 %v3179_v47, %v962_v28  ;;  %v1377_v32 = vmul.f32 %v3179_v47, %v1194_v29 }
 0x165   : > { %v1609_v34 = vmax.f32 %v1496_v27, 0.0  ;;  %v2421_v35 = vpop.f32.mrf.mxu0  ;;  %v2537_v36 = vpop.f32.mrf.mxu1 }
 0x166   : > { %v2030_v33 = vmax.f32 %v2018_v25, %v2028_v26  ;;  %1665 = vst.msk [vmem:[#allocation2 + $0x110] sm:$0xff] %vm1630_vm4, %v1551_v30  ;;  %v1439_v37 = vadd.f32 %v3190_v55, %v1319_v31  ;;  %v1497_v38 = vadd.f32 %v3190_v55, %v1377_v32 }
 0x167   : > { %1723 = vst.msk [vmem:[#allocation2 + $0x2e0] sm:$0xff] %vm1630_vm4, %v1609_v34  ;;  %v967_v39 = vpop.f32.mrf.mxu0  ;;  %v1199_v40 = vpop.f32.mrf.mxu1 }
 0x168   : > { %2032 = vst.msk [vmem:[%s3012_s6 + $0xad] sm:$0x7f] %vm1767_vm5, %v2030_v33  ;;  %v1552_v41 = vmax.f32 %v1439_v37, 0.0  ;;  %v1610_v42 = vmax.f32 %v1497_v38, 0.0  ;;  %v1320_v57 = vmul.f32 %v3179_v47, %v967_v39  ;;  %v1378_v43 = vmul.f32 %v3179_v47, %v1199_v40 }
 0x169   : > { %v2424_v44 = vpop.f32.mrf.mxu0  ;;  %v2540_v45 = vpop.f32.mrf.mxu1  ;;  %v1844_v22 = vld [vmem:[#allocation2 + $0x100] ss:$2 sm:$0x7f]  ;;  %v1848_v23 = vld [vmem:[#allocation2 + $0x101] ss:$2 sm:$0x7f] }
 0x16a   : > { %1666 = vst.msk [vmem:[#allocation2 + $0x118] sm:$0xff] %vm1630_vm4, %v1552_v41  ;;  %1724 = vst.msk [vmem:[#allocation2 + $0x2e8] sm:$0xff] %vm1630_vm4, %v1610_v42  ;;  %v1440_v46 = vadd.f32 %v3190_v55, %v1320_v57  ;;  %v1498_v48 = vadd.f32 %v3190_v55, %v1378_v43  ;;  %v2034_v28 = vld [vmem:[#allocation2 + $0x2d0] ss:$2 sm:$0xff]  ;;  %v2038_v29 = vld [vmem:[#allocation2 + $0x2d1] ss:$2 sm:$0xff]  ;;  %v1850_v33 = vmax.f32 %v1844_v22, %v1848_v23 }
 0x16b   : > { %v970_v49 = vpop.f32.mrf.mxu0  ;;  %v1202_v59 = vpop.f32.mrf.mxu1  ;;  %v2041_v43 = vmax.f32 %v2034_v28, %v2038_v29 }
 0x16c   : > { %v1553_v50 = vmax.f32 %v1440_v46, 0.0  ;;  %v1611_v51 = vmax.f32 %v1498_v48, 0.0  ;;  %v1321_v52 = vmul.f32 %v3179_v47, %v970_v49  ;;  %v1379_v53 = vmul.f32 %v3179_v47, %v1202_v59 }
 0x16d   : > { %v2425_v54 = vpop.f32.mrf.mxu0  ;;  %v2541_v56 = vpop.f32.mrf.mxu1 }
 0x16e   : > { %1667 = vst.msk [vmem:[#allocation2 + $0x120] sm:$0xff] %vm1630_vm4, %v1553_v50  ;;  %1725 = vst.msk [vmem:[#allocation2 + $0x2f0] sm:$0xff] %vm1630_vm4, %v1611_v51  ;;  %v1441_v58 = vadd.f32 %v3190_v55, %v1321_v52  ;;  %v1499_v60 = vadd.f32 %v3190_v55, %v1379_v53 }
 0x16f   : > { %v975_v63 = vpop.f32.mrf.mxu0  ;;  %v1207_v1 = vpop.f32.mrf.mxu1 }
 0x170   : > { %v1554_v2 = vmax.f32 %v1441_v58, 0.0  ;;  %v1612_v3 = vmax.f32 %v1499_v60, 0.0  ;;  %v1322_v4 = vmul.f32 %v3179_v47, %v975_v63  ;;  %v1380_v5 = vmul.f32 %v3179_v47, %v1207_v1 }
 0x171   : > { %v1852_v6 = vld [vmem:[#allocation2 + $0x10e] ss:$2 sm:$0xff]  ;;  %v1856_v7 = vld [vmem:[#allocation2 + $0x10f] ss:$2 sm:$0xff]  ;;  %v2428_v8 = vpop.f32.mrf.mxu0  ;;  %v2544_v9 = vpop.f32.mrf.mxu1 }
 0x172   : > { %v1859_v11 = vmax.f32 %v1852_v6, %v1856_v7  ;;  %1668 = vst.msk [vmem:[#allocation2 + $0x128] sm:$0xff] %vm1630_vm4, %v1554_v2  ;;  %1726 = vst.msk [vmem:[#allocation2 + $0x2f8] sm:$0xff] %vm1630_vm4, %v1612_v3  ;;  %v1442_v12 = vadd.f32 %v3190_v55, %v1322_v4  ;;  %v1500_v13 = vadd.f32 %v3190_v55, %v1380_v5  ;;  %v2036_v58 = vld [vmem:[#allocation2 + $0x2e0] ss:$2 sm:$0x7f] }
 0x173   : > { %v978_v14 = vpop.f32.mrf.mxu0  ;;  %v1210_v0 = vpop.f32.mrf.mxu1  ;;  %v2040_v63 = vld [vmem:[#allocation2 + $0x2e1] ss:$2 sm:$0x7f] }
 0x174   : > { %v1861_v15 = vmax.f32 %v1849_v10, %v1859_v11  ;;  %v1555_v16 = vmax.f32 %v1442_v12, 0.0  ;;  %v1613_v17 = vmax.f32 %v1500_v13, 0.0  ;;  %v1323_v18 = vmul.f32 %v3179_v47, %v978_v14 }
 0x175   : > { %v1381_v19 = vmul.f32 %v3179_v47, %v1210_v0  ;;  %v2429_v20 = vpop.f32.mrf.mxu0  ;;  %v2545_v21 = vpop.f32.mrf.mxu1  ;;  %v2042_v9 = vmax.f32 %v2036_v58, %v2040_v63 }
 0x176   : > { %1863 = vst.msk [vmem:[%s3012_s6 + $0x3c] sm:$0xff] %vm1630_vm4, %v1861_v15  ;;  %1669 = vst.msk [vmem:[#allocation2 + $0x130] sm:$0xff] %vm1630_vm4, %v1555_v16  ;;  %v1443_v24 = vadd.f32 %v3190_v55, %v1323_v18 }
 0x177   : > { %1727 = vst.msk [vmem:[#allocation2 + $0x300] sm:$0xff] %vm1630_vm4, %v1613_v17  ;;  %v1501_v25 = vadd.f32 %v3190_v55, %v1381_v19  ;;  %v983_v26 = vpop.f32.mrf.mxu0  ;;  %v1215_v27 = vpop.f32.mrf.mxu1 }
 0x178   : > { %v1556_v30 = vmax.f32 %v1443_v24, 0.0  ;;  %v1324_v31 = vmul.f32 %v3179_v47, %v983_v26  ;;  %v1382_v32 = vmul.f32 %v3179_v47, %v1215_v27 }
 0x179   : > { %v1854_v34 = vld [vmem:[#allocation2 + $0x11e] ss:$2 sm:$0x7f]  ;;  %v1858_v35 = vld [vmem:[#allocation2 + $0x11f] ss:$2 sm:$0x7f]  ;;  %v2432_v36 = vpop.f32.mrf.mxu0  ;;  %v2548_v37 = vpop.f32.mrf.mxu1 }
 0x17a   : > { %v1860_v38 = vmax.f32 %v1854_v34, %v1858_v35  ;;  %v2044_v39 = vld [vmem:[#allocation2 + $0x2ee] ss:$2 sm:$0xff]  ;;  %v2048_v40 = vld [vmem:[#allocation2 + $0x2ef] ss:$2 sm:$0xff]  ;;  %1670 = vst.msk [vmem:[#allocation2 + $0x138] sm:$0xff] %vm1630_vm4, %v1556_v30  ;;  %v1614_v41 = vmax.f32 %v1501_v25, 0.0  ;;  %v1444_v42 = vadd.f32 %v3190_v55, %v1324_v31  ;;  %v1502_v57 = vadd.f32 %v3190_v55, %v1382_v32 }
 0x17b   : > { %v2051_v44 = vmax.f32 %v2044_v39, %v2048_v40  ;;  %v986_v45 = vpop.f32.mrf.mxu0  ;;  %v1218_v46 = vpop.f32.mrf.mxu1 }
 0x17c   : > { %v1862_v48 = vmax.f32 %v1850_v33, %v1860_v38  ;;  %1728 = vst.msk [vmem:[#allocation2 + $0x308] sm:$0xff] %vm1630_vm4, %v1614_v41  ;;  %v1557_v49 = vmax.f32 %v1444_v42, 0.0  ;;  %v1615_v59 = vmax.f32 %v1502_v57, 0.0  ;;  %v1325_v50 = vmul.f32 %v3179_v47, %v986_v45 }
 0x17d   : > { %v2053_v51 = vmax.f32 %v2041_v43, %v2051_v44  ;;  %v1383_v52 = vmul.f32 %v3179_v47, %v1218_v46  ;;  %v2433_v53 = vpop.f32.mrf.mxu0  ;;  %v2549_v54 = vpop.f32.mrf.mxu1 }
 0x17e   : > { %1864 = vst.msk [vmem:[%s3012_s6 + $0x44] sm:$0x7f] %vm1767_vm5, %v1862_v48  ;;  %v1445_v56 = vadd.f32 %v3190_v55, %v1325_v50 }
 0x17f   : > { %1671 = vst.msk [vmem:[#allocation2 + $0x140] sm:$0xff] %vm1630_vm4, %v1557_v49  ;;  %1729 = vst.msk [vmem:[#allocation2 + $0x310] sm:$0xff] %vm1630_vm4, %v1615_v59  ;;  %v1503_v60 = vadd.f32 %v3190_v55, %v1383_v52  ;;  %v991_v61 = vpop.f32.mrf.mxu0  ;;  %v1223_v62 = vpop.f32.mrf.mxu1 }
 0x180   : > { %2055 = vst.msk [vmem:[%s3012_s6 + $0xb4] sm:$0xff] %vm1630_vm4, %v2053_v51  ;;  %v1558_v1 = vmax.f32 %v1445_v56, 0.0  ;;  %v1326_v2 = vmul.f32 %v3179_v47, %v991_v61  ;;  %v1384_v3 = vmul.f32 %v3179_v47, %v1223_v62 }
 0x181   : > { %v1616_v4 = vmax.f32 %v1503_v60, 0.0  ;;  %v2436_v5 = vpop.f32.mrf.mxu0  ;;  %v2552_v6 = vpop.f32.mrf.mxu1  ;;  %v1866_v57 = vld [vmem:[#allocation2 + $0x12c] ss:$2 sm:$0xff]  ;;  %v1870_v43 = vld [vmem:[#allocation2 + $0x12d] ss:$2 sm:$0xff] }
 0x182   : > { %1672 = vst.msk [vmem:[#allocation2 + $0x148] sm:$0xff] %vm1630_vm4, %v1558_v1  ;;  %v1446_v7 = vadd.f32 %v3190_v55, %v1326_v2  ;;  %v1504_v8 = vadd.f32 %v3190_v55, %v1384_v3  ;;  %v1873_v54 = vmax.f32 %v1866_v57, %v1870_v43 }
 0x183   : > { %v2046_v10 = vld [vmem:[#allocation2 + $0x2fe] ss:$2 sm:$0x7f]  ;;  %v2050_v11 = vld [vmem:[#allocation2 + $0x2ff] ss:$2 sm:$0x7f]  ;;  %v994_v12 = vpop.f32.mrf.mxu0  ;;  %v1226_v13 = vpop.f32.mrf.mxu1 }
 0x184   : > { %1730 = vst.msk [vmem:[#allocation2 + $0x318] sm:$0xff] %vm1630_vm4, %v1616_v4  ;;  %v2052_v14 = vmax.f32 %v2046_v10, %v2050_v11  ;;  %v1559_v0 = vmax.f32 %v1446_v7, 0.0  ;;  %v1617_v15 = vmax.f32 %v1504_v8, 0.0  ;;  %v1327_v16 = vmul.f32 %v3179_v47, %v994_v12 }
 0x185   : > { %v1385_v17 = vmul.f32 %v3179_v47, %v1226_v13  ;;  %v2437_v18 = vpop.f32.mrf.mxu0  ;;  %v2553_v19 = vpop.f32.mrf.mxu1 }
 0x186   : > { %v2054_v20 = vmax.f32 %v2042_v9, %v2052_v14  ;;  %1673 = vst.msk [vmem:[#allocation2 + $0x150] sm:$0xff] %vm1630_vm4, %v1559_v0  ;;  %1731 = vst.msk [vmem:[#allocation2 + $0x320] sm:$0xff] %vm1630_vm4, %v1617_v15  ;;  %v1447_v21 = vadd.f32 %v3190_v55, %v1327_v16 }
 0x187   : > { %v1505_v22 = vadd.f32 %v3190_v55, %v1385_v17  ;;  %v999_v23 = vpop.f32.mrf.mxu0  ;;  %v1231_v24 = vpop.f32.mrf.mxu1 }
 0x188   : > { %2056 = vst.msk [vmem:[%s3012_s6 + $0xbc] sm:$0x7f] %vm1767_vm5, %v2054_v20  ;;  %v1560_v25 = vmax.f32 %v1447_v21, 0.0  ;;  %v1328_v26 = vmul.f32 %v3179_v47, %v999_v23  ;;  %v1386_v27 = vmul.f32 %v3179_v47, %v1231_v24 }
 0x189   : > { %v2440_v28 = vpop.f32.mrf.mxu0  ;;  %v2556_v29 = vpop.f32.mrf.mxu1  ;;  %v1618_v30 = vmax.f32 %v1505_v22, 0.0  ;;  %v1868_v61 = vld [vmem:[#allocation2 + $0x13c] ss:$2 sm:$0x7f] }
 0x18a   : > { %1674 = vst.msk [vmem:[#allocation2 + $0x158] sm:$0xff] %vm1630_vm4, %v1560_v25  ;;  %v1448_v31 = vadd.f32 %v3190_v55, %v1328_v26  ;;  %v1506_v32 = vadd.f32 %v3190_v55, %v1386_v27  ;;  %v1872_v62 = vld [vmem:[#allocation2 + $0x13d] ss:$2 sm:$0x7f] }
 0x18b   : > { %v1002_v33 = vpop.f32.mrf.mxu0  ;;  %v1234_v34 = vpop.f32.mrf.mxu1  ;;  %1732 = vst.msk [vmem:[#allocation2 + $0x328] sm:$0xff] %vm1630_vm4, %v1618_v30  ;;  %v1874_v11 = vmax.f32 %v1868_v61, %v1872_v62  ;;  %v2058_v13 = vld [vmem:[#allocation2 + $0x30c] ss:$2 sm:$0xff]  ;;  %v2062_v14 = vld [vmem:[#allocation2 + $0x30d] ss:$2 sm:$0xff] }
 0x18c   : > { %v1561_v35 = vmax.f32 %v1448_v31, 0.0  ;;  %v1619_v36 = vmax.f32 %v1506_v32, 0.0  ;;  %v1329_v37 = vmul.f32 %v3179_v47, %v1002_v33  ;;  %v1387_v38 = vmul.f32 %v3179_v47, %v1234_v34 }
 0x18d   : > { %v2441_v39 = vpop.f32.mrf.mxu0  ;;  %v2557_v40 = vpop.f32.mrf.mxu1  ;;  %v2065_v27 = vmax.f32 %v2058_v13, %v2062_v14 }
 0x18e   : > { %1675 = vst.msk [vmem:[#allocation2 + $0x160] sm:$0xff] %vm1630_vm4, %v1561_v35  ;;  %1733 = vst.msk [vmem:[#allocation2 + $0x330] sm:$0xff] %vm1630_vm4, %v1619_v36  ;;  %v1449_v41 = vadd.f32 %v3190_v55, %v1329_v37  ;;  %v1507_v42 = vadd.f32 %v3190_v55, %v1387_v38 }
 0x18f   : > { %v1007_v44 = vpop.f32.mrf.mxu0  ;;  %v1239_v45 = vpop.f32.mrf.mxu1 }
 0x190   : > { %v1562_v46 = vmax.f32 %v1449_v41, 0.0  ;;  %v1620_v48 = vmax.f32 %v1507_v42, 0.0  ;;  %v1330_v49 = vmul.f32 %v3179_v47, %v1007_v44  ;;  %v1388_v59 = vmul.f32 %v3179_v47, %v1239_v45 }
 0x191   : > { %v1876_v50 = vld [vmem:[#allocation2 + $0x14a] ss:$2 sm:$0xff]  ;;  %v1880_v51 = vld [vmem:[#allocation2 + $0x14b] ss:$2 sm:$0xff]  ;;  %v2444_v52 = vpop.f32.mrf.mxu0  ;;  %v2560_v53 = vpop.f32.mrf.mxu1 }
 0x192   : > { %v1883_v56 = vmax.f32 %v1876_v50, %v1880_v51  ;;  %1676 = vst.msk [vmem:[#allocation2 + $0x168] sm:$0xff] %vm1630_vm4, %v1562_v46  ;;  %1734 = vst.msk [vmem:[#allocation2 + $0x338] sm:$0xff] %vm1630_vm4, %v1620_v48  ;;  %v1450_v58 = vadd.f32 %v3190_v55, %v1330_v49  ;;  %v1508_v60 = vadd.f32 %v3190_v55, %v1388_v59  ;;  %v2060_v31 = vld [vmem:[#allocation2 + $0x31c] ss:$2 sm:$0x7f] }
 0x193   : > { %v1010_v63 = vpop.f32.mrf.mxu0  ;;  %v1242_v1 = vpop.f32.mrf.mxu1  ;;  %v2064_v34 = vld [vmem:[#allocation2 + $0x31d] ss:$2 sm:$0x7f] }
 0x194   : > { %v1885_v2 = vmax.f32 %v1873_v54, %v1883_v56  ;;  %v1563_v3 = vmax.f32 %v1450_v58, 0.0  ;;  %v1621_v4 = vmax.f32 %v1508_v60, 0.0  ;;  %v1331_v7 = vmul.f32 %v3179_v47, %v1010_v63 }
 0x195   : > { %v1878_v5 = vld [vmem:[#allocation2 + $0x15a] ss:$2 sm:$0x7f]  ;;  %v1882_v6 = vld [vmem:[#allocation2 + $0x15b] ss:$2 sm:$0x7f]  ;;  %v1389_v8 = vmul.f32 %v3179_v47, %v1242_v1  ;;  %v2445_v9 = vpop.f32.mrf.mxu0  ;;  %v2561_v10 = vpop.f32.mrf.mxu1  ;;  %v2066_v44 = vmax.f32 %v2060_v31, %v2064_v34 }
 0x196   : > { %1887 = vst.msk [vmem:[%s3012_s6 + $0x4b] sm:$0xff] %vm1630_vm4, %v1885_v2  ;;  %v1884_v12 = vmax.f32 %v1878_v5, %v1882_v6  ;;  %1677 = vst.msk [vmem:[#allocation2 + $0x170] sm:$0xff] %vm1630_vm4, %v1563_v3  ;;  %v1451_v0 = vadd.f32 %v3190_v55, %v1331_v7 }
 0x197   : > { %1735 = vst.msk [vmem:[#allocation2 + $0x340] sm:$0xff] %vm1630_vm4, %v1621_v4  ;;  %v1509_v15 = vadd.f32 %v3190_v55, %v1389_v8  ;;  %v1015_v16 = vpop.f32.mrf.mxu0  ;;  %v1247_v17 = vpop.f32.mrf.mxu1 }
 0x198   : > { %v1886_v18 = vmax.f32 %v1874_v11, %v1884_v12  ;;  %v1332_v19 = vmul.f32 %v3179_v47, %v1015_v16  ;;  %v1390_v20 = vmul.f32 %v3179_v47, %v1247_v17  ;;  %v1564_v23 = vmax.f32 %v1451_v0, 0.0 }
 0x199   : > { %v2068_v21 = vld [vmem:[#allocation2 + $0x32a] ss:$2 sm:$0xff]  ;;  %v2072_v22 = vld [vmem:[#allocation2 + $0x32b] ss:$2 sm:$0xff]  ;;  %v1622_v24 = vmax.f32 %v1509_v15, 0.0  ;;  %v2448_v25 = vpop.f32.mrf.mxu0  ;;  %v2564_v26 = vpop.f32.mrf.mxu1 }
 0x19a   : > { %1888 = vst.msk [vmem:[%s3012_s6 + $0x53] sm:$0x7f] %vm1767_vm5, %v1886_v18  ;;  %v2075_v28 = vmax.f32 %v2068_v21, %v2072_v22  ;;  %v1452_v29 = vadd.f32 %v3190_v55, %v1332_v19  ;;  %v1510_v30 = vadd.f32 %v3190_v55, %v1390_v20 }
 0x19b   : > { %1678 = vst.msk [vmem:[#allocation2 + $0x178] sm:$0xff] %vm1630_vm4, %v1564_v23  ;;  %1736 = vst.msk [vmem:[#allocation2 + $0x348] sm:$0xff] %vm1630_vm4, %v1622_v24  ;;  %v1018_v32 = vpop.f32.mrf.mxu0  ;;  %v1250_v33 = vpop.f32.mrf.mxu1 }
 0x19c   : > { %v2077_v35 = vmax.f32 %v2065_v27, %v2075_v28  ;;  %v1565_v36 = vmax.f32 %v1452_v29, 0.0  ;;  %v1623_v37 = vmax.f32 %v1510_v30, 0.0  ;;  %v1333_v38 = vmul.f32 %v3179_v47, %v1018_v32 }
 0x19d   : > { %v1391_v39 = vmul.f32 %v3179_v47, %v1250_v33  ;;  %v2449_v40 = vpop.f32.mrf.mxu0  ;;  %v2565_v41 = vpop.f32.mrf.mxu1  ;;  %v1890_v17 = vld [vmem:[#allocation2 + $0x168] ss:$2 sm:$0xff]  ;;  %v1894_v18 = vld [vmem:[#allocation2 + $0x169] ss:$2 sm:$0xff] }
 0x19e   : > { %2079 = vst.msk [vmem:[%s3012_s6 + $0xc3] sm:$0xff] %vm1630_vm4, %v2077_v35  ;;  %v2070_v42 = vld [vmem:[#allocation2 + $0x33a] ss:$2 sm:$0x7f]  ;;  %1679 = vst.msk [vmem:[#allocation2 + $0x180] sm:$0xff] %vm1630_vm4, %v1565_v36  ;;  %v1453_v43 = vadd.f32 %v3190_v55, %v1333_v38  ;;  %v1897_v29 = vmax.f32 %v1890_v17, %v1894_v18 }
 0x19f   : > { %v2074_v57 = vld [vmem:[#allocation2 + $0x33b] ss:$2 sm:$0x7f]  ;;  %1737 = vst.msk [vmem:[#allocation2 + $0x350] sm:$0xff] %vm1630_vm4, %v1623_v37  ;;  %v1511_v46 = vadd.f32 %v3190_v55, %v1391_v39  ;;  %v1023_v48 = vpop.f32.mrf.mxu0  ;;  %v1255_v49 = vpop.f32.mrf.mxu1 }
 0x1a0   : > { %v2076_v45 = vmax.f32 %v2070_v42, %v2074_v57  ;;  %v1566_v59 = vmax.f32 %v1453_v43, 0.0  ;;  %v1334_v50 = vmul.f32 %v3179_v47, %v1023_v48  ;;  %v1392_v51 = vmul.f32 %v3179_v47, %v1255_v49 }
 0x1a1   : > { %v1624_v53 = vmax.f32 %v1511_v46, 0.0  ;;  %v2452_v54 = vpop.f32.mrf.mxu0  ;;  %v2568_v56 = vpop.f32.mrf.mxu1 }
 0x1a2   : > { %v2078_v52 = vmax.f32 %v2066_v44, %v2076_v45  ;;  %1680 = vst.msk [vmem:[#allocation2 + $0x188] sm:$0xff] %vm1630_vm4, %v1566_v59  ;;  %v1454_v58 = vadd.f32 %v3190_v55, %v1334_v50  ;;  %v1512_v60 = vadd.f32 %v3190_v55, %v1392_v51 }
 0x1a3   : > { %1738 = vst.msk [vmem:[#allocation2 + $0x358] sm:$0xff] %vm1630_vm4, %v1624_v53  ;;  %v1026_v61 = vpop.f32.mrf.mxu0  ;;  %v1258_v62 = vpop.f32.mrf.mxu1 }
 0x1a4   : > { %2080 = vst.msk [vmem:[%s3012_s6 + $0xcb] sm:$0x7f] %vm1767_vm5, %v2078_v52  ;;  %v1567_v63 = vmax.f32 %v1454_v58, 0.0  ;;  %v1625_v1 = vmax.f32 %v1512_v60, 0.0  ;;  %v1335_v2 = vmul.f32 %v3179_v47, %v1026_v61  ;;  %v1393_v3 = vmul.f32 %v3179_v47, %v1258_v62 }
 0x1a5   : > { %v2453_v4 = vpop.f32.mrf.mxu0  ;;  %v2569_v5 = vpop.f32.mrf.mxu1  ;;  %v1892_v57 = vld [vmem:[#allocation2 + $0x178] ss:$2 sm:$0x7f]  ;;  %v1896_v43 = vld [vmem:[#allocation2 + $0x179] ss:$2 sm:$0x7f] }
 0x1a6   : > { %1681 = vst.msk [vmem:[#allocation2 + $0x190] sm:$0xff] %vm1630_vm4, %v1567_v63  ;;  %1739 = vst.msk [vmem:[#allocation2 + $0x360] sm:$0xff] %vm1630_vm4, %v1625_v1  ;;  %v1455_v6 = vadd.f32 %v3190_v55, %v1335_v2  ;;  %v1513_v7 = vadd.f32 %v3190_v55, %v1393_v3  ;;  %v2082_v48 = vld [vmem:[#allocation2 + $0x348] ss:$2 sm:$0xff]  ;;  %v2086_v49 = vld [vmem:[#allocation2 + $0x349] ss:$2 sm:$0xff]  ;;  %v1898_v56 = vmax.f32 %v1892_v57, %v1896_v43 }
 0x1a7   : > { %v1031_v8 = vpop.f32.mrf.mxu0  ;;  %v1263_v9 = vpop.f32.mrf.mxu1  ;;  %v2089_v1 = vmax.f32 %v2082_v48, %v2086_v49 }
 0x1a8   : > { %v1568_v10 = vmax.f32 %v1455_v6, 0.0  ;;  %v1626_v11 = vmax.f32 %v1513_v7, 0.0  ;;  %v1336_v12 = vmul.f32 %v3179_v47, %v1031_v8  ;;  %v1394_v13 = vmul.f32 %v3179_v47, %v1263_v9 }
 0x1a9   : > { %v2456_v14 = vpop.f32.mrf.mxu0  ;;  %v2572_v0 = vpop.f32.mrf.mxu1 }
 0x1aa   : > { %1682 = vst.msk [vmem:[#allocation2 + $0x198] sm:$0xff] %vm1630_vm4, %v1568_v10  ;;  %1740 = vst.msk [vmem:[#allocation2 + $0x368] sm:$0xff] %vm1630_vm4, %v1626_v11  ;;  %v1456_v15 = vadd.f32 %v3190_v55, %v1336_v12  ;;  %v1514_v16 = vadd.f32 %v3190_v55, %v1394_v13 }
 0x1ab   : > { %v1034_v19 = vpop.f32.mrf.mxu0  ;;  %v1266_v20 = vpop.f32.mrf.mxu1 }
 0x1ac   : > { %v1569_v21 = vmax.f32 %v1456_v15, 0.0  ;;  %v1627_v22 = vmax.f32 %v1514_v16, 0.0  ;;  %v1337_v23 = vmul.f32 %v3179_v47, %v1034_v19  ;;  %v1395_v24 = vmul.f32 %v3179_v47, %v1266_v20 }
 0x1ad   : > { %v1900_v25 = vld [vmem:[#allocation2 + $0x186] ss:$2 sm:$0xff]  ;;  %v1904_v26 = vld [vmem:[#allocation2 + $0x187] ss:$2 sm:$0xff]  ;;  %v2457_v27 = vpop.f32.mrf.mxu0  ;;  %v2573_v28 = vpop.f32.mrf.mxu1 }
 0x1ae   : > { %v1907_v30 = vmax.f32 %v1900_v25, %v1904_v26  ;;  %1683 = vst.msk [vmem:[#allocation2 + $0x1a0] sm:$0xff] %vm1630_vm4, %v1569_v21  ;;  %1741 = vst.msk [vmem:[#allocation2 + $0x370] sm:$0xff] %vm1630_vm4, %v1627_v22  ;;  %v1457_v31 = vadd.f32 %v3190_v55, %v1337_v23  ;;  %v1515_v32 = vadd.f32 %v3190_v55, %v1395_v24  ;;  %v2084_v13 = vld [vmem:[#allocation2 + $0x358] ss:$2 sm:$0x7f] }
 0x1af   : > { %v1039_v33 = vpop.f32.mrf.mxu0  ;;  %v1271_v34 = vpop.f32.mrf.mxu1  ;;  %v2088_v14 = vld [vmem:[#allocation2 + $0x359] ss:$2 sm:$0x7f]  ;;  %v1926_v22 = vld [vmem:[#allocation2 + $0x1d2] ss:$2 sm:$0x7f] }
 0x1b0   : > { %v1909_v35 = vmax.f32 %v1897_v29, %v1907_v30  ;;  %v1570_v36 = vmax.f32 %v1457_v31, 0.0  ;;  %v1628_v37 = vmax.f32 %v1515_v32, 0.0  ;;  %v1338_v38 = vmul.f32 %v3179_v47, %v1039_v33  ;;  %v1930_v23 = vld [vmem:[#allocation2 + $0x1d3] ss:$2 sm:$0x7f] }
 0x1b1   : > { %v1396_v39 = vmul.f32 %v3179_v47, %v1271_v34  ;;  %v2460_v40 = vpop.f32.mrf.mxu0  ;;  %v2576_v41 = vpop.f32.mrf.mxu1  ;;  %v2090_v18 = vmax.f32 %v2084_v13, %v2088_v14  ;;  %v1932_v25 = vmax.f32 %v1926_v22, %v1930_v23 }
 0x1b2   : > { %1911 = vst.msk [vmem:[%s3012_s6 + $0x5a] sm:$0xff] %vm1630_vm4, %v1909_v35  ;;  %1684 = vst.msk [vmem:[#allocation2 + $0x1a8] sm:$0xff] %vm1630_vm4, %v1570_v36  ;;  %v1458_v42 = vadd.f32 %v3190_v55, %v1338_v38 }
 0x1b3   : > { %1742 = vst.msk [vmem:[#allocation2 + $0x378] sm:$0xff] %vm1630_vm4, %v1628_v37  ;;  %v1516_v44 = vadd.f32 %v3190_v55, %v1396_v39  ;;  %v1042_v45 = vpop.f32.mrf.mxu0  ;;  %v1274_v46 = vpop.f32.mrf.mxu1 }
 0x1b4   : > { %v1571_v59 = vmax.f32 %v1458_v42, 0.0  ;;  %v1339_v50 = vmul.f32 %v3179_v47, %v1042_v45 }
 0x1b5   : > { %v1902_v51 = vld [vmem:[#allocation2 + $0x196] ss:$2 sm:$0x7f]  ;;  %v1906_v52 = vld [vmem:[#allocation2 + $0x197] ss:$2 sm:$0x7f]  ;;  %v2461_v53 = vpop.f32.mrf.mxu0  ;;  %v2577_v54 = vpop.f32.mrf.mxu1 }
 0x1b6   : > { %v1908_v58 = vmax.f32 %v1902_v51, %v1906_v52  ;;  %v2092_v60 = vld [vmem:[#allocation2 + $0x366] ss:$2 sm:$0xff]  ;;  %v2096_v61 = vld [vmem:[#allocation2 + $0x367] ss:$2 sm:$0xff]  ;;  %1685 = vst.msk [vmem:[#allocation2 + $0x1b0] sm:$0xff] %vm1630_vm4, %v1571_v59  ;;  %v1629_v62 = vmax.f32 %v1516_v44, 0.0  ;;  %v1459_v63 = vadd.f32 %v3190_v55, %v1339_v50 }
 0x1b7   : > { %v2099_v2 = vmax.f32 %v2092_v60, %v2096_v61  ;;  %v1047_v3 = vpop.f32.mrf.mxu0 }
 0x1b8   : > { %v1910_v4 = vmax.f32 %v1898_v56, %v1908_v58  ;;  %1744 = vst.msk [vmem:[#allocation2 + $0x380] sm:$0xf] %vm1743_vm6, %v1629_v62  ;;  %v1572_v5 = vmax.f32 %v1459_v63, 0.0  ;;  %v1340_v6 = vmul.f32 %v3179_v47, %v1047_v3 }
 0x1b9   : > { %v2101_v7 = vmax.f32 %v2089_v1, %v2099_v2  ;;  %v2464_v8 = vpop.f32.mrf.mxu0 }
 0x1ba   : > { %1912 = vst.msk [vmem:[%s3012_s6 + $0x62] sm:$0x7f] %vm1767_vm5, %v1910_v4  ;;  %v1460_v9 = vadd.f32 %v3190_v55, %v1340_v6 }
 0x1bb   : > { %1686 = vst.msk [vmem:[#allocation2 + $0x1b8] sm:$0xff] %vm1630_vm4, %v1572_v5  ;;  %2103 = vst.msk [vmem:[%s3012_s6 + $0xd2] sm:$0xff] %vm1630_vm4, %v2101_v7  ;;  %v1050_v10 = vpop.f32.mrf.mxu0 }
 0x1bc   : > { %v1573_v11 = vmax.f32 %v1460_v9, 0.0  ;;  %v1341_v12 = vmul.f32 %v3179_v47, %v1050_v10 }
 0x1bd   : > { %v2465_v0 = vpop.f32.mrf.mxu0  ;;  %v1914_v27 = vld [vmem:[#allocation2 + $0x1a4] ss:$2 sm:$0xff] }
 0x1be   : > { %1687 = vst.msk [vmem:[#allocation2 + $0x1c0] sm:$0xff] %vm1630_vm4, %v1573_v11  ;;  %v1461_v15 = vadd.f32 %v3190_v55, %v1341_v12  ;;  %v1918_v55 = vld [vmem:[#allocation2 + $0x1a5] ss:$2 sm:$0xff] }
 0x1bf   : > { %v2094_v16 = vld [vmem:[#allocation2 + $0x376] ss:$2 sm:$0x7f]  ;;  %v2098_v17 = vld [vmem:[#allocation2 + $0x377] ss:$2 sm:$0x7f]  ;;  %v1921_v31 = vmax.f32 %v1914_v27, %v1918_v55 }
 0x1c0   : > { %v2100_v19 = vmax.f32 %v2094_v16, %v2098_v17  ;;  %v1574_v20 = vmax.f32 %v1461_v15, 0.0 }
 0x1c2   : > { %v2102_v21 = vmax.f32 %v2090_v18, %v2100_v19  ;;  %1688 = vst.msk [vmem:[#allocation2 + $0x1c8] sm:$0xff] %vm1630_vm4, %v1574_v20 }
 0x1c4   : > { %2104 = vst.msk [vmem:[%s3012_s6 + $0xda] sm:$0x7f] %vm1767_vm5, %v2102_v21 }
 0x1c5   : > { %v1916_v47 = vld [vmem:[#allocation2 + $0x1b4] ss:$2 sm:$0x7f]  ;;  %v1920_v24 = vld [vmem:[#allocation2 + $0x1b5] ss:$2 sm:$0x7f] }
 0x1c6   : > { %v1922_v26 = vmax.f32 %v1916_v47, %v1920_v24 }
 0x1c8   : > { %v1934_v28 = vmax.f32 %v1922_v26, %v1932_v25 }
 0x1c9   : > { %v1924_v29 = vld [vmem:[#allocation2 + $0x1c2] ss:$2 sm:$0xff]  ;;  %v1928_v30 = vld [vmem:[#allocation2 + $0x1c3] ss:$2 sm:$0xff] }
 0x1ca   : > { %1936 = vst.msk [vmem:[%s3012_s6 + $0x71] sm:$0x7f] %vm1767_vm5, %v1934_v28  ;;  %v1931_v32 = vmax.f32 %v1924_v29, %v1928_v30 }
 0x1cc   : > { %v1933_v33 = vmax.f32 %v1921_v31, %v1931_v32 }
 0x1ce   : > { %1935 = vst.msk [vmem:[%s3012_s6 + $0x69] sm:$0xff] %vm1630_vm4, %v1933_v33 }
 0x1cf PF: > { %s14_s15 = sadd.s32 1, %s2662_s15  }
 0x1d0   : > { %p11_p4 = scmp.ge.s32.totalorder %s14_s15, 4  }
 0x1d2   :  { %13 = sbr.rel (!%p11_p4) target bundleno = 1 (0x1), region = 185 }

// kernel: cnn_encoder_forward.5
= control target key start
LH: loop header
LB: loop body
LE: loop exit
PB: predicated region body
PF: predicated region fallthrough
CT: control target
= control target key end

     0   :  { %v2448_v0 = vmov 0   ;;  %vm977_vm0 = vcmask 523264   ;;  %vm1865_vm1 = vcmask 521216   ;;  %s3276_s1 = inlined_call_operand.vmem [shape: bf16[576,64], index: 1, kind: input, shape index: {}]   ;;  %s3277_s0 = inlined_call_operand.vmem [shape: bf16[1,338,576], index: 0, kind: input, shape index: {}]   ;;  %s3278_s2 = inlined_call_operand.vmem [shape: f32[1,64], index: 2, kind: input, shape index: {}]   ;;  %s3279_s3 = inlined_call_operand.vmem [shape: f32[1,64], index: 3, kind: input, shape index: {}]   ;;  %s3280_s4 = inlined_call_operand.vmem [shape: f32[1,72,64], index: 4, kind: output, shape index: {}]  }
   0x1   :  { %1044 = vmatprep.subr.bf16.mxu0 %v2448_v0  ;;  %1252 = vmatprep.subr.bf16.mxu1 %v2448_v0  ;;  %v2260_v1 = vld [vmem:[%s3276_s1 + $0x38] sm:$0xff]   ;;  %v2262_v3 = vld [vmem:[%s3276_s1 + $0x30] sm:$0xff]   ;;  %v2264_v5 = vld [vmem:[%s3276_s1 + $0x28] sm:$0xff]  }
   0x2   :  { %v2261_v2 = vld [vmem:[%s3276_s1 + $0xb8] sm:$0xff]   ;;  %1045 = vmatpush1.bf16.msra.mxu0 %v2260_v1  ;;  %v2263_v4 = vld [vmem:[%s3276_s1 + $0xb0] sm:$0xff]   ;;  %v2265_v6 = vld [vmem:[%s3276_s1 + $0xa8] sm:$0xff]  }
   0x3   :  { %1253 = vmatpush1.bf16.msra.mxu1 %v2261_v2  ;;  %1046 = vmatprep.subr.bf16.mxu0 %v2448_v0  ;;  %v2266_v7 = vld [vmem:[%s3276_s1 + $0x20] sm:$0xff]   ;;  %v2268_v9 = vld [vmem:[%s3276_s1 + $0x18] sm:$0xff]   ;;  %v2270_v11 = vld [vmem:[%s3276_s1 + $0x10] sm:$0xff]  }
   0x4   :  { %1254 = vmatprep.subr.bf16.mxu1 %v2448_v0  ;;  %v2267_v8 = vld [vmem:[%s3276_s1 + $0xa0] sm:$0xff]   ;;  %v2269_v10 = vld [vmem:[%s3276_s1 + $0x98] sm:$0xff]   ;;  %v2271_v12 = vld [vmem:[%s3276_s1 + $0x90] sm:$0xff]  }
   0x5   :  { %v2272_v13 = vld [vmem:[%s3276_s1 + $0x8] sm:$0xff]   ;;  %v2274_v15 = vld [vmem:[%s3276_s1] sm:$0xff]   ;;  %v2276_v17 = vld [vmem:[%s3276_s1 + $0x78] sm:$0xff]  }
   0x6   :  { %1047 = vmatpush1.bf16.msra.mxu0 %v2262_v3  ;;  %v2273_v14 = vld [vmem:[%s3276_s1 + $0x88] sm:$0xff]   ;;  %v2275_v16 = vld [vmem:[%s3276_s1 + $0x80] sm:$0xff]   ;;  %v2277_v18 = vld [vmem:[%s3276_s1 + $0xf8] sm:$0xff]  }
   0x7   :  { %1255 = vmatpush1.bf16.msra.mxu1 %v2263_v4  ;;  %1048 = vmatprep.subr.bf16.mxu0 %v2448_v0  ;;  %v2294_v19 = vld [vmem:[%s3277_s0 + $0x4] ss:$20 sps:$4 sm:$0xff]   ;;  %v2278_v20 = vld [vmem:[%s3276_s1 + $0x70] sm:$0xff]   ;;  %v2297_v21 = vld [vmem:[%s3277_s0 + $0xc] ss:$20 sps:$4 sm:$0xff]  }
   0x8   :  { %1256 = vmatprep.subr.bf16.mxu1 %v2448_v0  ;;  %v2279_v22 = vld [vmem:[%s3276_s1 + $0xf0] sm:$0xff]   ;;  %1076 = vmatprep.mubr.bf16.mxu0 %v2294_v19  ;;  %v2280_v23 = vld [vmem:[%s3276_s1 + $0x68] sm:$0xff]   ;;  %v2282_v25 = vld [vmem:[%s3276_s1 + $0x60] sm:$0xff]  }
   0x9   :  { %1284 = vmatprep.mubr.bf16.mxu1 %v2297_v21  ;;  %v2281_v24 = vld [vmem:[%s3276_s1 + $0xe8] sm:$0xff]   ;;  %v2283_v26 = vld [vmem:[%s3276_s1 + $0xe0] sm:$0xff]   ;;  %v2284_v27 = vld [vmem:[%s3276_s1 + $0x58] sm:$0xff]  }
   0xa   :  { %1049 = vmatpush1.bf16.msra.mxu0 %v2264_v5  ;;  %v2285_v28 = vld [vmem:[%s3276_s1 + $0xd8] sm:$0xff]   ;;  %v2286_v29 = vld [vmem:[%s3276_s1 + $0x50] sm:$0xff]   ;;  %v2288_v31 = vld [vmem:[%s3276_s1 + $0x48] sm:$0xff]  }
   0xb   :  { %1257 = vmatpush1.bf16.msra.mxu1 %v2265_v6  ;;  %1050 = vmatprep.subr.bf16.mxu0 %v2448_v0  ;;  %v2287_v30 = vld [vmem:[%s3276_s1 + $0xd0] sm:$0xff]   ;;  %v2289_v32 = vld [vmem:[%s3276_s1 + $0xc8] sm:$0xff]   ;;  %v2290_v33 = vld [vmem:[%s3276_s1 + $0x40] sm:$0xff]  }
   0xc   :  { %1258 = vmatprep.subr.bf16.mxu1 %v2448_v0  ;;  %v2291_v34 = vld [vmem:[%s3276_s1 + $0xc0] sm:$0xff]   ;;  %v2298_v35 = vld [vmem:[%s3276_s1 + $0x118] sm:$0xff]   ;;  %v2301_v39 = vld [vmem:[%s3277_s0 + $0x34] ss:$20 sps:$4 sm:$0xff]  }
   0xd   :  { %v2292_v36 = vld [vmem:[%s3277_s0] ss:$20 sps:$4 sm:$0xff]   ;;  %v2295_v37 = vld [vmem:[%s3277_s0 + $0x8] ss:$20 sps:$4 sm:$0xff]   ;;  %v2304_v43 = vld [vmem:[%s3277_s0 + $0x30] ss:$20 sps:$4 sm:$0xff]  }
   0xe   :  { %1051 = vmatpush1.bf16.msra.mxu0 %v2266_v7  ;;  %v2299_v38 = vld [vmem:[%s3277_s0 + $0x2c] ss:$20 sps:$4 sm:$0xff]   ;;  %v2329_v40 = vld [vmem:[%s3276_s1 + $0x110] sm:$0xff]   ;;  %v2303_v42 = vld [vmem:[%s3277_s0 + $0x28] ss:$20 sps:$4 sm:$0xff]  }
   0xf   :  { %1259 = vmatpush1.bf16.msra.mxu1 %v2267_v8  ;;  %1052 = vmatprep.subr.bf16.mxu0 %v2448_v0  ;;  %v2366_v41 = vld [vmem:[%s3276_s1 + $0x108] sm:$0xff]   ;;  %v2307_v45 = vld [vmem:[%s3277_s0 + $0x5c] ss:$20 sps:$4 sm:$0xff]   ;;  %v2313_v49 = vld [vmem:[%s3277_s0 + $0x84] ss:$20 sps:$4 sm:$0xff]  }
  0x10   :  { %1260 = vmatprep.subr.bf16.mxu1 %v2448_v0  ;;  %v2305_v44 = vld [vmem:[%s3277_s0 + $0x54] ss:$20 sps:$4 sm:$0xff]   ;;  %v2309_v46 = vld [vmem:[%s3277_s0 + $0x50] ss:$20 sps:$4 sm:$0xff]   ;;  %v2310_v47 = vld [vmem:[%s3277_s0 + $0x58] ss:$20 sps:$4 sm:$0xff]  }
  0x11   :  { %v2311_v48 = vld [vmem:[%s3277_s0 + $0x7c] ss:$20 sps:$4 sm:$0xff]   ;;  %v2397_v50 = vld [vmem:[%s3276_s1 + $0x100] sm:$0xff]   ;;  %v2315_v51 = vld [vmem:[%s3277_s0 + $0x78] ss:$20 sps:$4 sm:$0xff]  }
  0x12   :  { %1053 = vmatpush1.bf16.msra.mxu0 %v2268_v9  ;;  %v2316_v52 = vld [vmem:[%s3277_s0 + $0x80] ss:$20 sps:$4 sm:$0xff]   ;;  %v2317_v53 = vld [vmem:[%s3277_s0 + $0xa4] ss:$20 sps:$4 sm:$0xff]   ;;  %v2322_v56 = vld [vmem:[%s3277_s0 + $0xa8] ss:$20 sps:$4 sm:$0xff]  }
  0x13   :  { %1261 = vmatpush1.bf16.msra.mxu1 %v2269_v10  ;;  %1054 = vmatprep.subr.bf16.mxu0 %v2448_v0  ;;  %v2319_v54 = vld [vmem:[%s3277_s0 + $0xac] ss:$20 sps:$4 sm:$0xff]   ;;  %v2325_v58 = vld [vmem:[%s3277_s0 + $0xd4] ss:$20 sps:$4 sm:$0xff]   ;;  %v2328_v60 = vld [vmem:[%s3277_s0 + $0xd0] ss:$20 sps:$4 sm:$0xff]  }
  0x14   :  { %1262 = vmatprep.subr.bf16.mxu1 %v2448_v0  ;;  %v2321_v55 = vld [vmem:[%s3277_s0 + $0xa0] ss:$20 sps:$4 sm:$0xff]   ;;  %v2327_v59 = vld [vmem:[%s3277_s0 + $0xc8] ss:$20 sps:$4 sm:$0xff]   ;;  %v2334_v63 = vld [vmem:[%s3277_s0 + $0xf0] ss:$20 sps:$4 sm:$0xff]  }
  0x15   :  { %v2323_v57 = vld [vmem:[%s3277_s0 + $0xcc] ss:$20 sps:$4 sm:$0xff]   ;;  %v2330_v61 = vld [vmem:[%s3277_s0 + $0xf4] ss:$20 sps:$4 sm:$0xff]   ;;  %v2332_v62 = vld [vmem:[%s3277_s0 + $0xfc] ss:$20 sps:$4 sm:$0xff]  }
  0x16   :  { %1055 = vmatpush1.bf16.msra.mxu0 %v2270_v11  ;;  %v2336_v1 = vld [vmem:[%s3277_s0 + $0x11c] ss:$20 sps:$4 sm:$0xff]   ;;  %v2338_v2 = vld [vmem:[%s3277_s0 + $0x124] ss:$20 sps:$4 sm:$0xff]   ;;  %v2341_v4 = vld [vmem:[%s3277_s0 + $0x120] ss:$20 sps:$4 sm:$0xff]  }
  0x17   :  { %1263 = vmatpush1.bf16.msra.mxu1 %v2271_v12  ;;  %1056 = vmatprep.subr.bf16.mxu0 %v2448_v0  ;;  %v2340_v3 = vld [vmem:[%s3277_s0 + $0x118] ss:$20 sps:$4 sm:$0xff]   ;;  %v2346_v7 = vld [vmem:[%s3277_s0 + $0x140] ss:$20 sps:$4 sm:$0xff]   ;;  %v2347_v8 = vld [vmem:[%s3277_s0 + $0x148] ss:$20 sps:$4 sm:$0xff]  }
  0x18   :  { %1264 = vmatprep.subr.bf16.mxu1 %v2448_v0  ;;  %v2342_v5 = vld [vmem:[%s3277_s0 + $0x144] ss:$20 sps:$4 sm:$0xff]   ;;  %v2344_v6 = vld [vmem:[%s3277_s0 + $0x14c] ss:$20 sps:$4 sm:$0xff]   ;;  %v2350_v10 = vld [vmem:[%s3277_s0 + $0x174] ss:$20 sps:$4 sm:$0xff]  }
  0x19   :  { %v2348_v9 = vld [vmem:[%s3277_s0 + $0x16c] ss:$20 sps:$4 sm:$0xff]   ;;  %v2352_v11 = vld [vmem:[%s3277_s0 + $0x168] ss:$20 sps:$4 sm:$0xff]   ;;  %v2353_v12 = vld [vmem:[%s3277_s0 + $0x170] ss:$20 sps:$4 sm:$0xff]  }
  0x1a   :  { %1057 = vmatpush1.bf16.msra.mxu0 %v2272_v13  ;;  %v2354_v13 = vld [vmem:[%s3277_s0 + $0x194] ss:$20 sps:$4 sm:$0xff]   ;;  %v2364_v19 = vld [vmem:[%s3277_s0 + $0x1b8] ss:$20 sps:$4 sm:$0xff]  }
  0x1b   :  { %1265 = vmatpush1.bf16.msra.mxu1 %v2273_v14  ;;  %1058 = vmatprep.subr.bf16.mxu0 %v2448_v0  ;;  %v2356_v14 = vld [vmem:[%s3277_s0 + $0x19c] ss:$20 sps:$4 sm:$0xff]   ;;  %v2367_v21 = vld [vmem:[%s3277_s0 + $0x1e4] ss:$20 sps:$4 sm:$0xff]  }
  0x1c   :  { %1266 = vmatprep.subr.bf16.mxu1 %v2448_v0 }
  0x1e   :  { %1059 = vmatpush1.bf16.msra.mxu0 %v2274_v15  ;;  %v2358_v15 = vld [vmem:[%s3277_s0 + $0x190] ss:$20 sps:$4 sm:$0xff]  }
  0x1f   :  { %1267 = vmatpush1.bf16.msra.mxu1 %v2275_v16  ;;  %1060 = vmatprep.subr.bf16.mxu0 %v2448_v0  ;;  %v2359_v16 = vld [vmem:[%s3277_s0 + $0x198] ss:$20 sps:$4 sm:$0xff]  }
  0x20   :  { %1268 = vmatprep.subr.bf16.mxu1 %v2448_v0 }
  0x22   :  { %1061 = vmatpush2.bf16.msra.mxu0 %v2276_v17  ;;  %v2360_v17 = vld [vmem:[%s3277_s0 + $0x1bc] ss:$20 sps:$4 sm:$0xff]  }
  0x23   :  { %1269 = vmatpush2.bf16.msra.mxu1 %v2277_v18  ;;  %1062 = vmatprep.subr.bf16.mxu0 %v2448_v0  ;;  %v2362_v18 = vld [vmem:[%s3277_s0 + $0x1c4] ss:$20 sps:$4 sm:$0xff]  }
  0x24   :  { %1270 = vmatprep.subr.bf16.mxu1 %v2448_v0 }
  0x26   :  { %1063 = vmatpush2.bf16.msra.mxu0 %v2278_v20  ;;  %v2365_v20 = vld [vmem:[%s3277_s0 + $0x1c0] ss:$20 sps:$4 sm:$0xff]  }
  0x27   :  { %1271 = vmatpush2.bf16.msra.mxu1 %v2279_v22  ;;  %1064 = vmatprep.subr.bf16.mxu0 %v2448_v0  ;;  %v2369_v22 = vld [vmem:[%s3277_s0 + $0x1ec] ss:$20 sps:$4 sm:$0xff]  }
  0x28   :  { %1272 = vmatprep.subr.bf16.mxu1 %v2448_v0 }
  0x2a   :  { %1065 = vmatpush2.bf16.msra.mxu0 %v2280_v23  ;;  %v2371_v23 = vld [vmem:[%s3277_s0 + $0x1e0] ss:$20 sps:$4 sm:$0xff]  }
  0x2b   :  { %1273 = vmatpush2.bf16.msra.mxu1 %v2281_v24  ;;  %1066 = vmatprep.subr.bf16.mxu0 %v2448_v0  ;;  %v2372_v24 = vld [vmem:[%s3277_s0 + $0x1e8] ss:$20 sps:$4 sm:$0xff]  }
  0x2c   :  { %1274 = vmatprep.subr.bf16.mxu1 %v2448_v0 }
  0x2e   :  { %1067 = vmatpush2.bf16.msra.mxu0 %v2282_v25  ;;  %v2373_v25 = vld [vmem:[%s3277_s0 + $0x20c] ss:$20 sps:$4 sm:$0xff]  }
  0x2f   :  { %1275 = vmatpush2.bf16.msra.mxu1 %v2283_v26  ;;  %1068 = vmatprep.subr.bf16.mxu0 %v2448_v0  ;;  %v2375_v26 = vld [vmem:[%s3277_s0 + $0x214] ss:$20 sps:$4 sm:$0xff]  }
  0x30   :  { %1276 = vmatprep.subr.bf16.mxu1 %v2448_v0 }
  0x32   :  { %1069 = vmatpush2.bf16.msra.mxu0 %v2284_v27  ;;  %v2377_v27 = vld [vmem:[%s3277_s0 + $0x208] ss:$20 sps:$4 sm:$0xff]  }
  0x33   :  { %1277 = vmatpush2.bf16.msra.mxu1 %v2285_v28  ;;  %1070 = vmatprep.subr.bf16.mxu0 %v2448_v0  ;;  %v2378_v28 = vld [vmem:[%s3277_s0 + $0x210] ss:$20 sps:$4 sm:$0xff]  }
  0x34   :  { %1278 = vmatprep.subr.bf16.mxu1 %v2448_v0 }
  0x36   :  { %1071 = vmatpush2.bf16.msra.mxu0 %v2286_v29  ;;  %v2379_v29 = vld [vmem:[%s3277_s0 + $0x234] ss:$20 sps:$4 sm:$0xff]  }
  0x37   :  { %1279 = vmatpush2.bf16.msra.mxu1 %v2287_v30  ;;  %1072 = vmatprep.subr.bf16.mxu0 %v2448_v0  ;;  %v2381_v30 = vld [vmem:[%s3277_s0 + $0x23c] ss:$20 sps:$4 sm:$0xff]  }
  0x38   :  { %1280 = vmatprep.subr.bf16.mxu1 %v2448_v0 }
  0x3a   :  { %1073 = vmatpush2.bf16.msra.mxu0 %v2288_v31  ;;  %v2383_v31 = vld [vmem:[%s3277_s0 + $0x230] ss:$20 sps:$4 sm:$0xff]  }
  0x3b   :  { %1281 = vmatpush2.bf16.msra.mxu1 %v2289_v32  ;;  %1074 = vmatprep.subr.bf16.mxu0 %v2448_v0  ;;  %v2384_v32 = vld [vmem:[%s3277_s0 + $0x238] ss:$20 sps:$4 sm:$0xff]  }
  0x3c   :  { %1282 = vmatprep.subr.bf16.mxu1 %v2448_v0  ;;  %v2335_v0 = vld [vmem:[%s3277_s0 + $0xf8] ss:$20 sps:$4 sm:$0xff]  }
  0x3e   :  { %1075 = vmatpush2.bf16.msra.mxu0 %v2290_v33  ;;  %v2385_v33 = vld [vmem:[%s3277_s0 + $0x25c] ss:$20 sps:$4 sm:$0xff]  }
  0x3f   :  { %1283 = vmatpush2.bf16.msra.mxu1 %v2291_v34  ;;  %2199 = vmatprep.subr.bf16.mxu0 %v2298_v35  ;;  %v2387_v34 = vld [vmem:[%s3277_s0 + $0x264] ss:$20 sps:$4 sm:$0xff]  }
  0x40   :  { %2251 = vmatprep.subr.bf16.mxu1 %v2298_v35 }
  0x41   :  { %1077 = vmatmul.mubr.bf16.vlgmr.msra.gmra.mxu0 %v2292_v36  ;;  %v2390_v36 = vld [vmem:[%s3277_s0 + $0x260] ss:$20 sps:$4 sm:$0xff]  }
  0x42   :  { %1285 = vmatmul.mubr.bf16.vlgmr.msra.gmra.mxu1 %v2295_v37  ;;  %2200 = vmatpush3.bf16.msra.mxu0 %v2298_v35  ;;  %v2391_v37 = vld [vmem:[%s3277_s0 + $0x284] ss:$20 sps:$4 sm:$0xff]  }
  0x43   :  { %1084 = vmatprep.mubr.bf16.mxu0 %v2299_v38  ;;  %1292 = vmatprep.mubr.bf16.mxu1 %v2301_v39  ;;  %v2393_v38 = vld [vmem:[%s3277_s0 + $0x28c] ss:$20 sps:$4 sm:$0xff]  }
  0x44   :  { %2255 = vmatpush3.bf16.msra.mxu1 %v2298_v35  ;;  %2201 = vmatprep.subr.bf16.mxu0 %v2329_v40  ;;  %v2389_v35 = vld [vmem:[%s3277_s0 + $0x258] ss:$20 sps:$4 sm:$0xff]   ;;  %v2395_v39 = vld [vmem:[%s3277_s0 + $0x280] ss:$20 sps:$4 sm:$0xff]  }
  0x45   :  { %2252 = vmatprep.subr.bf16.mxu1 %v2329_v40 }
  0x46   :  { %2202 = vmatpush3.bf16.msra.mxu0 %v2329_v40 }
  0x47   :  { %2203 = vmatprep.subr.bf16.mxu0 %v2366_v41 }
  0x48   :  { %2256 = vmatpush3.bf16.msra.mxu1 %v2329_v40  ;;  %v2396_v40 = vld [vmem:[%s3277_s0 + $0x288] ss:$20 sps:$4 sm:$0xff]  }
  0x49   :  { %1085 = vmatmul.mubr.bf16.gmra.mxu0 %v2303_v42  ;;  %2253 = vmatprep.subr.bf16.mxu1 %v2366_v41  ;;  %v2400_v42 = vld [vmem:[%s3277_s0 + $0x2b4] ss:$20 sps:$4 sm:$0xff]  }
  0x4a   :  { %1293 = vmatmul.mubr.bf16.gmra.mxu1 %v2304_v43  ;;  %1092 = vmatprep.mubr.bf16.mxu0 %v2305_v44  ;;  %v2402_v43 = vld [vmem:[%s3277_s0 + $0x2a8] ss:$20 sps:$4 sm:$0xff]   ;;  %v2403_v44 = vld [vmem:[%s3277_s0 + $0x2b0] ss:$20 sps:$4 sm:$0xff]  }
  0x4b   :  { %1300 = vmatprep.mubr.bf16.mxu1 %v2307_v45  ;;  %2204 = vmatpush3.bf16.msra.mxu0 %v2366_v41  ;;  %v2404_v45 = vld [vmem:[%s3277_s0 + $0x2d4] ss:$20 sps:$4 sm:$0xff]  }
  0x4c   :  { %2257 = vmatpush3.bf16.msra.mxu1 %v2366_v41  ;;  %2205 = vmatprep.subr.bf16.mxu0 %v2397_v50  ;;  %v2398_v41 = vld [vmem:[%s3277_s0 + $0x2ac] ss:$20 sps:$4 sm:$0xff]  }
  0x4d   :  { %2254 = vmatprep.subr.bf16.mxu1 %v2397_v50 }
  0x4f   :  { %2206 = vmatpush3.bf16.msra.mxu0 %v2397_v50 }
  0x50   :  { %2258 = vmatpush3.bf16.msra.mxu1 %v2397_v50  ;;  %v2412_v50 = vld [vmem:[%s3277_s0 + $0x304] ss:$20 sps:$4 sm:$0xff]  }
  0x51   :  { %1093 = vmatmul.mubr.bf16.gmra.mxu0 %v2309_v46  ;;  %v2406_v46 = vld [vmem:[%s3277_s0 + $0x2dc] ss:$20 sps:$4 sm:$0xff]  }
  0x52   :  { %1301 = vmatmul.mubr.bf16.gmra.mxu1 %v2310_v47  ;;  %1100 = vmatprep.mubr.bf16.mxu0 %v2311_v48  ;;  %v2408_v47 = vld [vmem:[%s3277_s0 + $0x2d0] ss:$20 sps:$4 sm:$0xff]   ;;  %v2409_v48 = vld [vmem:[%s3277_s0 + $0x2d8] ss:$20 sps:$4 sm:$0xff]  }
  0x53   :  { %1308 = vmatprep.mubr.bf16.mxu1 %v2313_v49  ;;  %v2410_v49 = vld [vmem:[%s3277_s0 + $0x2fc] ss:$20 sps:$4 sm:$0xff]  }
  0x59   :  { %1101 = vmatmul.mubr.bf16.gmra.mxu0 %v2315_v51  ;;  %v2414_v51 = vld [vmem:[%s3277_s0 + $0x2f8] ss:$20 sps:$4 sm:$0xff]  }
  0x5a   :  { %1309 = vmatmul.mubr.bf16.gmra.mxu1 %v2316_v52  ;;  %1108 = vmatprep.mubr.bf16.mxu0 %v2317_v53  ;;  %v2415_v52 = vld [vmem:[%s3277_s0 + $0x300] ss:$20 sps:$4 sm:$0xff]   ;;  %v2416_v53 = vld [vmem:[%s3277_s0 + $0x324] ss:$20 sps:$4 sm:$0xff]  }
  0x5b   :  { %1316 = vmatprep.mubr.bf16.mxu1 %v2319_v54  ;;  %v2418_v54 = vld [vmem:[%s3277_s0 + $0x32c] ss:$20 sps:$4 sm:$0xff]  }
  0x61   :  { %1109 = vmatmul.mubr.bf16.gmra.mxu0 %v2321_v55  ;;  %v144_v55 = vld [vmem:[%s3277_s0 + $0x348] sm:$0x11] }
  0x62   :  { %1317 = vmatmul.mubr.bf16.gmra.mxu1 %v2322_v56  ;;  %1116 = vmatprep.mubr.bf16.mxu0 %v2323_v57  ;;  %v145_v56 = vld [vmem:[%s3277_s0 + $0x350] sm:$0x11] }
  0x63   :  { %1324 = vmatprep.mubr.bf16.mxu1 %v2325_v58  ;;  %v2420_v57 = vld [vmem:[%s3277_s0 + $0x320] ss:$20 sps:$4 sm:$0xff]   ;;  %v2421_v58 = vld [vmem:[%s3277_s0 + $0x328] ss:$20 sps:$4 sm:$0xff]  }
  0x69   :  { %1117 = vmatmul.mubr.bf16.gmra.mxu0 %v2327_v59  ;;  %v2109_v59 = vcombine.high %v144_v55, %v144_v55 }
  0x6a   :  { %1325 = vmatmul.mubr.bf16.gmra.mxu1 %v2328_v60  ;;  %1124 = vmatprep.mubr.bf16.mxu0 %v2330_v61  ;;  %v2111_v60 = vcombine.high %v145_v56, %v145_v56  ;;  %v2108_v61 = vcombine.low %v144_v55, %v144_v55 }
  0x6b   :  { %1332 = vmatprep.mubr.bf16.mxu1 %v2332_v62  ;;  %v2110_v62 = vcombine.low %v145_v56, %v145_v56 }
  0x71   :  { %1125 = vmatmul.mubr.bf16.gmra.mxu0 %v2334_v63  ;;  %v2426_v63 = vld [vmem:[%s3277_s0 + $0x10] ss:$20 sps:$4 sm:$0xff]  }
  0x72   :  { %1333 = vmatmul.mubr.bf16.gmra.mxu1 %v2335_v0  ;;  %1132 = vmatprep.mubr.bf16.mxu0 %v2336_v1  ;;  %v2427_v0 = vld [vmem:[%s3277_s0 + $0x1f0] ss:$20 sps:$4 sm:$0xff]   ;;  %v2428_v1 = vld [vmem:[%s3277_s0 + $0x38] ss:$20 sps:$4 sm:$0xff]  }
  0x73   :  { %1340 = vmatprep.mubr.bf16.mxu1 %v2338_v2  ;;  %v2429_v2 = vld [vmem:[%s3277_s0 + $0x218] ss:$20 sps:$4 sm:$0xff]  }
  0x79   :  { %1133 = vmatmul.mubr.bf16.gmra.mxu0 %v2340_v3  ;;  %v2430_v3 = vld [vmem:[%s3277_s0 + $0x60] ss:$20 sps:$4 sm:$0xff]  }
  0x7a   :  { %1341 = vmatmul.mubr.bf16.gmra.mxu1 %v2341_v4  ;;  %1140 = vmatprep.mubr.bf16.mxu0 %v2342_v5  ;;  %v2431_v4 = vld [vmem:[%s3277_s0 + $0x240] ss:$20 sps:$4 sm:$0xff]   ;;  %v2432_v5 = vld [vmem:[%s3277_s0 + $0x88] ss:$20 sps:$4 sm:$0xff]  }
  0x7b   :  { %1348 = vmatprep.mubr.bf16.mxu1 %v2344_v6  ;;  %v2433_v6 = vld [vmem:[%s3277_s0 + $0x268] ss:$20 sps:$4 sm:$0xff]  }
  0x81   :  { %1141 = vmatmul.mubr.bf16.gmra.mxu0 %v2346_v7  ;;  %v2434_v7 = vld [vmem:[%s3277_s0 + $0xb0] ss:$20 sps:$4 sm:$0xff]  }
  0x82   :  { %1349 = vmatmul.mubr.bf16.gmra.mxu1 %v2347_v8  ;;  %1148 = vmatprep.mubr.bf16.mxu0 %v2348_v9  ;;  %v2435_v8 = vld [vmem:[%s3277_s0 + $0x290] ss:$20 sps:$4 sm:$0xff]   ;;  %v2436_v9 = vld [vmem:[%s3277_s0 + $0xd8] ss:$20 sps:$4 sm:$0xff]  }
  0x83   :  { %1356 = vmatprep.mubr.bf16.mxu1 %v2350_v10  ;;  %v2437_v10 = vld [vmem:[%s3277_s0 + $0x2b8] ss:$20 sps:$4 sm:$0xff]  }
  0x89   :  { %1149 = vmatmul.mubr.bf16.gmra.mxu0 %v2352_v11  ;;  %v2438_v11 = vld [vmem:[%s3277_s0 + $0x100] ss:$20 sps:$4 sm:$0xff]  }
  0x8a   :  { %1357 = vmatmul.mubr.bf16.gmra.mxu1 %v2353_v12  ;;  %1156 = vmatprep.mubr.bf16.mxu0 %v2354_v13  ;;  %v2439_v12 = vld [vmem:[%s3277_s0 + $0x2e0] ss:$20 sps:$4 sm:$0xff]  }
  0x8b   :  { %1364 = vmatprep.mubr.bf16.mxu1 %v2356_v14 }
  0x91   :  { %1157 = vmatmul.mubr.bf16.gmra.mxu0 %v2358_v15 }
  0x92   :  { %1365 = vmatmul.mubr.bf16.gmra.mxu1 %v2359_v16  ;;  %1164 = vmatprep.mubr.bf16.mxu0 %v2360_v17 }
  0x93   :  { %1372 = vmatprep.mubr.bf16.mxu1 %v2362_v18 }
  0x99   :  { %1165 = vmatmul.mubr.bf16.gmra.mxu0 %v2364_v19  ;;  %v2440_v19 = vld [vmem:[%s3277_s0 + $0x128] ss:$20 sps:$4 sm:$0xff]  }
  0x9a   :  { %1373 = vmatmul.mubr.bf16.gmra.mxu1 %v2365_v20  ;;  %1172 = vmatprep.mubr.bf16.mxu0 %v2367_v21  ;;  %v2441_v21 = vld [vmem:[%s3277_s0 + $0x308] ss:$20 sps:$4 sm:$0xff]  }
  0x9b   :  { %1380 = vmatprep.mubr.bf16.mxu1 %v2369_v22  ;;  %v2442_v22 = vld [vmem:[%s3277_s0 + $0x150] ss:$20 sps:$4 sm:$0xff]  }
  0xa1   :  { %1173 = vmatmul.mubr.bf16.gmra.mxu0 %v2371_v23 }
  0xa2   :  { %1381 = vmatmul.mubr.bf16.gmra.mxu1 %v2372_v24  ;;  %1180 = vmatprep.mubr.bf16.mxu0 %v2373_v25  ;;  %v2443_v25 = vld [vmem:[%s3277_s0 + $0x330] ss:$20 sps:$4 sm:$0xff]  }
  0xa3   :  { %1388 = vmatprep.mubr.bf16.mxu1 %v2375_v26 }
  0xa9   :  { %1181 = vmatmul.mubr.bf16.gmra.mxu0 %v2377_v27 }
  0xaa   :  { %1389 = vmatmul.mubr.bf16.gmra.mxu1 %v2378_v28  ;;  %1188 = vmatprep.mubr.bf16.mxu0 %v2379_v29 }
  0xab   :  { %1396 = vmatprep.mubr.bf16.mxu1 %v2381_v30 }
  0xb1   :  { %1189 = vmatmul.mubr.bf16.gmra.mxu0 %v2383_v31 }
  0xb2   :  { %1397 = vmatmul.mubr.bf16.gmra.mxu1 %v2384_v32  ;;  %1196 = vmatprep.mubr.bf16.mxu0 %v2385_v33  ;;  %v2444_v33 = vld [vmem:[%s3277_s0 + $0x178] ss:$20 sps:$4 sm:$0xff]  }
  0xb3   :  { %1404 = vmatprep.mubr.bf16.mxu1 %v2387_v34 }
  0xb9   :  { %1197 = vmatmul.mubr.bf16.gmra.mxu0 %v2389_v35  ;;  %v2445_v35 = vld [vmem:[%s3277_s0 + $0x358] ss:$0 sps:$4 sm:$0x11]  }
  0xba   :  { %1405 = vmatmul.mubr.bf16.gmra.mxu1 %v2390_v36  ;;  %1204 = vmatprep.mubr.bf16.mxu0 %v2391_v37  ;;  %v2446_v36 = vld [vmem:[%s3277_s0 + $0x1a0] ss:$20 sps:$4 sm:$0xff]  }
  0xbb   :  { %1412 = vmatprep.mubr.bf16.mxu1 %v2393_v38 }
  0xc1   :  { %1205 = vmatmul.mubr.bf16.gmra.mxu0 %v2395_v39 }
  0xc2   :  { %1413 = vmatmul.mubr.bf16.gmra.mxu1 %v2396_v40  ;;  %1212 = vmatprep.mubr.bf16.mxu0 %v2398_v41 }
  0xc3   :  { %1420 = vmatprep.mubr.bf16.mxu1 %v2400_v42 }
  0xc9   :  { %1213 = vmatmul.mubr.bf16.gmra.mxu0 %v2402_v43 }
  0xca   :  { %1421 = vmatmul.mubr.bf16.gmra.mxu1 %v2403_v44  ;;  %1220 = vmatprep.mubr.bf16.mxu0 %v2404_v45 }
  0xcb   :  { %1428 = vmatprep.mubr.bf16.mxu1 %v2406_v46  ;;  %v2447_v46 = vld [vmem:[%s3277_s0 + $0x1c8] ss:$20 sps:$4 sm:$0xff]  }
  0xd1   :  { %1221 = vmatmul.mubr.bf16.gmra.mxu0 %v2408_v47 }
  0xd2   :  { %1429 = vmatmul.mubr.bf16.gmra.mxu1 %v2409_v48  ;;  %1228 = vmatprep.mubr.bf16.mxu0 %v2410_v49 }
  0xd3   :  { %1436 = vmatprep.mubr.bf16.mxu1 %v2412_v50 }
  0xd9   :  { %1229 = vmatmul.mubr.bf16.gmra.mxu0 %v2414_v51 }
  0xda   :  { %1437 = vmatmul.mubr.bf16.gmra.mxu1 %v2415_v52  ;;  %1236 = vmatprep.mubr.bf16.mxu0 %v2416_v53 }
  0xdb   :  { %1444 = vmatprep.mubr.bf16.mxu1 %v2418_v54 }
  0xe1   :  { %1237 = vmatmul.mubr.bf16.gmra.mxu0 %v2420_v57 }
  0xe2   :  { %1445 = vmatmul.mubr.bf16.gmra.mxu1 %v2421_v58  ;;  %1244 = vmatprep.mubr.bf16.mxu0 %v2109_v59 }
  0xe3   :  { %1452 = vmatprep.mubr.bf16.mxu1 %v2111_v60 }
  0xe9   :  { %1245 = vmatmul.mubr.bf16.gmra.mxu0 %v2108_v61 }
  0xea   :  { %1453 = vmatmul.mubr.bf16.gmra.mxu1 %v2110_v62  ;;  %2207 = vmatprep.mubr.msk.bf16.mxu0 %vm977_vm0, %v2426_v63 }
  0xeb   :  { %2231 = vmatprep.mubr.msk.bf16.mxu1 %vm977_vm0, %v2427_v0 }
  0xf1   :  { %2208 = vmatmul.mubr.msk.bf16.vlgmr.msra.gmra.mxu0 %vm977_vm0, %v2428_v1 }
  0xf2   :  { %2232 = vmatmul.mubr.msk.bf16.vlgmr.msra.gmra.mxu1 %vm977_vm0, %v2429_v2  ;;  %2211 = vmatprep.mubr.msk.bf16.mxu0 %vm977_vm0, %v2430_v3 }
  0xf3   :  { %2235 = vmatprep.mubr.msk.bf16.mxu1 %vm977_vm0, %v2431_v4 }
  0xf9   :  { %2212 = vmatmul.mubr.msk.bf16.gmra.mxu0 %vm977_vm0, %v2432_v5 }
  0xfa   :  { %2236 = vmatmul.mubr.msk.bf16.gmra.mxu1 %vm977_vm0, %v2433_v6  ;;  %2215 = vmatprep.mubr.msk.bf16.mxu0 %vm977_vm0, %v2434_v7 }
  0xfb   :  { %2239 = vmatprep.mubr.msk.bf16.mxu1 %vm977_vm0, %v2435_v8 }
 0x101   :  { %v1078_v13 = vpop.f32.mrf.mxu0  ;;  %2216 = vmatmul.mubr.msk.bf16.gmra.mxu0 %vm977_vm0, %v2436_v9 }
 0x102   :  { %v1286_v14 = vpop.f32.mrf.mxu1  ;;  %2240 = vmatmul.mubr.msk.bf16.gmra.mxu1 %vm977_vm0, %v2437_v10  ;;  %2219 = vmatprep.mubr.msk.bf16.mxu0 %vm977_vm0, %v2438_v11 }
 0x103   :  { %v2927_v15 = vadd.f32 %v1286_v14, %v1078_v13  ;;  %v1080_v16 = vpop.f32.mrf.mxu0  ;;  %2243 = vmatprep.mubr.msk.bf16.mxu1 %vm977_vm0, %v2439_v12 }
 0x104   :  { %v1288_v17 = vpop.f32.mrf.mxu1 }
 0x105   :  { %v1081_v18 = vpop.f32.mrf.mxu0 }
 0x106   :  { %v1289_v20 = vpop.f32.mrf.mxu1 }
 0x107   :  { %v2939_v23 = vadd.f32 %v1289_v20, %v1081_v18  ;;  %v1083_v24 = vpop.f32.mrf.mxu0 }
 0x108   :  { %v1291_v26 = vpop.f32.mrf.mxu1 }
 0x109   :  { %v1086_v27 = vpop.f32.mrf.mxu0  ;;  %2220 = vmatmul.mubr.msk.bf16.gmra.mxu0 %vm977_vm0, %v2440_v19 }
 0x10a   :  { %v1294_v28 = vpop.f32.mrf.mxu1  ;;  %2244 = vmatmul.mubr.msk.bf16.gmra.mxu1 %vm977_vm0, %v2441_v21  ;;  %2223 = vmatprep.mubr.msk.bf16.mxu0 %vm977_vm0, %v2442_v22 }
 0x10b   :  { %v2947_v29 = vadd.f32 %v1294_v28, %v1086_v27  ;;  %v1088_v30 = vpop.f32.mrf.mxu0  ;;  %2247 = vmatprep.mubr.msk.bf16.mxu1 %vm977_vm0, %v2443_v25 }
 0x10c   :  { %v1296_v31 = vpop.f32.mrf.mxu1 }
 0x10d   :  { %v1089_v32 = vpop.f32.mrf.mxu0 }
 0x10e   :  { %v1297_v34 = vpop.f32.mrf.mxu1 }
 0x10f   :  { %v2959_v37 = vadd.f32 %v1297_v34, %v1089_v32  ;;  %v1091_v38 = vpop.f32.mrf.mxu0 }
 0x110   :  { %v1299_v39 = vpop.f32.mrf.mxu1 }
 0x111   :  { %v1094_v40 = vpop.f32.mrf.mxu0  ;;  %2224 = vmatmul.mubr.msk.bf16.gmra.mxu0 %vm977_vm0, %v2444_v33 }
 0x112   :  { %v1302_v41 = vpop.f32.mrf.mxu1  ;;  %2248 = vmatmul.mubr.msk.bf16.gmra.mxu1 %vm977_vm0, %v2445_v35  ;;  %2227 = vmatprep.mubr.msk.bf16.mxu0 %vm977_vm0, %v2446_v36 }
 0x113   :  { %v2964_v42 = vadd.f32 %v1302_v41, %v1094_v40  ;;  %v1096_v43 = vpop.f32.mrf.mxu0 }
 0x114   :  { %v1304_v44 = vpop.f32.mrf.mxu1 }
 0x115   :  { %v1097_v45 = vpop.f32.mrf.mxu0 }
 0x116   :  { %v1305_v47 = vpop.f32.mrf.mxu1 }
 0x117   :  { %v2969_v48 = vadd.f32 %v1305_v47, %v1097_v45  ;;  %v1099_v49 = vpop.f32.mrf.mxu0 }
 0x118   :  { %v1307_v50 = vpop.f32.mrf.mxu1 }
 0x119   :  { %v1102_v51 = vpop.f32.mrf.mxu0  ;;  %2228 = vmatmul.mubr.msk.bf16.gmra.mxu0 %vm977_vm0, %v2447_v46 }
 0x11a   :  { %v1310_v52 = vpop.f32.mrf.mxu1 }
 0x11b   :  { %v2972_v53 = vadd.f32 %v1310_v52, %v1102_v51  ;;  %v1104_v54 = vpop.f32.mrf.mxu0 }
 0x11c   :  { %v1312_v55 = vpop.f32.mrf.mxu1 }
 0x11d   :  { %v1105_v56 = vpop.f32.mrf.mxu0 }
 0x11e   :  { %v1313_v57 = vpop.f32.mrf.mxu1 }
 0x11f   :  { %v2974_v58 = vadd.f32 %v1313_v57, %v1105_v56  ;;  %v1107_v59 = vpop.f32.mrf.mxu0 }
 0x120   :  { %v1315_v60 = vpop.f32.mrf.mxu1 }
 0x121   :  { %v1110_v61 = vpop.f32.mrf.mxu0 }
 0x122   :  { %v1318_v62 = vpop.f32.mrf.mxu1 }
 0x123   :  { %v2976_v63 = vadd.f32 %v1318_v62, %v1110_v61  ;;  %v1112_v0 = vpop.f32.mrf.mxu0 }
 0x124   :  { %v1320_v1 = vpop.f32.mrf.mxu1 }
 0x125   :  { %v1113_v2 = vpop.f32.mrf.mxu0 }
 0x126   :  { %v1321_v3 = vpop.f32.mrf.mxu1 }
 0x127   :  { %v2978_v4 = vadd.f32 %v1321_v3, %v1113_v2  ;;  %v1115_v5 = vpop.f32.mrf.mxu0 }
 0x128   :  { %v1323_v6 = vpop.f32.mrf.mxu1 }
 0x129   :  { %v1118_v7 = vpop.f32.mrf.mxu0 }
 0x12a   :  { %v1326_v8 = vpop.f32.mrf.mxu1 }
 0x12b   :  { %v2980_v9 = vadd.f32 %v1326_v8, %v1118_v7  ;;  %v1120_v10 = vpop.f32.mrf.mxu0 }
 0x12c   :  { %v1328_v11 = vpop.f32.mrf.mxu1 }
 0x12d   :  { %v1121_v12 = vpop.f32.mrf.mxu0 }
 0x12e   :  { %v1329_v13 = vpop.f32.mrf.mxu1 }
 0x12f   :  { %v2982_v14 = vadd.f32 %v1329_v13, %v1121_v12  ;;  %v1123_v16 = vpop.f32.mrf.mxu0 }
 0x130   :  { %v1331_v17 = vpop.f32.mrf.mxu1 }
 0x131   :  { %v1126_v18 = vpop.f32.mrf.mxu0 }
 0x132   :  { %v1334_v19 = vpop.f32.mrf.mxu1 }
 0x133   :  { %v2984_v20 = vadd.f32 %v1334_v19, %v1126_v18  ;;  %v1128_v21 = vpop.f32.mrf.mxu0 }
 0x134   :  { %v1336_v22 = vpop.f32.mrf.mxu1 }
 0x135   :  { %v1129_v24 = vpop.f32.mrf.mxu0 }
 0x136   :  { %v1337_v25 = vpop.f32.mrf.mxu1 }
 0x137   :  { %v2986_v26 = vadd.f32 %v1337_v25, %v1129_v24  ;;  %v1131_v27 = vpop.f32.mrf.mxu0 }
 0x138   :  { %v1339_v28 = vpop.f32.mrf.mxu1 }
 0x139   :  { %v1134_v30 = vpop.f32.mrf.mxu0 }
 0x13a   :  { %v1342_v31 = vpop.f32.mrf.mxu1 }
 0x13b   :  { %v2988_v32 = vadd.f32 %v1342_v31, %v1134_v30  ;;  %v1136_v33 = vpop.f32.mrf.mxu0 }
 0x13c   :  { %v1344_v34 = vpop.f32.mrf.mxu1 }
 0x13d   :  { %v1137_v35 = vpop.f32.mrf.mxu0 }
 0x13e   :  { %v1345_v36 = vpop.f32.mrf.mxu1 }
 0x13f   :  { %v2990_v38 = vadd.f32 %v1345_v36, %v1137_v35  ;;  %v1139_v39 = vpop.f32.mrf.mxu0 }
 0x140   :  { %v1347_v40 = vpop.f32.mrf.mxu1 }
 0x141   :  { %v1142_v41 = vpop.f32.mrf.mxu0 }
 0x142   :  { %v1350_v43 = vpop.f32.mrf.mxu1 }
 0x143   :  { %v2992_v44 = vadd.f32 %v1350_v43, %v1142_v41  ;;  %v1144_v45 = vpop.f32.mrf.mxu0 }
 0x144   :  { %v1352_v46 = vpop.f32.mrf.mxu1 }
 0x145   :  { %v1145_v47 = vpop.f32.mrf.mxu0 }
 0x146   :  { %v1353_v49 = vpop.f32.mrf.mxu1 }
 0x147   :  { %v2994_v50 = vadd.f32 %v1353_v49, %v1145_v47  ;;  %v1147_v51 = vpop.f32.mrf.mxu0 }
 0x148   :  { %v1355_v52 = vpop.f32.mrf.mxu1 }
 0x149   :  { %v1150_v54 = vpop.f32.mrf.mxu0 }
 0x14a   :  { %v1358_v55 = vpop.f32.mrf.mxu1 }
 0x14b   :  { %v2996_v56 = vadd.f32 %v1358_v55, %v1150_v54  ;;  %v1152_v57 = vpop.f32.mrf.mxu0 }
 0x14c   :  { %v1360_v59 = vpop.f32.mrf.mxu1 }
 0x14d   :  { %v1153_v60 = vpop.f32.mrf.mxu0 }
 0x14e   :  { %v1361_v61 = vpop.f32.mrf.mxu1 }
 0x14f   :  { %v2998_v62 = vadd.f32 %v1361_v61, %v1153_v60  ;;  %v1155_v0 = vpop.f32.mrf.mxu0 }
 0x150   :  { %v1363_v1 = vpop.f32.mrf.mxu1 }
 0x151   :  { %v1158_v2 = vpop.f32.mrf.mxu0 }
 0x152   :  { %v1366_v3 = vpop.f32.mrf.mxu1 }
 0x153   :  { %v1160_v5 = vpop.f32.mrf.mxu0 }
 0x154   :  { %v1368_v6 = vpop.f32.mrf.mxu1 }
 0x155   :  { %v1161_v7 = vpop.f32.mrf.mxu0 }
 0x156   :  { %v1369_v8 = vpop.f32.mrf.mxu1 }
 0x157   :  { %v3000_v10 = vadd.f32 %v1369_v8, %v1161_v7  ;;  %v1163_v11 = vpop.f32.mrf.mxu0 }
 0x158   :  { %v1371_v12 = vpop.f32.mrf.mxu1 }
 0x159   :  { %3281 = vst [vmem:[#allocation3_spill] sm:$0xff] %v3000_v10  ;;  %v1166_v13 = vpop.f32.mrf.mxu0 }
 0x15a   :  { %v1374_v16 = vpop.f32.mrf.mxu1 }
 0x15b   :  { %v3002_v17 = vadd.f32 %v1374_v16, %v1166_v13  ;;  %v1168_v18 = vpop.f32.mrf.mxu0 }
 0x15c   :  { %v1376_v19 = vpop.f32.mrf.mxu1 }
 0x15d   :  { %v1169_v21 = vpop.f32.mrf.mxu0 }
 0x15e   :  { %v1377_v22 = vpop.f32.mrf.mxu1 }
 0x15f   :  { %v3004_v24 = vadd.f32 %v1377_v22, %v1169_v21  ;;  %v1171_v25 = vpop.f32.mrf.mxu0 }
 0x160   :  { %v1379_v27 = vpop.f32.mrf.mxu1 }
 0x161   :  { %3282 = vst [vmem:[#allocation4_spill] sm:$0xff] %v3004_v24  ;;  %v1174_v28 = vpop.f32.mrf.mxu0 }
 0x162   :  { %v1382_v30 = vpop.f32.mrf.mxu1 }
 0x163   :  { %v3006_v31 = vadd.f32 %v1382_v30, %v1174_v28  ;;  %v1176_v33 = vpop.f32.mrf.mxu0 }
 0x164   :  { %v1384_v34 = vpop.f32.mrf.mxu1 }
 0x165   :  { %v1177_v35 = vpop.f32.mrf.mxu0 }
 0x166   :  { %v1385_v36 = vpop.f32.mrf.mxu1 }
 0x167   :  { %v3008_v39 = vadd.f32 %v1385_v36, %v1177_v35  ;;  %v1179_v40 = vpop.f32.mrf.mxu0 }
 0x168   :  { %v1387_v41 = vpop.f32.mrf.mxu1 }
 0x169   :  { %v1182_v43 = vpop.f32.mrf.mxu0 }
 0x16a   :  { %v1390_v45 = vpop.f32.mrf.mxu1 }
 0x16b   :  { %v3010_v46 = vadd.f32 %v1390_v45, %v1182_v43  ;;  %v1184_v47 = vpop.f32.mrf.mxu0 }
 0x16c   :  { %v1392_v49 = vpop.f32.mrf.mxu1 }
 0x16d   :  { %v1185_v51 = vpop.f32.mrf.mxu0 }
 0x16e   :  { %v1393_v52 = vpop.f32.mrf.mxu1 }
 0x16f   :  { %v3012_v54 = vadd.f32 %v1393_v52, %v1185_v51  ;;  %v1187_v55 = vpop.f32.mrf.mxu0 }
 0x170   :  { %v1395_v57 = vpop.f32.mrf.mxu1 }
 0x171   :  { %v1190_v59 = vpop.f32.mrf.mxu0 }
 0x172   :  { %v1398_v60 = vpop.f32.mrf.mxu1 }
 0x173   :  { %v3014_v61 = vadd.f32 %v1398_v60, %v1190_v59  ;;  %v1192_v0 = vpop.f32.mrf.mxu0 }
 0x174   :  { %v1400_v1 = vpop.f32.mrf.mxu1 }
 0x175   :  { %v1193_v2 = vpop.f32.mrf.mxu0 }
 0x176   :  { %v1401_v3 = vpop.f32.mrf.mxu1 }
 0x177   :  { %v3016_v5 = vadd.f32 %v1401_v3, %v1193_v2  ;;  %v1195_v6 = vpop.f32.mrf.mxu0 }
 0x178   :  { %v1403_v7 = vpop.f32.mrf.mxu1 }
 0x179   :  { %v3018_v8 = vpop.f32.mrf.mxu0 }
 0x17a   :  { %v3020_v11 = vpop.f32.mrf.mxu1 }
 0x17b   :  { %v1200_v12 = vpop.f32.mrf.mxu0 }
 0x17c   :  { %v1408_v13 = vpop.f32.mrf.mxu1 }
 0x17d   :  { %v1201_v16 = vpop.f32.mrf.mxu0 }
 0x17e   :  { %v1409_v18 = vpop.f32.mrf.mxu1 }
 0x17f   :  { %v1203_v19 = vpop.f32.mrf.mxu0 }
 0x180   :  { %v1411_v21 = vpop.f32.mrf.mxu1 }
 0x181   :  { %v1206_v22 = vpop.f32.mrf.mxu0 }
 0x182   :  { %v1414_v25 = vpop.f32.mrf.mxu1 }
 0x183   :  { %v3022_v27 = vadd.f32 %v1414_v25, %v1206_v22  ;;  %v1208_v28 = vpop.f32.mrf.mxu0 }
 0x184   :  { %v1416_v30 = vpop.f32.mrf.mxu1 }
 0x185   :  { %v1209_v33 = vpop.f32.mrf.mxu0 }
 0x186   :  { %v1417_v34 = vpop.f32.mrf.mxu1 }
 0x187   :  { %v3024_v35 = vadd.f32 %v1417_v34, %v1209_v33  ;;  %v1211_v36 = vpop.f32.mrf.mxu0 }
 0x188   :  { %v1419_v40 = vpop.f32.mrf.mxu1 }
 0x189   :  { %v1214_v41 = vpop.f32.mrf.mxu0 }
 0x18a   :  { %v1422_v43 = vpop.f32.mrf.mxu1 }
 0x18b   :  { %v1216_v45 = vpop.f32.mrf.mxu0 }
 0x18c   :  { %v1424_v47 = vpop.f32.mrf.mxu1 }
 0x18d   :  { %v1217_v49 = vpop.f32.mrf.mxu0 }
 0x18e   :  { %v1425_v51 = vpop.f32.mrf.mxu1 }
 0x18f   :  { %v1219_v52 = vpop.f32.mrf.mxu0 }
 0x190   :  { %v1427_v55 = vpop.f32.mrf.mxu1 }
 0x191   :  { %v1222_v57 = vpop.f32.mrf.mxu0 }
 0x192   :  { %v1430_v59 = vpop.f32.mrf.mxu1 }
 0x193   :  { %v1224_v60 = vpop.f32.mrf.mxu0 }
 0x194   :  { %v1432_v0 = vpop.f32.mrf.mxu1 }
 0x195   :  { %v1225_v1 = vpop.f32.mrf.mxu0 }
 0x196   :  { %v1433_v2 = vpop.f32.mrf.mxu1 }
 0x197   :  { %v1227_v3 = vpop.f32.mrf.mxu0 }
 0x198   :  { %v1435_v6 = vpop.f32.mrf.mxu1 }
 0x199   :  { %v1230_v7 = vpop.f32.mrf.mxu0 }
 0x19a   :  { %v1438_v12 = vpop.f32.mrf.mxu1 }
 0x19b   :  { %v1232_v13 = vpop.f32.mrf.mxu0 }
 0x19c   :  { %v1440_v19 = vpop.f32.mrf.mxu1 }
 0x19d   :  { %v1233_v21 = vpop.f32.mrf.mxu0 }
 0x19e   :  { %v1441_v22 = vpop.f32.mrf.mxu1 }
 0x19f   :  { %v1235_v25 = vpop.f32.mrf.mxu0 }
 0x1a0   :  { %v1443_v28 = vpop.f32.mrf.mxu1  ;;  %v3029_v25 = vld [vmem:[%s3278_s2] ss:$0 sm:$0xff] }
 0x1a1   :  { %v1238_v30 = vpop.f32.mrf.mxu0 }
 0x1a2   :  { %v1446_v33 = vpop.f32.mrf.mxu1 }
 0x1a3   :  { %v1240_v34 = vpop.f32.mrf.mxu0 }
 0x1a4   :  { %v1448_v36 = vpop.f32.mrf.mxu1 }
 0x1a5   :  { %v1241_v40 = vpop.f32.mrf.mxu0  ;;  %v1407_v36 = vadd.f32 %v3020_v11, %v3018_v8  ;;  %v3050_v11 = vadd.f32 %v1433_v2, %v1225_v1 }
 0x1a6   :  { %v1449_v45 = vpop.f32.mrf.mxu1  ;;  %v3034_v40 = vadd.f32 %v1409_v18, %v1201_v16  ;;  %v3052_v16 = vadd.f32 %v1438_v12, %v1230_v7 }
 0x1a7   :  { %v1243_v47 = vpop.f32.mrf.mxu0  ;;  %v3036_v45 = vadd.f32 %v1422_v43, %v1214_v41 }
 0x1a8   :  { %v1451_v52 = vpop.f32.mrf.mxu1 }
 0x1a9   :  { %v1246_v55 = vpop.f32.mrf.mxu0 }
 0x1aa   :  { %v1454_v60 = vpop.f32.mrf.mxu1  ;;  %v3044_v55 = vadd.f32 %v1425_v51, %v1217_v49 }
 0x1ab   :  { %v1248_v0 = vpop.f32.mrf.mxu0  ;;  %v3046_v60 = vadd.f32 %v1430_v59, %v1222_v57 }
 0x1ac   :  { %v1456_v3 = vpop.f32.mrf.mxu1 }
 0x1ad   :  { %v1249_v6 = vpop.f32.mrf.mxu0 }
 0x1ae   :  { %v1457_v10 = vpop.f32.mrf.mxu1 }
 0x1af   :  { %v1250_v13 = vpop.f32.mrf.mxu0  ;;  %v3041_v10 = vld [vmem:[%s3279_s3] ss:$0 sm:$0xff] }
 0x1b0   :  { %v1458_v19 = vpop.f32.mrf.mxu1 }
 0x1b1   :  { %v2209_v24 = vpop.f32.mrf.mxu0 }
 0x1b2   :  { %v1503_v28 = vadd.f32 %v2209_v24, %v2947_v29  ;;  %v2233_v34 = vpop.f32.mrf.mxu1 }
 0x1b3   :  { %v1599_v47 = vadd.f32 %v2233_v34, %v3010_v46  ;;  %v1494_v52 = vpop.f32.mrf.mxu0  ;;  %v3056_v46 = vadd.f32 %v1441_v22, %v1233_v21 }
 0x1b4   :  { %v1677_v29 = vmul.f32 %v3029_v25, %v1503_v28  ;;  %v1495_v24 = vadd.f32 %v1494_v52, %v2927_v15  ;;  %v1590_v8 = vpop.f32.mrf.mxu1  ;;  %v3061_v15 = vadd.f32 %v1446_v33, %v1238_v30 }
 0x1b5   :  { %v1701_v18 = vmul.f32 %v3029_v25, %v1599_v47  ;;  %v1591_v41 = vadd.f32 %v1590_v8, %v3006_v31  ;;  %v2210_v43 = vpop.f32.mrf.mxu0 }
 0x1b6   :  { %v1727_v49 = vadd.f32 %v3041_v10, %v1677_v29  ;;  %v1675_v51 = vmul.f32 %v3029_v25, %v1495_v24  ;;  %v1506_v57 = vadd.f32 %v2210_v43, %v2959_v37  ;;  %v2234_v59 = vpop.f32.mrf.mxu1 }
 0x1b7   :  { %v1751_v1 = vadd.f32 %v3041_v10, %v1701_v18  ;;  %v1699_v2 = vmul.f32 %v3029_v25, %v1591_v41  ;;  %v1602_v7 = vadd.f32 %v2234_v59, %v3012_v54  ;;  %v1497_v12 = vpop.f32.mrf.mxu0 }
 0x1b8   :  { %v1770_v31 = vmax.f32 %v1727_v49, 0.0  ;;  %v1725_v21 = vadd.f32 %v3041_v10, %v1675_v51  ;;  %v1678_v22 = vmul.f32 %v3029_v25, %v1506_v57  ;;  %v1498_v0 = vadd.f32 %v1497_v12, %v2939_v23  ;;  %v1593_v3 = vpop.f32.mrf.mxu1 }
 0x1b9   :  { %v1794_v6 = vmax.f32 %v1751_v1, 0.0  ;;  %v1749_v37 = vadd.f32 %v3041_v10, %v1699_v2  ;;  %v1702_v30 = vmul.f32 %v3029_v25, %v1602_v7  ;;  %v1594_v33 = vadd.f32 %v1593_v3, %v3008_v39  ;;  %v2213_v13 = vpop.f32.mrf.mxu0 }
 0x1ba   :  { %1813 = vst.msk [vmem:[#allocation2 + $0x10] sm:$0xff] %vm977_vm0, %v1770_v31  ;;  %v1768_v54 = vmax.f32 %v1725_v21, 0.0  ;;  %v1728_v19 = vadd.f32 %v3041_v10, %v1678_v22  ;;  %v1676_v28 = vmul.f32 %v3029_v25, %v1498_v0  ;;  %v1519_v34 = vadd.f32 %v2213_v13, %v2972_v53  ;;  %v2237_v47 = vpop.f32.mrf.mxu1 }
 0x1bb   :  { %1837 = vst.msk [vmem:[#allocation2 + $0xd0] sm:$0xff] %vm977_vm0, %v1794_v6  ;;  %v1792_v23 = vmax.f32 %v1749_v37, 0.0  ;;  %v1752_v52 = vadd.f32 %v3041_v10, %v1702_v30  ;;  %v1700_v29 = vmul.f32 %v3029_v25, %v1594_v33  ;;  %v1615_v24 = vadd.f32 %v2237_v47, %v1407_v36  ;;  %v1510_v39 = vpop.f32.mrf.mxu0 }
 0x1bc   :  { %1811 = vst.msk [vmem:[#allocation2] sm:$0xff] %vm977_vm0, %v1768_v54  ;;  %v1771_v8 = vmax.f32 %v1728_v19, 0.0  ;;  %v1726_v18 = vadd.f32 %v3041_v10, %v1676_v28  ;;  %v1681_v41 = vmul.f32 %v3029_v25, %v1519_v34  ;;  %v1511_v43 = vadd.f32 %v1510_v39, %v2964_v42  ;;  %v1606_v53 = vpop.f32.mrf.mxu1 }
 0x1bd   :  { %1835 = vst.msk [vmem:[#allocation2 + $0xc0] sm:$0xff] %vm977_vm0, %v1792_v23  ;;  %v1795_v49 = vmax.f32 %v1752_v52, 0.0  ;;  %v1750_v51 = vadd.f32 %v3041_v10, %v1700_v29  ;;  %v1705_v57 = vmul.f32 %v3029_v25, %v1615_v24  ;;  %v1607_v36 = vadd.f32 %v1606_v53, %v3014_v61  ;;  %v2214_v59 = vpop.f32.mrf.mxu0 }
 0x1be   :  { %1814 = vst.msk [vmem:[#allocation2 + $0x18] sm:$0xff] %vm977_vm0, %v1771_v8  ;;  %v1769_v1 = vmax.f32 %v1726_v18, 0.0  ;;  %v1731_v2 = vadd.f32 %v3041_v10, %v1681_v41  ;;  %v1679_v7 = vmul.f32 %v3029_v25, %v1511_v43  ;;  %v1522_v42 = vadd.f32 %v2214_v59, %v2974_v58  ;;  %v2238_v12 = vpop.f32.mrf.mxu1 }
 0x1bf   :  { %1838 = vst.msk [vmem:[#allocation2 + $0xd8] sm:$0xff] %vm977_vm0, %v1795_v49  ;;  %v1793_v31 = vmax.f32 %v1750_v51, 0.0  ;;  %v1755_v21 = vadd.f32 %v3041_v10, %v1705_v57  ;;  %v1703_v22 = vmul.f32 %v3029_v25, %v1607_v36  ;;  %v1618_v61 = vadd.f32 %v2238_v12, %v3034_v40  ;;  %v1513_v0 = vpop.f32.mrf.mxu0 }
 0x1c0   :  { %1812 = vst.msk [vmem:[#allocation2 + $0x8] sm:$0xff] %vm977_vm0, %v1769_v1  ;;  %v1774_v3 = vmax.f32 %v1731_v2, 0.0  ;;  %v1729_v6 = vadd.f32 %v3041_v10, %v1679_v7  ;;  %v1682_v37 = vmul.f32 %v3029_v25, %v1522_v42  ;;  %v1514_v58 = vadd.f32 %v1513_v0, %v2969_v48  ;;  %v1609_v30 = vpop.f32.mrf.mxu1 }
 0x1c1   :  { %1836 = vst.msk [vmem:[#allocation2 + $0xc8] sm:$0xff] %vm977_vm0, %v1793_v31  ;;  %v1798_v33 = vmax.f32 %v1755_v21, 0.0  ;;  %v1753_v13 = vadd.f32 %v3041_v10, %v1703_v22  ;;  %v1706_v54 = vmul.f32 %v3029_v25, %v1618_v61  ;;  %v1610_v40 = vadd.f32 %v1609_v30, %v3016_v5  ;;  %v2217_v19 = vpop.f32.mrf.mxu0 }
 0x1c2   :  { %1817 = vst.msk [vmem:[#allocation2 + $0x30] sm:$0xff] %vm977_vm0, %v1774_v3  ;;  %v1772_v28 = vmax.f32 %v1729_v6, 0.0  ;;  %v1732_v34 = vadd.f32 %v3041_v10, %v1682_v37  ;;  %v1680_v47 = vmul.f32 %v3029_v25, %v1514_v58  ;;  %v1535_v48 = vadd.f32 %v2217_v19, %v2980_v9  ;;  %v2241_v23 = vpop.f32.mrf.mxu1 }
 0x1c3   :  { %1841 = vst.msk [vmem:[#allocation2 + $0xf0] sm:$0xff] %vm977_vm0, %v1798_v33  ;;  %v1796_v52 = vmax.f32 %v1753_v13, 0.0  ;;  %v1756_v29 = vadd.f32 %v3041_v10, %v1706_v54  ;;  %v1704_v24 = vmul.f32 %v3029_v25, %v1610_v40  ;;  %v1631_v5 = vadd.f32 %v2241_v23, %v3036_v45  ;;  %v1526_v39 = vpop.f32.mrf.mxu0 }
 0x1c4   :  { %1815 = vst.msk [vmem:[#allocation2 + $0x20] sm:$0xff] %vm977_vm0, %v1772_v28  ;;  %v1775_v8 = vmax.f32 %v1732_v34, 0.0  ;;  %v1685_v18 = vmul.f32 %v3029_v25, %v1535_v48  ;;  %v1527_v41 = vadd.f32 %v1526_v39, %v2976_v63  ;;  %v1622_v43 = vpop.f32.mrf.mxu1  ;;  %v1730_v53 = vadd.f32 %v3041_v10, %v1680_v47 }
 0x1c5   :  { %1839 = vst.msk [vmem:[#allocation2 + $0xe0] sm:$0xff] %vm977_vm0, %v1796_v52  ;;  %v1799_v9 = vmax.f32 %v1756_v29, 0.0  ;;  %v1709_v49 = vmul.f32 %v3029_v25, %v1631_v5  ;;  %v1623_v51 = vadd.f32 %v1622_v43, %v3022_v27  ;;  %v2218_v57 = vpop.f32.mrf.mxu0  ;;  %v1754_v59 = vadd.f32 %v3041_v10, %v1704_v24 }
 0x1c6   :  { %v1945_v45 = vld [vmem:[#allocation2 + $0xd0] ss:$2 sm:$0x3f]  ;;  %v1947_v36 = vld [vmem:[#allocation2 + $0xd1] ss:$2 sm:$0x3f]  ;;  %v1735_v1 = vadd.f32 %v3041_v10, %v1685_v18  ;;  %v1683_v63 = vmul.f32 %v3029_v25, %v1527_v41  ;;  %v1538_v2 = vadd.f32 %v2218_v57, %v2982_v14  ;;  %v2242_v7 = vpop.f32.mrf.mxu1 }
 0x1c7   :  { %1818 = vst.msk [vmem:[#allocation2 + $0x38] sm:$0xff] %vm977_vm0, %v1775_v8  ;;  %v1948_v42 = vmax.f32 %v1945_v45, %v1947_v36  ;;  %v1855_v12 = vld [vmem:[#allocation2] ss:$2 sm:$0x3f]  ;;  %1842 = vst.msk [vmem:[#allocation2 + $0xf8] sm:$0xff] %vm977_vm0, %v1799_v9  ;;  %v1759_v27 = vadd.f32 %v3041_v10, %v1709_v49  ;;  %v1707_v21 = vmul.f32 %v3029_v25, %v1623_v51  ;;  %v1529_v61 = vpop.f32.mrf.mxu0  ;;  %v1773_v47 = vmax.f32 %v1730_v53, 0.0 }
 0x1c8   :  { %v1857_v31 = vld [vmem:[#allocation2 + $0x1] ss:$2 sm:$0x3f]  ;;  %v1634_v22 = vadd.f32 %v2242_v7, %v3044_v55  ;;  %v1860_v3 = vld [vmem:[#allocation2 + $0xd] ss:$2 sm:$0x3f]  ;;  %v1733_v37 = vadd.f32 %v3041_v10, %v1683_v63  ;;  %v1686_v14 = vmul.f32 %v3029_v25, %v1538_v2  ;;  %v1530_v58 = vadd.f32 %v1529_v61, %v2978_v4  ;;  %v1625_v30 = vpop.f32.mrf.mxu1 }
 0x1c9   :  { %v1858_v0 = vmax.f32 %v1855_v12, %v1857_v31  ;;  %v1862_v6 = vld [vmem:[#allocation2 + $0xe] ss:$2 sm:$0x3f]  ;;  %v1940_v13 = vld [vmem:[#allocation2 + $0xc3] ss:$2 sm:$0x3f]  ;;  %v1757_v40 = vadd.f32 %v3041_v10, %v1707_v21  ;;  %v1626_v55 = vadd.f32 %v1625_v30, %v3024_v35  ;;  %v2221_v28 = vpop.f32.mrf.mxu0 }
 0x1ca   :  { %v1863_v33 = vmax.f32 %v1860_v3, %v1862_v6  ;;  %v1942_v54 = vld [vmem:[#allocation2 + $0xc4] ss:$2 sm:$0x3f]  ;;  %v1710_v19 = vmul.f32 %v3029_v25, %v1634_v22  ;;  %v1797_v48 = vmax.f32 %v1754_v59, 0.0  ;;  %v1778_v23 = vmax.f32 %v1735_v1, 0.0  ;;  %v2245_v52 = vpop.f32.mrf.mxu1  ;;  %1816 = vst.msk [vmem:[#allocation2 + $0x28] sm:$0xff] %vm977_vm0, %v1773_v47 }
 0x1cb   :  { %v1943_v34 = vmax.f32 %v1940_v13, %v1942_v54  ;;  %v3133_v24 = vld [vmem:[#allocation2 + $0x1a] ss:$2 sm:$0x3f]  ;;  %v3135_v4 = vld [vmem:[#allocation2 + $0x1b] ss:$2 sm:$0x3f]  ;;  %v1736_v5 = vadd.f32 %v3041_v10, %v1686_v14  ;;  %v1684_v8 = vmul.f32 %v3029_v25, %v1530_v58  ;;  %v1542_v18 = vpop.f32.mrf.mxu0  ;;  %v1708_v49 = vmul.f32 %v3029_v25, %v1626_v55 }
 0x1cc   :  { %v1864_v29 = vmax.f32 %v1858_v0, %v1863_v33  ;;  %v1760_v39 = vadd.f32 %v3041_v10, %v1710_v19  ;;  %1840 = vst.msk [vmem:[#allocation2 + $0xe8] sm:$0xff] %vm977_vm0, %v1797_v48  ;;  %1821 = vst.msk [vmem:[#allocation2 + $0x50] sm:$0xff] %vm977_vm0, %v1778_v23  ;;  %v1802_v35 = vmax.f32 %v1759_v27, 0.0  ;;  %v1776_v43 = vmax.f32 %v1733_v37, 0.0  ;;  %v1638_v9 = vpop.f32.mrf.mxu1 }
 0x1cd   :  { %v1949_v41 = vmax.f32 %v1943_v34, %v1948_v42  ;;  %v1734_v53 = vadd.f32 %v3041_v10, %v1684_v8  ;;  %v1551_v51 = vadd.f32 %v2221_v28, %v2988_v32  ;;  %v1647_v57 = vadd.f32 %v2245_v52, %v3052_v16  ;;  %v2222_v45 = vpop.f32.mrf.mxu0  ;;  %v1952_v33 = vld [vmem:[#allocation2 + $0xdd] ss:$2 sm:$0x3f] }
 0x1ce   :  { %1866 = vst.msk [vmem:[%s3280_s4] sm:$0x3f] %vm1865_vm1, %v1864_v29  ;;  %v1871_v36 = vmax.f32 %v3133_v24, %v3135_v4  ;;  %v3157_v59 = vld [vmem:[#allocation2 + $0x34] ss:$2 sm:$0x3f]  ;;  %v1800_v1 = vmax.f32 %v1757_v40, 0.0  ;;  %v2246_v2 = vpop.f32.mrf.mxu1  ;;  %v1758_v42 = vadd.f32 %v3041_v10, %v1708_v49  ;;  %v1543_v21 = vadd.f32 %v1542_v18, %v2984_v20 }
 0x1cf   :  { %1950 = vst.msk [vmem:[%s3280_s4 + $0x2a] sm:$0x3f] %vm1865_vm1, %v1949_v41  ;;  %v1779_v63 = vmax.f32 %v1736_v5, 0.0  ;;  %v1803_v32 = vmax.f32 %v1760_v39, 0.0  ;;  %v1777_v7 = vmax.f32 %v1734_v53, 0.0  ;;  %v1689_v12 = vmul.f32 %v3029_v25, %v1551_v51  ;;  %v1545_v27 = vpop.f32.mrf.mxu0 }
 0x1d0   :  { %1845 = vst.msk [vmem:[#allocation2 + $0x110] sm:$0xff] %vm977_vm0, %v1802_v35  ;;  %1819 = vst.msk [vmem:[#allocation2 + $0x40] sm:$0xff] %vm977_vm0, %v1776_v43  ;;  %v3161_v16 = vld [vmem:[#allocation2 + $0x35] ss:$2 sm:$0x3f]  ;;  %v1713_v31 = vmul.f32 %v3029_v25, %v1647_v57  ;;  %v1639_v22 = vadd.f32 %v1638_v9, %v3046_v60  ;;  %v1554_v61 = vadd.f32 %v2222_v45, %v2990_v38  ;;  %v1641_v3 = vpop.f32.mrf.mxu1  ;;  %v1801_v6 = vmax.f32 %v1758_v42, 0.0 }
 0x1d1   :  { %1843 = vst.msk [vmem:[#allocation2 + $0x100] sm:$0xff] %vm977_vm0, %v1800_v1  ;;  %1822 = vst.msk [vmem:[#allocation2 + $0x58] sm:$0xff] %vm977_vm0, %v1779_v63  ;;  %v1650_v0 = vadd.f32 %v2246_v2, %v3056_v46  ;;  %v1739_v37 = vadd.f32 %v3041_v10, %v1689_v12  ;;  %v1546_v58 = vadd.f32 %v1545_v27, %v2986_v26  ;;  %v2225_v30 = vpop.f32.mrf.mxu0  ;;  %v1873_v54 = vld [vmem:[#allocation2 + $0x27] ss:$2 sm:$0x3f] }
 0x1d2   :  { %1846 = vst.msk [vmem:[#allocation2 + $0x118] sm:$0xff] %vm977_vm0, %v1803_v32  ;;  %1820 = vst.msk [vmem:[#allocation2 + $0x48] sm:$0xff] %vm977_vm0, %v1777_v7  ;;  %v1763_v14 = vadd.f32 %v3041_v10, %v1713_v31  ;;  %v1883_v20 = vmax.f32 %v3157_v59, %v3161_v16  ;;  %v1687_v60 = vmul.f32 %v3029_v25, %v1543_v21  ;;  %v2249_v13 = vpop.f32.mrf.mxu1  ;;  %v1875_v40 = vld [vmem:[#allocation2 + $0x28] ss:$2 sm:$0x3f] }
 0x1d3   :  { %v1711_v38 = vmul.f32 %v3029_v25, %v1639_v22  ;;  %v1690_v46 = vmul.f32 %v3029_v25, %v1554_v61  ;;  %1844 = vst.msk [vmem:[#allocation2 + $0x108] sm:$0xff] %vm977_vm0, %v1801_v6  ;;  %v1714_v19 = vmul.f32 %v3029_v25, %v1650_v0  ;;  %v1642_v26 = vadd.f32 %v1641_v3, %v3050_v11  ;;  %v1558_v28 = vpop.f32.mrf.mxu0  ;;  %v1954_v47 = vld [vmem:[#allocation2 + $0xde] ss:$2 sm:$0x3f] }
 0x1d4   :  { %v1567_v55 = vadd.f32 %v2225_v30, %v2996_v56  ;;  %v1876_v34 = vmax.f32 %v1873_v54, %v1875_v40  ;;  %v1957_v48 = vld [vmem:[#allocation2 + $0xea] ss:$2 sm:$0x3f]  ;;  %v1737_v23 = vadd.f32 %v3041_v10, %v1687_v60  ;;  %v1688_v29 = vmul.f32 %v3029_v25, %v1546_v58  ;;  %v1654_v24 = vpop.f32.mrf.mxu1  ;;  %v1959_v5 = vld [vmem:[#allocation2 + $0xeb] ss:$2 sm:$0x3f] }
 0x1d5   :  { %v1761_v52 = vadd.f32 %v3041_v10, %v1711_v38  ;;  %v1955_v4 = vmax.f32 %v1952_v33, %v1954_v47  ;;  %v1782_v39 = vmax.f32 %v1739_v37, 0.0  ;;  %v1806_v8 = vmax.f32 %v1763_v14, 0.0  ;;  %v2226_v11 = vpop.f32.mrf.mxu0 }
 0x1d6   :  { %v1740_v18 = vadd.f32 %v3041_v10, %v1690_v46  ;;  %v1877_v41 = vmax.f32 %v1871_v36, %v1876_v34  ;;  %v1960_v56 = vmax.f32 %v1957_v48, %v1959_v5  ;;  %v1780_v35 = vmax.f32 %v1737_v23, 0.0  ;;  %v2250_v9 = vpop.f32.mrf.mxu1 }
 0x1d7   :  { %v1804_v43 = vmax.f32 %v1761_v52, 0.0  ;;  %1825 = vst.msk [vmem:[#allocation2 + $0x70] sm:$0xff] %vm977_vm0, %v1782_v39  ;;  %1849 = vst.msk [vmem:[#allocation2 + $0x130] sm:$0xff] %vm977_vm0, %v1806_v8  ;;  %v1764_v51 = vadd.f32 %v3041_v10, %v1714_v19  ;;  %v1712_v57 = vmul.f32 %v3029_v25, %v1642_v26  ;;  %v1693_v45 = vmul.f32 %v3029_v25, %v1567_v55  ;;  %v1561_v1 = vpop.f32.mrf.mxu0  ;;  %v3283_v8 = vld [vmem:[#allocation4_spill] sm:$0xff] }
 0x1d8   :  { %v1964_v53 = vld [vmem:[#allocation2 + $0xf7] ss:$2 sm:$0x3f]  ;;  %v1966_v49 = vld [vmem:[#allocation2 + $0xf8] ss:$2 sm:$0x3f]  ;;  %v1961_v36 = vmax.f32 %v1955_v4, %v1960_v56  ;;  %v1738_v63 = vadd.f32 %v3041_v10, %v1688_v29  ;;  %v1559_v32 = vadd.f32 %v1558_v28, %v2992_v44  ;;  %v1655_v2 = vadd.f32 %v1654_v24, %v3061_v15  ;;  %v1657_v7 = vpop.f32.mrf.mxu1 }
 0x1d9   :  { %1878 = vst.msk [vmem:[%s3280_s4 + $0x6] sm:$0x3f] %vm1865_vm1, %v1877_v41  ;;  %v1967_v42 = vmax.f32 %v1964_v53, %v1966_v49  ;;  %v1885_v12 = vld [vmem:[#allocation2 + $0x41] ss:$2 sm:$0x3f]  ;;  %v1762_v27 = vadd.f32 %v3041_v10, %v1712_v57  ;;  %v1743_v21 = vadd.f32 %v3041_v10, %v1693_v45  ;;  %v2229_v22 = vpop.f32.mrf.mxu0  ;;  %v1570_v6 = vadd.f32 %v2226_v11, %v2998_v62  ;;  %v3284_v11 = vld [vmem:[#allocation3_spill] sm:$0xff] }
 0x1da   :  { %1823 = vst.msk [vmem:[#allocation2 + $0x60] sm:$0xff] %vm977_vm0, %v1780_v35  ;;  %1847 = vst.msk [vmem:[#allocation2 + $0x120] sm:$0xff] %vm977_vm0, %v1804_v43  ;;  %v1887_v31 = vld [vmem:[#allocation2 + $0x42] ss:$2 sm:$0x3f]  ;;  %v1691_v44 = vmul.f32 %v3029_v25, %v1559_v32  ;;  %v1715_v15 = vmul.f32 %v3029_v25, %v1655_v2  ;;  %v1562_v30 = vadd.f32 %v1561_v1, %v2994_v50  ;;  %v1783_v13 = vmax.f32 %v1740_v18, 0.0 }
 0x1db   :  { %1962 = vst.msk [vmem:[%s3280_s4 + $0x30] sm:$0x3f] %vm1865_vm1, %v1961_v36  ;;  %v1888_v61 = vmax.f32 %v1885_v12, %v1887_v31  ;;  %v1892_v0 = vld [vmem:[#allocation2 + $0x4e] ss:$2 sm:$0x3f]  ;;  %v1583_v33 = vadd.f32 %v2229_v22, %v3002_v17  ;;  %v1574_v60 = vpop.f32.mrf.mxu0  ;;  %v1807_v54 = vmax.f32 %v1764_v51, 0.0  ;;  %v1694_v59 = vmul.f32 %v3029_v25, %v1570_v6 }
 0x1dc   :  { %v1894_v3 = vld [vmem:[#allocation2 + $0x4f] ss:$2 sm:$0x3f]  ;;  %v1969_v14 = vld [vmem:[#allocation2 + $0x104] ss:$2 sm:$0x3f]  ;;  %v1741_v62 = vadd.f32 %v3041_v10, %v1691_v44  ;;  %v1765_v17 = vadd.f32 %v3041_v10, %v1715_v15  ;;  %v1692_v28 = vmul.f32 %v3029_v25, %v1562_v30 }
 0x1dd   :  { %v1895_v37 = vmax.f32 %v1892_v0, %v1894_v3  ;;  %v1971_v58 = vld [vmem:[#allocation2 + $0x105] ss:$2 sm:$0x3f]  ;;  %v1889_v38 = vmax.f32 %v1883_v20, %v1888_v61  ;;  %v1781_v40 = vmax.f32 %v1738_v63, 0.0  ;;  %v1805_v19 = vmax.f32 %v1762_v27, 0.0  ;;  %v2230_v55 = vpop.f32.mrf.mxu0  ;;  %1826 = vst.msk [vmem:[#allocation2 + $0x78] sm:$0xff] %vm977_vm0, %v1783_v13 }
 0x1de   :  { %v1972_v46 = vmax.f32 %v1969_v14, %v1971_v58  ;;  %v1786_v26 = vmax.f32 %v1743_v21, 0.0  ;;  %1850 = vst.msk [vmem:[#allocation2 + $0x138] sm:$0xff] %vm977_vm0, %v1807_v54  ;;  %v1697_v34 = vmul.f32 %v3029_v25, %v1583_v33  ;;  %v1784_v23 = vmax.f32 %v1741_v62, 0.0  ;;  %v1976_v43 = vld [vmem:[#allocation2 + $0x111] ss:$2 sm:$0x3f] }
 0x1df   :  { %1890 = vst.msk [vmem:[%s3280_s4 + $0xc] sm:$0x3f] %vm1865_vm1, %v1889_v38  ;;  %v1577_v47 = vpop.f32.mrf.mxu0  ;;  %v1808_v52 = vmax.f32 %v1765_v17, 0.0  ;;  %v1744_v29 = vadd.f32 %v3041_v10, %v1694_v59  ;;  %v1742_v24 = vadd.f32 %v3041_v10, %v1692_v28  ;;  %v1586_v18 = vadd.f32 %v2230_v55, %v3283_v8  ;;  %v1978_v49 = vld [vmem:[#allocation2 + $0x112] ss:$2 sm:$0x3f] }
 0x1e0   :  { %v1973_v50 = vmax.f32 %v1967_v42, %v1972_v46  ;;  %1824 = vst.msk [vmem:[#allocation2 + $0x68] sm:$0xff] %vm977_vm0, %v1781_v40  ;;  %1848 = vst.msk [vmem:[#allocation2 + $0x128] sm:$0xff] %vm977_vm0, %v1805_v19  ;;  %v1747_v4 = vadd.f32 %v3041_v10, %v1697_v34  ;;  %v1578_v41 = vadd.f32 %v1577_v47, %v3284_v11 }
 0x1e1   :  { %v1897_v16 = vld [vmem:[#allocation2 + $0x5b] ss:$2 sm:$0x3f]  ;;  %v1899_v20 = vld [vmem:[#allocation2 + $0x5c] ss:$2 sm:$0x3f]  ;;  %v1698_v9 = vmul.f32 %v3029_v25, %v1586_v18  ;;  %v1979_v2 = vmax.f32 %v1976_v43, %v1978_v49 }
 0x1e2   :  { %1829 = vst.msk [vmem:[#allocation2 + $0x90] sm:$0xff] %vm977_vm0, %v1786_v26  ;;  %v1900_v48 = vmax.f32 %v1897_v16, %v1899_v20  ;;  %1827 = vst.msk [vmem:[#allocation2 + $0x80] sm:$0xff] %vm977_vm0, %v1784_v23  ;;  %v1787_v39 = vmax.f32 %v1744_v29, 0.0  ;;  %v1785_v56 = vmax.f32 %v1742_v24, 0.0  ;;  %v1790_v35 = vmax.f32 %v1747_v4, 0.0 }
 0x1e3   :  { %1974 = vst.msk [vmem:[%s3280_s4 + $0x36] sm:$0x3f] %vm1865_vm1, %v1973_v50  ;;  %v1696_v53 = vmul.f32 %v3029_v25, %v1578_v41  ;;  %v1748_v45 = vadd.f32 %v3041_v10, %v1698_v9 }
 0x1e4   :  { %v1901_v5 = vmax.f32 %v1895_v37, %v1900_v48  ;;  %1851 = vst.msk [vmem:[#allocation2 + $0x140] sm:$0xff] %vm977_vm0, %v1808_v52  ;;  %1830 = vst.msk [vmem:[#allocation2 + $0x98] sm:$0xff] %vm977_vm0, %v1787_v39  ;;  %v1909_v36 = vld [vmem:[#allocation2 + $0x75] ss:$2 sm:$0x3f] }
 0x1e5   :  { %1828 = vst.msk [vmem:[#allocation2 + $0x88] sm:$0xff] %vm977_vm0, %v1785_v56  ;;  %1833 = vst.msk [vmem:[#allocation2 + $0xb0] sm:$0xff] %vm977_vm0, %v1790_v35  ;;  %v1746_v1 = vadd.f32 %v3041_v10, %v1696_v53  ;;  %v1791_v0 = vmax.f32 %v1748_v45, 0.0 }
 0x1e6   :  { %1902 = vst.msk [vmem:[%s3280_s4 + $0x12] sm:$0x3f] %vm1865_vm1, %v1901_v5 }
 0x1e7   :  { %v1904_v51 = vld [vmem:[#allocation2 + $0x68] ss:$2 sm:$0x3f]  ;;  %v1906_v57 = vld [vmem:[#allocation2 + $0x69] ss:$2 sm:$0x3f] }
 0x1e8   :  { %v1981_v63 = vld [vmem:[#allocation2 + $0x11e] ss:$2 sm:$0x3f]  ;;  %v1983_v32 = vld [vmem:[#allocation2 + $0x11f] ss:$2 sm:$0x3f]  ;;  %v1907_v31 = vmax.f32 %v1904_v51, %v1906_v57 }
 0x1e9   :  { %v1984_v7 = vmax.f32 %v1981_v63, %v1983_v32  ;;  %v1988_v42 = vld [vmem:[#allocation2 + $0x12b] ss:$2 sm:$0x3f]  ;;  %v1990_v12 = vld [vmem:[#allocation2 + $0x12c] ss:$2 sm:$0x3f] }
 0x1ea   :  { %v1911_v25 = vld [vmem:[#allocation2 + $0x76] ss:$2 sm:$0x3f]  ;;  %v1789_v3 = vmax.f32 %v1746_v1, 0.0  ;;  %v1991_v44 = vmax.f32 %v1988_v42, %v1990_v12  ;;  %1834 = vst.msk [vmem:[#allocation2 + $0xb8] sm:$0xff] %vm977_vm0, %v1791_v0 }
 0x1eb   :  { %v1993_v27 = vld [vmem:[#allocation2 + $0x138] ss:$2 sm:$0x3f]  ;;  %v1985_v21 = vmax.f32 %v1979_v2, %v1984_v7  ;;  %v1912_v22 = vmax.f32 %v1909_v36, %v1911_v25  ;;  %v1995_v61 = vld [vmem:[#allocation2 + $0x139] ss:$2 sm:$0x3f] }
 0x1ec   :  { %v1996_v15 = vmax.f32 %v1993_v27, %v1995_v61  ;;  %v1916_v6 = vld [vmem:[#allocation2 + $0x82] ss:$2 sm:$0x3f]  ;;  %v1918_v37 = vld [vmem:[#allocation2 + $0x83] ss:$2 sm:$0x3f] }
 0x1ed   :  { %1986 = vst.msk [vmem:[%s3280_s4 + $0x3c] sm:$0x3f] %vm1865_vm1, %v1985_v21  ;;  %v1913_v10 = vmax.f32 %v1907_v31, %v1912_v22  ;;  %v1923_v58 = vld [vmem:[#allocation2 + $0x90] ss:$2 sm:$0x3f]  ;;  %v1919_v30 = vmax.f32 %v1916_v6, %v1918_v37 }
 0x1ee   :  { %1832 = vst.msk [vmem:[#allocation2 + $0xa8] sm:$0xff] %vm977_vm0, %v1789_v3  ;;  %v1997_v14 = vmax.f32 %v1991_v44, %v1996_v15  ;;  %v1921_v33 = vld [vmem:[#allocation2 + $0x8f] ss:$2 sm:$0x3f] }
 0x1ef   :  { %1914 = vst.msk [vmem:[%s3280_s4 + $0x18] sm:$0x3f] %vm1865_vm1, %v1913_v10  ;;  %v1924_v60 = vmax.f32 %v1921_v33, %v1923_v58 }
 0x1f0   :  { %1998 = vst.msk [vmem:[%s3280_s4 + $0x42] sm:$0x3f] %vm1865_vm1, %v1997_v14 }
 0x1f1   :  { %v1925_v38 = vmax.f32 %v1919_v30, %v1924_v60  ;;  %v1933_v46 = vld [vmem:[#allocation2 + $0xb6] ss:$2 sm:$0x3f]  ;;  %v1935_v13 = vld [vmem:[#allocation2 + $0xb7] ss:$2 sm:$0x3f] }
 0x1f2   :  { %v1936_v19 = vmax.f32 %v1933_v46, %v1935_v13 }
 0x1f3   :  { %1926 = vst.msk [vmem:[%s3280_s4 + $0x1e] sm:$0x3f] %vm1865_vm1, %v1925_v38 }
 0x1f5   :  { %v1928_v54 = vld [vmem:[#allocation2 + $0xa9] ss:$2 sm:$0x3f]  ;;  %v1930_v40 = vld [vmem:[#allocation2 + $0xaa] ss:$2 sm:$0x3f] }
 0x1f6   :  { %v1931_v26 = vmax.f32 %v1928_v54, %v1930_v40 }
 0x1f8   :  { %v1937_v55 = vmax.f32 %v1931_v26, %v1936_v19 }
 0x1fa   :  { %1938 = vst.msk [vmem:[%s3280_s4 + $0x24] sm:$0x3f] %vm1865_vm1, %v1937_v55 }

// kernel: cnn_encoder_forward.6
= control target key start
LH: loop header
LB: loop body
LE: loop exit
PB: predicated region body
PF: predicated region fallthrough
CT: control target
= control target key end

     0   :  { %v1084_v34 = vmov 0.0   ;;  %vm1085_vm0 = vmmov 0   ;;  %vm450_vm1 = vcmask 523264   ;;  %vm742_vm2 = vcmask 518144   ;;  %s1397_s1 = inlined_call_operand.vmem [shape: bf16[576,64], index: 1, kind: input, shape index: {}]   ;;  %s1398_s0 = inlined_call_operand.vmem [shape: bf16[1,72,576], index: 0, kind: input, shape index: {}]   ;;  %s1399_s2 = inlined_call_operand.vmem [shape: f32[1,64], index: 2, kind: input, shape index: {}]   ;;  %s1400_s3 = inlined_call_operand.vmem [shape: f32[1,64], index: 3, kind: input, shape index: {}]   ;;  %s1401_s4 = inlined_call_operand.vmem [shape: f32[1,18,64], index: 4, kind: output, shape index: {}]  }
   0x1   :  { %v1015_v0 = vld [vmem:[%s1397_s1 + $0x78] sm:$0xff]   ;;  %v1019_v4 = vld [vmem:[%s1397_s1 + $0x70] sm:$0xff]   ;;  %v1023_v8 = vld [vmem:[%s1397_s1 + $0x68] sm:$0xff]  }
   0x2   :  { %v1016_v1 = vld [vmem:[%s1397_s1 + $0xf8] sm:$0xff]   ;;  %876 = vmatprep.subr.bf16.mxu0 %v1015_v0  ;;  %v1020_v5 = vld [vmem:[%s1397_s1 + $0xf0] sm:$0xff]   ;;  %v1024_v9 = vld [vmem:[%s1397_s1 + $0xe8] sm:$0xff]  }
   0x3   :  { %v1017_v2 = vld [vmem:[%s1397_s1 + $0x38] sm:$0xff]   ;;  %922 = vmatprep.subr.bf16.mxu1 %v1016_v1  ;;  %v1021_v6 = vld [vmem:[%s1397_s1 + $0x30] sm:$0xff]   ;;  %v1025_v10 = vld [vmem:[%s1397_s1 + $0x28] sm:$0xff]  }
   0x4   :  { %v1018_v3 = vld [vmem:[%s1397_s1 + $0xb8] sm:$0xff]   ;;  %877 = vmatpush3.bf16.msra.mxu0 %v1017_v2  ;;  %v1022_v7 = vld [vmem:[%s1397_s1 + $0xb0] sm:$0xff]   ;;  %v1026_v11 = vld [vmem:[%s1397_s1 + $0xa8] sm:$0xff]  }
   0x5   :  { %923 = vmatpush3.bf16.msra.mxu1 %v1018_v3  ;;  %878 = vmatprep.subr.bf16.mxu0 %v1019_v4  ;;  %v1027_v12 = vld [vmem:[%s1397_s1 + $0x60] sm:$0xff]   ;;  %v1031_v16 = vld [vmem:[%s1397_s1 + $0x58] sm:$0xff]   ;;  %v1035_v20 = vld [vmem:[%s1397_s1 + $0x50] sm:$0xff]  }
   0x6   :  { %924 = vmatprep.subr.bf16.mxu1 %v1020_v5  ;;  %v1028_v13 = vld [vmem:[%s1397_s1 + $0xe0] sm:$0xff]   ;;  %v1032_v17 = vld [vmem:[%s1397_s1 + $0xd8] sm:$0xff]   ;;  %v1036_v21 = vld [vmem:[%s1397_s1 + $0xd0] sm:$0xff]  }
   0x7   :  { %v1029_v14 = vld [vmem:[%s1397_s1 + $0x20] sm:$0xff]   ;;  %v1033_v18 = vld [vmem:[%s1397_s1 + $0x18] sm:$0xff]   ;;  %v1037_v22 = vld [vmem:[%s1397_s1 + $0x10] sm:$0xff]  }
   0x8   :  { %879 = vmatpush3.bf16.msra.mxu0 %v1021_v6  ;;  %v1030_v15 = vld [vmem:[%s1397_s1 + $0xa0] sm:$0xff]   ;;  %v1034_v19 = vld [vmem:[%s1397_s1 + $0x98] sm:$0xff]   ;;  %v1038_v23 = vld [vmem:[%s1397_s1 + $0x90] sm:$0xff]  }
   0x9   :  { %925 = vmatpush3.bf16.msra.mxu1 %v1022_v7  ;;  %880 = vmatprep.subr.bf16.mxu0 %v1023_v8  ;;  %v1039_v24 = vld [vmem:[%s1397_s1 + $0x48] sm:$0xff]   ;;  %v1043_v28 = vld [vmem:[%s1397_s1 + $0x40] sm:$0xff]   ;;  %v1053_v37 = vld [vmem:[%s1397_s1 + $0x118] sm:$0xff]  }
   0xa   :  { %926 = vmatprep.subr.bf16.mxu1 %v1024_v9  ;;  %v1040_v25 = vld [vmem:[%s1397_s1 + $0xc8] sm:$0xff]   ;;  %v1044_v29 = vld [vmem:[%s1397_s1 + $0xc0] sm:$0xff]   ;;  %v1060_v40 = vld [vmem:[%s1397_s1 + $0x110] sm:$0xff]  }
   0xb   :  { %v1041_v26 = vld [vmem:[%s1397_s1 + $0x8] sm:$0xff]   ;;  %v1045_v30 = vld [vmem:[%s1397_s1] sm:$0xff]   ;;  %v1063_v44 = vld [vmem:[%s1398_s0 + $0x5c] ss:$20 sps:$4 sm:$0xff]  }
   0xc   :  { %881 = vmatpush3.bf16.msra.mxu0 %v1025_v10  ;;  %v1042_v27 = vld [vmem:[%s1397_s1 + $0x88] sm:$0xff]   ;;  %v1046_v31 = vld [vmem:[%s1397_s1 + $0x80] sm:$0xff]   ;;  %v1068_v49 = vld [vmem:[%s1398_s0 + $0x7c] ss:$20 sps:$4 sm:$0xff]  }
   0xd   :  { %927 = vmatpush3.bf16.msra.mxu1 %v1026_v11  ;;  %882 = vmatprep.subr.bf16.mxu0 %v1027_v12  ;;  %v1047_v32 = vld [vmem:[%s1398_s0] ss:$20 sps:$4 sm:$0xff]   ;;  %v1049_v33 = vld [vmem:[%s1398_s0 + $0x4] ss:$20 sps:$4 sm:$0xff]   ;;  %v1050_v35 = vld [vmem:[%s1398_s0 + $0x8] ss:$20 sps:$4 sm:$0xff]  }
   0xe   :  { %928 = vmatprep.subr.bf16.mxu1 %v1028_v13  ;;  %v1052_v36 = vld [vmem:[%s1398_s0 + $0xc] ss:$20 sps:$4 sm:$0xff]   ;;  %498 = vmatprep.mubr.bf16.mxu0 %v1049_v33  ;;  %v1056_v39 = vld [vmem:[%s1398_s0 + $0x34] ss:$20 sps:$4 sm:$0xff]   ;;  %v1059_v42 = vld [vmem:[%s1398_s0 + $0x30] ss:$20 sps:$4 sm:$0xff]  }
   0xf   :  { %570 = vmatprep.mubr.bf16.mxu1 %v1052_v36  ;;  %v1054_v38 = vld [vmem:[%s1398_s0 + $0x2c] ss:$20 sps:$4 sm:$0xff]   ;;  %v1058_v41 = vld [vmem:[%s1398_s0 + $0x28] ss:$20 sps:$4 sm:$0xff]   ;;  %v1065_v46 = vld [vmem:[%s1398_s0 + $0x50] ss:$20 sps:$4 sm:$0xff]  }
  0x10   :  { %883 = vmatpush3.bf16.msra.mxu0 %v1029_v14  ;;  %v1061_v43 = vld [vmem:[%s1398_s0 + $0x54] ss:$20 sps:$4 sm:$0xff]   ;;  %v1076_v47 = vld [vmem:[%s1397_s1 + $0x100] sm:$0xff]   ;;  %v1066_v48 = vld [vmem:[%s1398_s0 + $0x58] ss:$20 sps:$4 sm:$0xff]  }
  0x11   :  { %929 = vmatpush3.bf16.msra.mxu1 %v1030_v15  ;;  %884 = vmatprep.subr.bf16.mxu0 %v1031_v16  ;;  %v1067_v45 = vld [vmem:[%s1397_s1 + $0x108] sm:$0xff]   ;;  %v1070_v50 = vld [vmem:[%s1398_s0 + $0x84] ss:$20 sps:$4 sm:$0xff]   ;;  %v1073_v54 = vld [vmem:[%s1398_s0 + $0x80] ss:$20 sps:$4 sm:$0xff]  }
  0x12   :  { %930 = vmatprep.subr.bf16.mxu1 %v1032_v17  ;;  %v42_v51 = vld [vmem:[%s1398_s0 + $0xa0] sm:$0xff]  ;;  %v43_v52 = vld [vmem:[%s1398_s0 + $0xa8] sm:$0xff]  ;;  %v1082_v62 = vld [vmem:[%s1398_s0 + $0xb0] ss:$0 sps:$4 sm:$0xff]  }
  0x13   :  { %v1072_v53 = vld [vmem:[%s1398_s0 + $0x78] ss:$20 sps:$4 sm:$0xff]   ;;  %v829_v55 = vcombine.high %v42_v51, %v42_v51  ;;  %v831_v56 = vcombine.high %v43_v52, %v43_v52  ;;  %v828_v57 = vcombine.low %v42_v51, %v42_v51  ;;  %v830_v58 = vcombine.low %v43_v52, %v43_v52  ;;  %v1079_v59 = vld [vmem:[%s1398_s0 + $0x10] ss:$20 sps:$4 sm:$0xff]   ;;  %v1080_v60 = vld [vmem:[%s1398_s0 + $0x88] ss:$20 sps:$4 sm:$0xff]  }
  0x14   :  { %885 = vmatpush3.bf16.msra.mxu0 %v1033_v18  ;;  %v1081_v61 = vld [vmem:[%s1398_s0 + $0x38] ss:$20 sps:$4 sm:$0xff]   ;;  %v1083_v63 = vld [vmem:[%s1398_s0 + $0x60] ss:$20 sps:$4 sm:$0xff]  }
  0x15   :  { %931 = vmatpush3.bf16.msra.mxu1 %v1034_v19  ;;  %886 = vmatprep.subr.bf16.mxu0 %v1035_v20 }
  0x16   :  { %932 = vmatprep.subr.bf16.mxu1 %v1036_v21 }
  0x18   :  { %887 = vmatpush3.bf16.msra.mxu0 %v1037_v22 }
  0x19   :  { %933 = vmatpush3.bf16.msra.mxu1 %v1038_v23  ;;  %888 = vmatprep.subr.bf16.mxu0 %v1039_v24 }
  0x1a   :  { %934 = vmatprep.subr.bf16.mxu1 %v1040_v25 }
  0x1c   :  { %889 = vmatpush3.bf16.msra.mxu0 %v1041_v26 }
  0x1d   :  { %935 = vmatpush3.bf16.msra.mxu1 %v1042_v27  ;;  %890 = vmatprep.subr.bf16.mxu0 %v1043_v28 }
  0x1e   :  { %936 = vmatprep.subr.bf16.mxu1 %v1044_v29 }
  0x20   :  { %891 = vmatpush3.bf16.msra.mxu0 %v1045_v30 }
  0x21   :  { %937 = vmatpush3.bf16.msra.mxu1 %v1046_v31  ;;  %977 = vmatprep.subr.bf16.mxu0 %v1084_v34 }
  0x22   :  { %1005 = vmatprep.subr.bf16.mxu1 %v1084_v34 }
  0x23   :  { %499 = vmatmul.mubr.bf16.vlgmr.msra.gmra.mxu0 %v1047_v32 }
  0x24   :  { %571 = vmatmul.mubr.bf16.vlgmr.msra.gmra.mxu1 %v1050_v35  ;;  %978 = vmatpush3.bf16.msra.mxu0 %v1053_v37 }
  0x25   :  { %506 = vmatprep.mubr.bf16.mxu0 %v1054_v38  ;;  %979 = vmatprep.subr.bf16.mxu0 %v1084_v34 }
  0x26   :  { %578 = vmatprep.mubr.bf16.mxu1 %v1056_v39  ;;  %1009 = vmatpush3.bf16.msra.mxu1 %v1053_v37 }
  0x27   :  { %1006 = vmatprep.subr.bf16.mxu1 %v1084_v34 }
  0x28   :  { %980 = vmatpush3.bf16.msra.mxu0 %v1060_v40 }
  0x29   :  { %981 = vmatprep.subr.bf16.mxu0 %v1084_v34 }
  0x2a   :  { %1010 = vmatpush3.bf16.msra.mxu1 %v1060_v40 }
  0x2b   :  { %507 = vmatmul.mubr.bf16.gmra.mxu0 %v1058_v41  ;;  %1007 = vmatprep.subr.bf16.mxu1 %v1084_v34 }
  0x2c   :  { %579 = vmatmul.mubr.bf16.gmra.mxu1 %v1059_v42  ;;  %514 = vmatprep.mubr.bf16.mxu0 %v1061_v43 }
  0x2d   :  { %586 = vmatprep.mubr.bf16.mxu1 %v1063_v44  ;;  %982 = vmatpush3.bf16.msra.mxu0 %v1067_v45 }
  0x2e   :  { %983 = vmatprep.subr.bf16.mxu0 %v1084_v34  ;;  %1011 = vmatpush3.bf16.msra.mxu1 %v1067_v45 }
  0x2f   :  { %1008 = vmatprep.subr.bf16.mxu1 %v1084_v34 }
  0x31   :  { %984 = vmatpush3.bf16.msra.mxu0 %v1076_v47 }
  0x32   :  { %1012 = vmatpush3.bf16.msra.mxu1 %v1076_v47 }
  0x33   :  { %515 = vmatmul.mubr.bf16.gmra.mxu0 %v1065_v46 }
  0x34   :  { %587 = vmatmul.mubr.bf16.gmra.mxu1 %v1066_v48  ;;  %522 = vmatprep.mubr.bf16.mxu0 %v1068_v49 }
  0x35   :  { %594 = vmatprep.mubr.bf16.mxu1 %v1070_v50  ;;  %v1329_v50 = vld [vmem:[%s1399_s2] ss:$0 sm:$0xff] }
  0x3b   :  { %523 = vmatmul.mubr.bf16.gmra.mxu0 %v1072_v53 }
  0x3c   :  { %595 = vmatmul.mubr.bf16.gmra.mxu1 %v1073_v54  ;;  %530 = vmatprep.mubr.bf16.mxu0 %v829_v55 }
  0x3d   :  { %602 = vmatprep.mubr.bf16.mxu1 %v831_v56  ;;  %v1334_v56 = vld [vmem:[%s1400_s3] ss:$0 sm:$0xff] }
  0x43   :  { %531 = vmatmul.mubr.bf16.gmra.mxu0 %v828_v57 }
  0x44   :  { %603 = vmatmul.mubr.bf16.gmra.mxu1 %v830_v58  ;;  %985 = vmatprep.mubr.msk.bf16.mxu0 %vm1085_vm0, %v1084_v34 }
  0x45   :  { %997 = vmatprep.mubr.msk.bf16.mxu1 %vm1085_vm0, %v1084_v34 }
  0x4b   :  { %986 = vmatmul.mubr.msk.bf16.vlgmr.msra.gmra.mxu0 %vm450_vm1, %v1079_v59 }
  0x4c   :  { %998 = vmatmul.mubr.msk.bf16.vlgmr.msra.gmra.mxu1 %vm450_vm1, %v1080_v60  ;;  %989 = vmatprep.mubr.msk.bf16.mxu0 %vm1085_vm0, %v1084_v34 }
  0x4d   :  { %1001 = vmatprep.mubr.msk.bf16.mxu1 %vm1085_vm0, %v1084_v34 }
  0x53   :  { %990 = vmatmul.mubr.msk.bf16.gmra.mxu0 %vm450_vm1, %v1081_v61 }
  0x54   :  { %1002 = vmatmul.mubr.msk.bf16.gmra.mxu1 %vm450_vm1, %v1082_v62  ;;  %993 = vmatprep.mubr.msk.bf16.mxu0 %vm1085_vm0, %v1084_v34 }
  0x5b   :  { %994 = vmatmul.mubr.msk.bf16.gmra.mxu0 %vm450_vm1, %v1083_v63 }
  0xe3   :  { %v892_v0 = vpop.f32.mrf.mxu0 }
  0xe4   :  { %v938_v1 = vpop.f32.mrf.mxu1 }
  0xe5   :  { %v893_v2 = vpop.f32.mrf.mxu0 }
  0xe6   :  { %v939_v3 = vpop.f32.mrf.mxu1  ;;  %v894_v35 = vadd.f32 %v893_v2, %v892_v0 }
  0xe7   :  { %v895_v4 = vpop.f32.mrf.mxu0  ;;  %v940_v36 = vadd.f32 %v939_v3, %v938_v1 }
  0xe8   :  { %v941_v5 = vpop.f32.mrf.mxu1 }
  0xe9   :  { %v896_v6 = vpop.f32.mrf.mxu0  ;;  %v573_v46 = vadd.f32 %v940_v36, %v894_v35 }
  0xea   :  { %v942_v7 = vpop.f32.mrf.mxu1  ;;  %v897_v43 = vadd.f32 %v896_v6, %v895_v4 }
  0xeb   :  { %v898_v8 = vpop.f32.mrf.mxu0  ;;  %v943_v44 = vadd.f32 %v942_v7, %v941_v5 }
  0xec   :  { %v944_v9 = vpop.f32.mrf.mxu1 }
  0xed   :  { %v899_v10 = vpop.f32.mrf.mxu0  ;;  %v576_v61 = vadd.f32 %v943_v44, %v897_v43 }
  0xee   :  { %v945_v11 = vpop.f32.mrf.mxu1  ;;  %v900_v54 = vadd.f32 %v899_v10, %v898_v8 }
  0xef   :  { %v1306_v12 = vpop.f32.mrf.mxu0  ;;  %v946_v55 = vadd.f32 %v945_v11, %v944_v9 }
  0xf0   :  { %v1308_v13 = vpop.f32.mrf.mxu1 }
  0xf1   :  { %v902_v14 = vpop.f32.mrf.mxu0  ;;  %v581_v9 = vadd.f32 %v946_v55, %v900_v54 }
  0xf2   :  { %v948_v15 = vpop.f32.mrf.mxu1  ;;  %v903_v10 = vadd.f32 %v902_v14, %v1306_v12 }
  0xf3   :  { %v1310_v16 = vpop.f32.mrf.mxu0  ;;  %v949_v11 = vadd.f32 %v948_v15, %v1308_v13 }
  0xf4   :  { %v1312_v17 = vpop.f32.mrf.mxu1 }
  0xf5   :  { %v1314_v18 = vpop.f32.mrf.mxu0 }
  0xf6   :  { %v1316_v19 = vpop.f32.mrf.mxu1  ;;  %v906_v12 = vadd.f32 %v1314_v18, %v1310_v16 }
  0xf7   :  { %v1318_v20 = vpop.f32.mrf.mxu0  ;;  %v952_v13 = vadd.f32 %v1316_v19, %v1312_v17 }
  0xf8   :  { %v1320_v21 = vpop.f32.mrf.mxu1 }
  0xf9   :  { %v1322_v22 = vpop.f32.mrf.mxu0  ;;  %v589_v43 = vadd.f32 %v952_v13, %v906_v12 }
  0xfa   :  { %v1324_v23 = vpop.f32.mrf.mxu1  ;;  %v909_v44 = vadd.f32 %v1322_v22, %v1318_v20 }
  0xfb   :  { %v910_v24 = vpop.f32.mrf.mxu0 }
  0xfc   :  { %v956_v25 = vpop.f32.mrf.mxu1 }
  0xfd   :  { %v911_v26 = vpop.f32.mrf.mxu0 }
  0xfe   :  { %v957_v27 = vpop.f32.mrf.mxu1  ;;  %v912_v38 = vadd.f32 %v911_v26, %v910_v24 }
  0xff   :  { %v913_v28 = vpop.f32.mrf.mxu0  ;;  %v958_v39 = vadd.f32 %v957_v27, %v956_v25 }
 0x100   :  { %v959_v29 = vpop.f32.mrf.mxu1 }
 0x101   :  { %v914_v30 = vpop.f32.mrf.mxu0  ;;  %v597_v51 = vadd.f32 %v958_v39, %v912_v38 }
 0x102   :  { %v960_v31 = vpop.f32.mrf.mxu1  ;;  %v915_v47 = vadd.f32 %v914_v30, %v913_v28 }
 0x103   :  { %v916_v32 = vpop.f32.mrf.mxu0  ;;  %v961_v48 = vadd.f32 %v960_v31, %v959_v29 }
 0x104   :  { %v962_v33 = vpop.f32.mrf.mxu1 }
 0x105   :  { %v917_v34 = vpop.f32.mrf.mxu0  ;;  %v600_v2 = vadd.f32 %v961_v48, %v915_v47 }
 0x106   :  { %v963_v37 = vpop.f32.mrf.mxu1  ;;  %v918_v62 = vadd.f32 %v917_v34, %v916_v32 }
 0x107   :  { %v919_v40 = vpop.f32.mrf.mxu0  ;;  %v964_v63 = vadd.f32 %v963_v37, %v962_v33  ;;  %v584_v37 = vadd.f32 %v949_v11, %v903_v10 }
 0x108   :  { %v965_v41 = vpop.f32.mrf.mxu1 }
 0x109   :  { %v920_v42 = vpop.f32.mrf.mxu0  ;;  %v605_v30 = vadd.f32 %v964_v63, %v918_v62 }
 0x10a   :  { %v966_v45 = vpop.f32.mrf.mxu1 }
 0x10b   :  { %v644_v49 = vpop.f32.mrf.mxu0  ;;  %v955_v45 = vadd.f32 %v1324_v23, %v1320_v21 }
 0x10c   :  { %v645_v52 = vadd.f32 %v644_v49, %v573_v46  ;;  %v668_v53 = vpop.f32.mrf.mxu1 }
 0x10d   :  { %v669_v57 = vadd.f32 %v668_v53, %v597_v51  ;;  %v987_v58 = vpop.f32.mrf.mxu0  ;;  %v592_v21 = vadd.f32 %v955_v45, %v909_v44 }
 0x10e   :  { %v689_v59 = vmul.f32 %v1329_v50, %v645_v52  ;;  %v999_v60 = vpop.f32.mrf.mxu1 }
 0x10f   :  { %v695_v0 = vmul.f32 %v1329_v50, %v669_v57  ;;  %v647_v1 = vpop.f32.mrf.mxu0 }
 0x110   :  { %v705_v3 = vadd.f32 %v1334_v56, %v689_v59  ;;  %v648_v4 = vadd.f32 %v647_v1, %v576_v61  ;;  %v671_v5 = vpop.f32.mrf.mxu1 }
 0x111   :  { %v711_v6 = vadd.f32 %v1334_v56, %v695_v0  ;;  %v672_v7 = vadd.f32 %v671_v5, %v600_v2  ;;  %v988_v8 = vpop.f32.mrf.mxu0 }
 0x112   :  { %v714_v24 = vmax.f32 %v705_v3, 0.0  ;;  %v690_v25 = vmul.f32 %v1329_v50, %v648_v4  ;;  %v1000_v26 = vpop.f32.mrf.mxu1 }
 0x113   :  { %v720_v27 = vmax.f32 %v711_v6, 0.0  ;;  %v696_v28 = vmul.f32 %v1329_v50, %v672_v7  ;;  %v652_v29 = vpop.f32.mrf.mxu0 }
 0x114   :  { %723 = vst.msk [vmem:[#allocation2] sm:$0xff] %vm450_vm1, %v714_v24  ;;  %v706_v31 = vadd.f32 %v1334_v56, %v690_v25  ;;  %v653_v32 = vadd.f32 %v652_v29, %v581_v9  ;;  %v676_v33 = vpop.f32.mrf.mxu1 }
 0x115   :  { %729 = vst.msk [vmem:[#allocation2 + $0x30] sm:$0xff] %vm450_vm1, %v720_v27  ;;  %v712_v14 = vadd.f32 %v1334_v56, %v696_v28  ;;  %v677_v15 = vadd.f32 %v676_v33, %v605_v30  ;;  %v991_v34 = vpop.f32.mrf.mxu0 }
 0x116   :  { %v715_v35 = vmax.f32 %v706_v31, 0.0  ;;  %v691_v36 = vmul.f32 %v1329_v50, %v653_v32  ;;  %v1003_v38 = vpop.f32.mrf.mxu1 }
 0x117   :  { %v721_v39 = vmax.f32 %v712_v14, 0.0  ;;  %v697_v40 = vmul.f32 %v1329_v50, %v677_v15  ;;  %v655_v41 = vpop.f32.mrf.mxu0 }
 0x118   :  { %724 = vst.msk [vmem:[#allocation2 + $0x8] sm:$0xff] %vm450_vm1, %v715_v35  ;;  %v707_v16 = vadd.f32 %v1334_v56, %v691_v36  ;;  %v656_v17 = vadd.f32 %v655_v41, %v584_v37  ;;  %v679_v18 = vpop.f32.mrf.mxu1 }
 0x119   :  { %730 = vst.msk [vmem:[#allocation2 + $0x38] sm:$0xff] %vm450_vm1, %v721_v39  ;;  %v713_v19 = vadd.f32 %v1334_v56, %v697_v40  ;;  %v992_v42 = vpop.f32.mrf.mxu0 }
 0x11a   :  { %v716_v46 = vmax.f32 %v707_v16, 0.0  ;;  %v692_v47 = vmul.f32 %v1329_v50, %v656_v17  ;;  %v1004_v48 = vpop.f32.mrf.mxu1 }
 0x11b   :  { %v660_v49 = vpop.f32.mrf.mxu0  ;;  %v732_v51 = vld [vmem:[#allocation2] ss:$2 sm:$0x7]  ;;  %v734_v52 = vld [vmem:[#allocation2 + $0x1] ss:$2 sm:$0x7] }
 0x11c   :  { %725 = vst.msk [vmem:[#allocation2 + $0x10] sm:$0xff] %vm450_vm1, %v716_v46  ;;  %v708_v53 = vadd.f32 %v1334_v56, %v692_v47  ;;  %v661_v54 = vadd.f32 %v660_v49, %v589_v43  ;;  %v781_v55 = vld [vmem:[#allocation2 + $0x30] ss:$2 sm:$0x7]  ;;  %v722_v57 = vmax.f32 %v713_v19, 0.0  ;;  %v735_v62 = vmax.f32 %v732_v51, %v734_v52 }
 0x11d   :  { %v995_v58 = vpop.f32.mrf.mxu0  ;;  %v783_v59 = vld [vmem:[#allocation2 + $0x31] ss:$2 sm:$0x7] }
 0x11e   :  { %v717_v20 = vmax.f32 %v708_v53, 0.0  ;;  %v693_v22 = vmul.f32 %v1329_v50, %v661_v54  ;;  %731 = vst.msk [vmem:[#allocation2 + $0x40] sm:$0xff] %vm450_vm1, %v722_v57  ;;  %v784_v4 = vmax.f32 %v781_v55, %v783_v59 }
 0x11f   :  { %v737_v23 = vld [vmem:[#allocation2 + $0x6] ss:$2 sm:$0x7]  ;;  %v739_v60 = vld [vmem:[#allocation2 + $0x7] ss:$2 sm:$0x7]  ;;  %v663_v61 = vpop.f32.mrf.mxu0 }
 0x120   :  { %v740_v63 = vmax.f32 %v737_v23, %v739_v60  ;;  %v786_v0 = vld [vmem:[#allocation2 + $0x36] ss:$2 sm:$0x7]  ;;  %v788_v1 = vld [vmem:[#allocation2 + $0x37] ss:$2 sm:$0x7]  ;;  %v709_v2 = vadd.f32 %v1334_v56, %v693_v22  ;;  %v664_v3 = vadd.f32 %v663_v61, %v592_v21 }
 0x121   :  { %726 = vst.msk [vmem:[#allocation2 + $0x18] sm:$0xff] %vm450_vm1, %v717_v20  ;;  %v789_v5 = vmax.f32 %v786_v0, %v788_v1  ;;  %v996_v6 = vpop.f32.mrf.mxu0 }
 0x122   :  { %v741_v7 = vmax.f32 %v735_v62, %v740_v63  ;;  %v718_v8 = vmax.f32 %v709_v2, 0.0  ;;  %v694_v9 = vmul.f32 %v1329_v50, %v664_v3 }
 0x123   :  { %v790_v10 = vmax.f32 %v784_v4, %v789_v5  ;;  %v745_v11 = vld [vmem:[#allocation2 + $0xc] ss:$2 sm:$0x7]  ;;  %v747_v24 = vld [vmem:[#allocation2 + $0xd] ss:$2 sm:$0x7] }
 0x124   :  { %743 = vst.msk [vmem:[%s1401_s4] sm:$0x7] %vm742_vm2, %v741_v7  ;;  %v748_v25 = vmax.f32 %v745_v11, %v747_v24  ;;  %v750_v26 = vld [vmem:[#allocation2 + $0x12] ss:$2 sm:$0x7]  ;;  %v710_v50 = vadd.f32 %v1334_v56, %v694_v9 }
 0x125   :  { %v752_v27 = vld [vmem:[#allocation2 + $0x13] ss:$2 sm:$0x7]  ;;  %727 = vst.msk [vmem:[#allocation2 + $0x20] sm:$0xff] %vm450_vm1, %v718_v8 }
 0x126   :  { %791 = vst.msk [vmem:[%s1401_s4 + $0xc] sm:$0x7] %vm742_vm2, %v790_v10  ;;  %v753_v28 = vmax.f32 %v750_v26, %v752_v27  ;;  %v793_v29 = vld [vmem:[#allocation2 + $0x3c] ss:$2 sm:$0x7]  ;;  %v719_v34 = vmax.f32 %v710_v50, 0.0 }
 0x127   :  { %v795_v30 = vld [vmem:[#allocation2 + $0x3d] ss:$2 sm:$0x7]  ;;  %v798_v33 = vld [vmem:[#allocation2 + $0x42] ss:$2 sm:$0x7] }
 0x128   :  { %v754_v31 = vmax.f32 %v748_v25, %v753_v28  ;;  %v796_v32 = vmax.f32 %v793_v29, %v795_v30  ;;  %v800_v12 = vld [vmem:[#allocation2 + $0x43] ss:$2 sm:$0x7]  ;;  %v757_v14 = vld [vmem:[#allocation2 + $0x18] ss:$2 sm:$0x7] }
 0x129   :  { %v801_v13 = vmax.f32 %v798_v33, %v800_v12  ;;  %v759_v15 = vld [vmem:[#allocation2 + $0x19] ss:$2 sm:$0x7]  ;;  %728 = vst.msk [vmem:[#allocation2 + $0x28] sm:$0xff] %vm450_vm1, %v719_v34 }
 0x12a   :  { %755 = vst.msk [vmem:[%s1401_s4 + $0x3] sm:$0x7] %vm742_vm2, %v754_v31  ;;  %v760_v56 = vmax.f32 %v757_v14, %v759_v15 }
 0x12b   :  { %v802_v35 = vmax.f32 %v796_v32, %v801_v13 }
 0x12c   :  { %v762_v36 = vld [vmem:[#allocation2 + $0x1e] ss:$2 sm:$0x7]  ;;  %v764_v37 = vld [vmem:[#allocation2 + $0x1f] ss:$2 sm:$0x7] }
 0x12d   :  { %803 = vst.msk [vmem:[%s1401_s4 + $0xf] sm:$0x7] %vm742_vm2, %v802_v35  ;;  %v765_v38 = vmax.f32 %v762_v36, %v764_v37 }
 0x12f   :  { %v766_v39 = vmax.f32 %v760_v56, %v765_v38 }
 0x130   :  { %v769_v40 = vld [vmem:[#allocation2 + $0x24] ss:$2 sm:$0x7]  ;;  %v771_v41 = vld [vmem:[#allocation2 + $0x25] ss:$2 sm:$0x7] }
 0x131   :  { %767 = vst.msk [vmem:[%s1401_s4 + $0x6] sm:$0x7] %vm742_vm2, %v766_v39  ;;  %v772_v16 = vmax.f32 %v769_v40, %v771_v41  ;;  %v774_v17 = vld [vmem:[#allocation2 + $0x2a] ss:$2 sm:$0x7] }
 0x132   :  { %v776_v18 = vld [vmem:[#allocation2 + $0x2b] ss:$2 sm:$0x7] }
 0x133   :  { %v777_v19 = vmax.f32 %v774_v17, %v776_v18 }
 0x135   :  { %v778_v42 = vmax.f32 %v772_v16, %v777_v19 }
 0x137   :  { %779 = vst.msk [vmem:[%s1401_s4 + $0x9] sm:$0x7] %vm742_vm2, %v778_v42 }

// kernel: cnn_encoder_forward.7
= control target key start
LH: loop header
LB: loop body
LE: loop exit
PB: predicated region body
PF: predicated region fallthrough
CT: control target
= control target key end

     0   :  { %s933_s0 = inlined_call_operand.vmem [shape: bf16[1,18,576], index: 0, kind: input, shape index: {}]   ;;  %s934_s1 = inlined_call_operand.vmem [shape: bf16[576,64], index: 1, kind: input, shape index: {}]   ;;  %s935_s2 = inlined_call_operand.vmem [shape: f32[1,64], index: 2, kind: input, shape index: {}]   ;;  %s936_s3 = inlined_call_operand.vmem [shape: f32[1,64], index: 3, kind: input, shape index: {}]   ;;  %s937_s4 = inlined_call_operand.hbm [shape: f32[1,2,64], index: 4, kind: output, shape index: {}]  }
   0x1   :  { %v692_v0 = vld [vmem:[%s934_s1 + $0x78] sm:$0xff]   ;;  %v696_v4 = vld [vmem:[%s934_s1 + $0x70] sm:$0xff]   ;;  %v700_v8 = vld [vmem:[%s934_s1 + $0x68] sm:$0xff]  }
   0x2   :  { %v693_v1 = vld [vmem:[%s934_s1 + $0xf8] sm:$0xff]   ;;  %617 = vmatprep.subr.bf16.mxu0 %v692_v0  ;;  %v697_v5 = vld [vmem:[%s934_s1 + $0xf0] sm:$0xff]   ;;  %v701_v9 = vld [vmem:[%s934_s1 + $0xe8] sm:$0xff]  }
   0x3   :  { %v694_v2 = vld [vmem:[%s934_s1 + $0x38] sm:$0xff]   ;;  %645 = vmatprep.subr.bf16.mxu1 %v693_v1  ;;  %v698_v6 = vld [vmem:[%s934_s1 + $0x30] sm:$0xff]   ;;  %v702_v10 = vld [vmem:[%s934_s1 + $0x28] sm:$0xff]  }
   0x4   :  { %v695_v3 = vld [vmem:[%s934_s1 + $0xb8] sm:$0xff]   ;;  %618 = vmatpush3.bf16.msra.mxu0 %v694_v2  ;;  %v699_v7 = vld [vmem:[%s934_s1 + $0xb0] sm:$0xff]   ;;  %v703_v11 = vld [vmem:[%s934_s1 + $0xa8] sm:$0xff]  }
   0x5   :  { %646 = vmatpush3.bf16.msra.mxu1 %v695_v3  ;;  %619 = vmatprep.subr.bf16.mxu0 %v696_v4  ;;  %v704_v12 = vld [vmem:[%s934_s1 + $0x60] sm:$0xff]   ;;  %v708_v16 = vld [vmem:[%s934_s1 + $0x58] sm:$0xff]   ;;  %v712_v20 = vld [vmem:[%s934_s1 + $0x50] sm:$0xff]  }
   0x6   :  { %647 = vmatprep.subr.bf16.mxu1 %v697_v5  ;;  %v705_v13 = vld [vmem:[%s934_s1 + $0xe0] sm:$0xff]   ;;  %v709_v17 = vld [vmem:[%s934_s1 + $0xd8] sm:$0xff]   ;;  %v713_v21 = vld [vmem:[%s934_s1 + $0xd0] sm:$0xff]  }
   0x7   :  { %v706_v14 = vld [vmem:[%s934_s1 + $0x20] sm:$0xff]   ;;  %v710_v18 = vld [vmem:[%s934_s1 + $0x18] sm:$0xff]   ;;  %v714_v22 = vld [vmem:[%s934_s1 + $0x10] sm:$0xff]  }
   0x8   :  { %620 = vmatpush3.bf16.msra.mxu0 %v698_v6  ;;  %v707_v15 = vld [vmem:[%s934_s1 + $0xa0] sm:$0xff]   ;;  %v711_v19 = vld [vmem:[%s934_s1 + $0x98] sm:$0xff]   ;;  %v715_v23 = vld [vmem:[%s934_s1 + $0x90] sm:$0xff]  }
   0x9   :  { %648 = vmatpush3.bf16.msra.mxu1 %v699_v7  ;;  %621 = vmatprep.subr.bf16.mxu0 %v700_v8  ;;  %v716_v24 = vld [vmem:[%s934_s1 + $0x48] sm:$0xff]   ;;  %v720_v28 = vld [vmem:[%s934_s1 + $0x40] sm:$0xff]   ;;  %v730_v36 = vld [vmem:[%s934_s1 + $0x118] sm:$0xff]  }
   0xa   :  { %649 = vmatprep.subr.bf16.mxu1 %v701_v9  ;;  %v717_v25 = vld [vmem:[%s934_s1 + $0xc8] sm:$0xff]   ;;  %v721_v29 = vld [vmem:[%s934_s1 + $0xc0] sm:$0xff]   ;;  %v731_v37 = vld [vmem:[%s934_s1 + $0x110] sm:$0xff]  }
   0xb   :  { %v718_v26 = vld [vmem:[%s934_s1 + $0x8] sm:$0xff]   ;;  %v722_v30 = vld [vmem:[%s934_s1] sm:$0xff]   ;;  %v26_v40 = vld [vmem:[%s933_s0 + $0x30] sm:$0x11] }
   0xc   :  { %622 = vmatpush3.bf16.msra.mxu0 %v702_v10  ;;  %v719_v27 = vld [vmem:[%s934_s1 + $0x88] sm:$0xff]   ;;  %v723_v31 = vld [vmem:[%s934_s1 + $0x80] sm:$0xff]   ;;  %v575_v41 = vcombine.high %v26_v40, %v26_v40 }
   0xd   :  { %650 = vmatpush3.bf16.msra.mxu1 %v703_v11  ;;  %623 = vmatprep.subr.bf16.mxu0 %v704_v12  ;;  %v724_v32 = vld [vmem:[%s933_s0] ss:$20 sps:$4 sm:$0xff]   ;;  %v726_v33 = vld [vmem:[%s933_s0 + $0x4] ss:$20 sps:$4 sm:$0xff]   ;;  %v727_v34 = vld [vmem:[%s933_s0 + $0x8] ss:$20 sps:$4 sm:$0xff]  }
   0xe   :  { %651 = vmatprep.subr.bf16.mxu1 %v705_v13  ;;  %v729_v35 = vld [vmem:[%s933_s0 + $0xc] ss:$20 sps:$4 sm:$0xff]   ;;  %397 = vmatprep.mubr.bf16.mxu0 %v726_v33 }
   0xf   :  { %445 = vmatprep.mubr.bf16.mxu1 %v729_v35  ;;  %v25_v38 = vld [vmem:[%s933_s0 + $0x28] sm:$0x11] }
  0x10   :  { %624 = vmatpush3.bf16.msra.mxu0 %v706_v14  ;;  %v573_v39 = vcombine.high %v25_v38, %v25_v38  ;;  %v736_v42 = vld [vmem:[%s934_s1 + $0x108] sm:$0xff]   ;;  %v572_v43 = vcombine.low %v25_v38, %v25_v38 }
  0x11   :  { %652 = vmatpush3.bf16.msra.mxu1 %v707_v15  ;;  %625 = vmatprep.subr.bf16.mxu0 %v708_v16 }
  0x12   :  { %653 = vmatprep.subr.bf16.mxu1 %v709_v17 }
  0x14   :  { %626 = vmatpush3.bf16.msra.mxu0 %v710_v18 }
  0x15   :  { %654 = vmatpush3.bf16.msra.mxu1 %v711_v19  ;;  %627 = vmatprep.subr.bf16.mxu0 %v712_v20 }
  0x16   :  { %655 = vmatprep.subr.bf16.mxu1 %v713_v21 }
  0x18   :  { %628 = vmatpush3.bf16.msra.mxu0 %v714_v22 }
  0x19   :  { %656 = vmatpush3.bf16.msra.mxu1 %v715_v23  ;;  %629 = vmatprep.subr.bf16.mxu0 %v716_v24 }
  0x1a   :  { %657 = vmatprep.subr.bf16.mxu1 %v717_v25 }
  0x1c   :  { %630 = vmatpush3.bf16.msra.mxu0 %v718_v26 }
  0x1d   :  { %658 = vmatpush3.bf16.msra.mxu1 %v719_v27  ;;  %631 = vmatprep.subr.bf16.mxu0 %v720_v28 }
  0x1e   :  { %659 = vmatprep.subr.bf16.mxu1 %v721_v29 }
  0x20   :  { %632 = vmatpush3.bf16.msra.mxu0 %v722_v30 }
  0x21   :  { %660 = vmatpush3.bf16.msra.mxu1 %v723_v31  ;;  %679 = vmatprep.subr.bf16.mxu0 %v730_v36 }
  0x23   :  { %398 = vmatmul.mubr.bf16.vlgmr.msra.gmra.mxu0 %v724_v32 }
  0x24   :  { %446 = vmatmul.mubr.bf16.vlgmr.msra.gmra.mxu1 %v727_v34  ;;  %680 = vmatpush3.bf16.msra.mxu0 %v730_v36 }
  0x25   :  { %681 = vmatprep.subr.bf16.mxu0 %v731_v37  ;;  %405 = vmatprep.mubr.bf16.mxu0 %v573_v39 }
  0x26   :  { %453 = vmatprep.mubr.bf16.mxu1 %v575_v41 }
  0x27   :  { %9 = vsyncpa [#allocation4], 0  ;;  %v574_v44 = vcombine.low %v26_v40, %v26_v40  ;;  %v738_v45 = vld [vmem:[%s933_s0 + $0x10] ss:$20 sps:$4 sm:$0xff]   ;;  %vm358_vm0 = vcmask 523264   ;;  %vm543_vm1 = vcmask 516096  }
  0x28   :  { %682 = vmatpush3.bf16.msra.mxu0 %v731_v37  ;;  %v737_v46 = vld [vmem:[%s934_s1 + $0x100] sm:$0xff]   ;;  %v739_v47 = vld [vmem:[%s933_s0 + $0x38] ss:$0 sps:$4 sm:$0x11]  }
  0x29   :  { %683 = vmatprep.subr.bf16.mxu0 %v736_v42  ;;  %v615_v3 = vld [vmem:[%s935_s2] ss:$0 sm:$0xff]  ;;  %s762_s2 = smov [#allocation3]  }
  0x2a   :  { %v616_v7 = vld [vmem:[%s936_s3] ss:$0 sm:$0xff]  ;;  %s559_s3 = sshll.u32 %s762_s2, 4  ;;  %s560_s3 = int_to_ptr.vmem [resolvable:$true] %s559_s3 }
  0x2b   :  { %406 = vmatmul.mubr.bf16.gmra.mxu0 %v572_v43  ;;  %s740_s27 = scalar_lea.vmem %s560_s3, 32  ;;  %p745_p1 = scmp.lt.s32.totalorder %s560_s3, %s560_s3 }
  0x2c   :  { %454 = vmatmul.mubr.bf16.gmra.mxu1 %v574_v44  ;;  %687 = vmatprep.mubr.msk.bf16.mxu0 %vm358_vm0, %v738_v45  ;;  %p741_p0 = scmp.ne.s32.totalorder %s560_s3, %s740_s27  ;;  %p746_p2 = scmp.lt.s32.totalorder %s740_s27, %s740_s27 }
  0x2d   :  { %684 = vmatpush3.bf16.msra.mxu0 %v736_v42 }
  0x2e   :  { %685 = vmatprep.subr.bf16.mxu0 %v737_v46  ;;  %p747_p3 = por %p746_p2, %p745_p1 }
  0x30   :  { %p748_p4 = pnand %p747_p3, %p741_p0 }
  0x31   :  { %686 = vmatpush3.bf16.msra.mxu0 %v737_v46 }
  0x34   :  { %688 = vmatmul.mubr.msk.bf16.vlgmr.msra.gmra.mxu0 %vm358_vm0, %v739_v47 }
  0xe3   :  { %v633_v48 = vpop.f32.mrf.mxu0 }
  0xe4   :  { %v661_v49 = vpop.f32.mrf.mxu1 }
  0xe5   :  { %v634_v50 = vpop.f32.mrf.mxu0 }
  0xe6   :  { %v662_v51 = vpop.f32.mrf.mxu1  ;;  %v635_v62 = vadd.f32 %v634_v50, %v633_v48 }
  0xe7   :  { %v636_v52 = vpop.f32.mrf.mxu0  ;;  %v663_v63 = vadd.f32 %v662_v51, %v661_v49 }
  0xe8   :  { %v664_v53 = vpop.f32.mrf.mxu1 }
  0xe9   :  { %v637_v54 = vpop.f32.mrf.mxu0  ;;  %v448_v6 = vadd.f32 %v663_v63, %v635_v62 }
  0xea   :  { %v665_v55 = vpop.f32.mrf.mxu1  ;;  %v638_v4 = vadd.f32 %v637_v54, %v636_v52 }
  0xeb   :  { %v639_v56 = vpop.f32.mrf.mxu0  ;;  %v666_v5 = vadd.f32 %v665_v55, %v664_v53 }
  0xec   :  { %v667_v57 = vpop.f32.mrf.mxu1 }
  0xed   :  { %v640_v58 = vpop.f32.mrf.mxu0  ;;  %v451_v12 = vadd.f32 %v666_v5, %v638_v4 }
  0xee   :  { %v668_v59 = vpop.f32.mrf.mxu1 }
  0xef   :  { %v642_v60 = vpop.f32.mrf.mxu0 }
  0xf0   :  { %v670_v61 = vpop.f32.mrf.mxu1 }
  0xf1   :  { %v643_v0 = vpop.f32.mrf.mxu0 }
  0xf2   :  { %v671_v1 = vpop.f32.mrf.mxu1 }
  0xf4   :  { %v689_v2 = vpop.f32.mrf.mxu0 }
  0xf6   :  { %v495_v8 = vpop.f32.mrf.mxu0 }
  0xf7   :  { %v496_v9 = vadd.f32 %v495_v8, %v448_v6 }
  0xf8   :  { %v690_v10 = vpop.f32.mrf.mxu0 }
  0xf9   :  { %v516_v11 = vmul.f32 %v615_v3, %v496_v9 }
  0xfa   :  { %v498_v13 = vpop.f32.mrf.mxu0 }
  0xfb   :  { %v526_v14 = vadd.f32 %v616_v7, %v516_v11  ;;  %v499_v15 = vadd.f32 %v498_v13, %v451_v12 }
  0xfd   :  { %v529_v16 = vmax.f32 %v526_v14, 0.0  ;;  %v517_v17 = vmul.f32 %v615_v3, %v499_v15 }
  0xff   :  { %532 = vst.msk [vmem:[#allocation2] sm:$0xff] %vm358_vm0, %v529_v16  ;;  %v527_v18 = vadd.f32 %v616_v7, %v517_v17 }
 0x101   :  { %v530_v19 = vmax.f32 %v527_v18, 0.0 }
 0x103   :  { %533 = vst.msk [vmem:[#allocation2 + $0x8] sm:$0xff] %vm358_vm0, %v530_v19 }
 0x106   :  { %v536_v20 = vld [vmem:[#allocation2] sm:$0x1]  ;;  %v537_v21 = vld [vmem:[#allocation2 + $0x1] sm:$0x1]  ;;  %v539_v22 = vld [vmem:[#allocation2 + $0x3] sm:$0x1] }
 0x107   :  { %v538_v23 = vmax.f32 %v536_v20, %v537_v21  ;;  %v540_v24 = vld [vmem:[#allocation2 + $0x4] sm:$0x1] }
 0x108   :  { %v541_v25 = vmax.f32 %v539_v22, %v540_v24 }
 0x10a   :  { %v542_v26 = vmax.f32 %v538_v23, %v541_v25  ;;  %v545_v27 = vld [vmem:[#allocation2 + $0x9] sm:$0x1]  ;;  %v546_v28 = vld [vmem:[#allocation2 + $0xa] sm:$0x1]  ;;  %v548_v29 = vld [vmem:[#allocation2 + $0xc] sm:$0x1] }
 0x10b   :  { %v547_v30 = vmax.f32 %v545_v27, %v546_v28  ;;  %v549_v31 = vld [vmem:[#allocation2 + $0xd] sm:$0x1] }
 0x10c   :  { %544 = vst.msk [vmem:[#allocation3] sm:$0x1] %vm543_vm1, %v542_v26  ;;  %v550_v32 = vmax.f32 %v548_v29, %v549_v31 }
 0x10e   :  { %v551_v33 = vmax.f32 %v547_v30, %v550_v32 }
 0x110   :  { %552 = vst.msk [vmem:[#allocation3 + $0x1] sm:$0x1] %vm543_vm1, %v551_v33 }
 0x111   :  { %751 = shalt.err (!%p748_p4)
}
 0x112   :  { %562 = dma.vmem_to_hbm [thread:$0]  %s560_s3, 32, %s937_s4, [#allocation4]  }
 0x113   :  { %760 = dma.done.wait [#allocation4], 32  }
 0x114   :  { %761 = vsyncadd [#allocation4], 4294967264 }
 0x115   :  { %566 = vsyncpa [#allocation4], 1 }

</bundles_post_ra>
